<compile_context>
chip_gen: v7x
topology: tpu7x:2x2x1
jax: 0.10.0
libtpu: 0.0.40
codegen_flags: <defaults>
</compile_context>

<pallas_src>
import functools
import math

import jax
import jax.numpy as jnp
from jax.experimental import pallas as pl
from jax.experimental.pallas import tpu as pltpu


_NEG_INF = -1e30            # finite "masked" logit (causal diagonal guarantees >=1 live key)
_MXU_DTYPE = jnp.bfloat16   # MXU input precision (accumulation stays f32)


def _layernorm(x, gamma, beta, eps=1e-5):
    # PyTorch nn.LayerNorm: biased variance over last dim, eps inside sqrt.
    mean = jnp.mean(x, axis=-1, keepdims=True)
    var = jnp.mean((x - mean) ** 2, axis=-1, keepdims=True)
    return (x - mean) * jax.lax.rsqrt(var + eps) * gamma + beta


def _gelu_exact(x):
    # nn.GELU() default (approximate='none'): 0.5*x*(1+erf(x/sqrt(2)))
    return 0.5 * x * (1.0 + jax.lax.erf(x * 0.7071067811865476))


def transformer_block_kernel(
    x_ref,                     # (1, T, C)  full sequence of this batch element
    ln1_g_ref, ln1_b_ref,      # (1, C) f32
    wq_ref, bq_ref,            # (C, C) bf16 / (1, C) f32   (1/sqrt(dh) folded in)
    wkv_ref, bkv_ref,          # (C, 2C) bf16 / (1, 2C) f32  fused [K | V]
    wp_ref, bp_ref,            # (n_head, dh, C) bf16 / (1, C) f32
    ln2_g_ref, ln2_b_ref,      # (1, C) f32
    w1_ref, b1_ref,            # (C, 4C) bf16 / (1, 4C) f32
    w2_ref, b2_ref,            # (4C, C) bf16 / (1, C) f32
    out_ref,                   # (1, tq, C)
    k_ref, v_ref,              # VMEM scratch (n_head, T, dh) bf16 — persists across q tiles
    *, n_head, q_tile,
):
    qi = pl.program_id(1)
    T = x_ref.shape[1]
    C = x_ref.shape[2]
    dh = C // n_head
    mm = _MXU_DTYPE

    # ---- K/V for the whole sequence: computed once per batch element on the
    # first query tile, chunked over row slabs (bounds f32 transients), and
    # stored pre-split per head so the q-tile hot path never relayouts it.
    # NOTE: correctness relies on the qi grid axis staying "arbitrary"
    # (sequential per core), so scratch written at qi==0 is visible at qi>0.
    @pl.when(qi == 0)
    def _compute_kv():
        n_chunks = T // q_tile

        @pl.loop(0, n_chunks)
        def _(c):
            r0 = pl.multiple_of(c * q_tile, q_tile)
            xc = x_ref[0, pl.ds(r0, q_tile), :]                       # (tq, C) f32
            hc = _layernorm(xc, ln1_g_ref[...], ln1_b_ref[...])
            kv = jnp.dot(hc.astype(mm), wkv_ref[...],
                         preferred_element_type=jnp.float32) + bkv_ref[...]
            for hd in range(n_head):                                  # off the hot path
                k_ref[hd, pl.ds(r0, q_tile), :] = kv[:, hd * dh:(hd + 1) * dh].astype(mm)
                v_ref[hd, pl.ds(r0, q_tile), :] = kv[:, C + hd * dh:C + (hd + 1) * dh].astype(mm)

    # ---- Query tile: LN1 + Q projection (attention scale pre-folded) ----
    q0 = pl.multiple_of(qi * q_tile, q_tile)
    x_q = x_ref[0, pl.ds(q0, q_tile), :]                              # (tq, C) f32
    h_q = _layernorm(x_q, ln1_g_ref[...], ln1_b_ref[...])
    q = jnp.dot(h_q.astype(mm), wq_ref[...],
                preferred_element_type=jnp.float32) + bq_ref[...]     # (tq, C) f32
    # single relayout to head-major (no per-head lane slicing on the hot path)
    q_h = jnp.transpose(q.reshape(q_tile, n_head, dh), (1, 0, 2)).astype(mm)

    # ---- flash-style online softmax over causally-needed key tiles ----
    m0 = jnp.full((n_head, q_tile, 1), _NEG_INF, jnp.float32)
    l0 = jnp.zeros((n_head, q_tile, 1), jnp.float32)
    a0 = jnp.zeros((n_head, q_tile, dh), jnp.float32)

    def kv_step(kt, carry):
        m_i, l_i, acc = carry
        k0 = pl.multiple_of(kt * q_tile, q_tile)
        k_blk = k_ref[:, pl.ds(k0, q_tile), :]                        # (H, tk, dh) bf16
        v_blk = v_ref[:, pl.ds(k0, q_tile), :]
        s = jnp.einsum('hqd,hkd->hqk', q_h, k_blk,
                       preferred_element_type=jnp.float32)            # (H, tq, tk) f32
        q_pos = q0 + jax.lax.broadcasted_iota(jnp.int32, (q_tile, q_tile), 0)
        k_pos = k0 + jax.lax.broadcasted_iota(jnp.int32, (q_tile, q_tile), 1)
        s = jnp.where(q_pos >= k_pos, s, _NEG_INF)                    # causal mask
        m_new = jnp.maximum(m_i, jnp.max(s, axis=-1, keepdims=True))
        alpha = jnp.exp(m_i - m_new)
        # TODO(synk): on v6e/v7x compute p directly in bf16 (bf16 EUP path); keep f32 on v5e.
        p = jnp.exp(s - m_new)
        l_new = alpha * l_i + jnp.sum(p, axis=-1, keepdims=True)
        acc_new = alpha * acc + jnp.einsum('hqk,hkd->hqd', p.astype(mm), v_blk,
                                           preferred_element_type=jnp.float32)
        return m_new, l_new, acc_new

    _, l_i, acc = jax.lax.fori_loop(0, qi + 1, kv_step, (m0, l0, a0))

    # normalize the small (H, tq, dh) accumulator; reciprocal goes to the EUP slot
    y_h = acc * pl.reciprocal(l_i, approx=True)

    # ---- head-concat fused into the output projection:
    # sum_h y_h[h] @ wp[h]   (batched matmul + cheap H-way add; no lane concat)
    y = jnp.einsum('hqd,hdc->hqc', y_h.astype(mm), wp_ref[...],
                   preferred_element_type=jnp.float32)                # (H, tq, C)
    y = jnp.sum(y, axis=0) + bp_ref[...]                              # (tq, C) f32
    x1 = x_q + y                                                      # residual 1

    # ---- LN2 + MLP (Linear -> GELU -> Linear), elementwise math in f32 ----
    h2 = _layernorm(x1, ln2_g_ref[...], ln2_b_ref[...])
    m = jnp.dot(h2.astype(mm), w1_ref[...],
                preferred_element_type=jnp.float32) + b1_ref[...]
    m = _gelu_exact(m)
    m = jnp.dot(m.astype(mm), w2_ref[...],
                preferred_element_type=jnp.float32) + b2_ref[...]

    out_ref[0] = (x1 + m).astype(out_ref.dtype)                       # residual 2


def _default_q_tile(T):
    kind = ""
    try:
        kind = jax.devices()[0].device_kind.lower()
    except Exception:
        pass
    # v6e/v7x MXU is 256 deep and the flash key loop bounds the score tile, so
    # 256 is safe there; v5e (128-deep MXU, smaller scoped VMEM) stays at 128.
    pref = 256 if ("v6" in kind or "v7" in kind or "7x" in kind) else 128
    for cand in (pref, 128):
        if T % cand == 0:
            return cand
    return T


def _vmem_limit_bytes(T, C, q_tile, n_head, weight_buffers):
    bf2, f4 = 2, 4
    H4 = 4 * C
    w_bytes = (2 * C * C + 2 * C * C + C * H4 + H4 * C) * bf2     # 12*C^2 bf16 weights
    p_bytes = 13 * C * f4                                         # biases + LN params
    invariants = (w_bytes + p_bytes) * weight_buffers
    x_blk = T * C * f4 * 2                                        # double-buffered x
    out_blk = q_tile * C * f4 * 2
    kv_scratch = 2 * T * C * bf2
    temps = (4 * n_head * q_tile * q_tile * f4                    # score / prob tiles
             + 3 * n_head * q_tile * (C // n_head) * f4           # acc / y_h
             + 3 * q_tile * H4 * f4                               # MLP intermediates
             + 8 * q_tile * C * f4)                               # LN / residual temps
    need = invariants + x_blk + out_blk + kv_scratch + temps
    try:
        phys = pltpu.get_tpu_info().vmem_capacity_bytes           # 64 MiB v7x, 128 MiB v5e/v6e
    except Exception:
        phys = 128 * 1024 * 1024
    cap = int(phys * 0.85)
    return max(24 * 1024 * 1024, min(int(need * 1.3) + (2 << 20), cap))


def transformer_block(x, params, n_head, q_tile=None):
    """params: the 16 PyTorch-layout f32 tensors; fusion/fold/bf16 cast done here."""
    (ln1_g, ln1_b, wk, bk, wq, bq, wv, bv, wp, bp,
     ln2_g, ln2_b, w1, b1, w2, b2) = params
    B, T, C = x.shape
    H4 = 4 * C
    assert C % n_head == 0
    dh = C // n_head

    if q_tile is None:
        q_tile = _default_q_tile(T)
    assert T % q_tile == 0, "sequence length must be divisible by the query tile"
    n_q = T // q_tile

    mm = _MXU_DTYPE
    scale = 1.0 / math.sqrt(dh)

    # Host-side parameter prep (trace-time, free at runtime).
    wq_c = (wq * scale).astype(mm)                                # attention scale folded in
    bq2 = (bq * scale).reshape(1, C)
    wkv_c = jnp.concatenate([wk, wv], axis=1).astype(mm)          # (C, 2C) fused K|V
    bkv2 = jnp.concatenate([bk, bv], axis=0).reshape(1, 2 * C)
    wp_h = wp.reshape(n_head, dh, C).astype(mm)                   # concat fused into proj
    bp2 = bp.reshape(1, C)
    w1_c = w1.astype(mm)
    b12 = b1.reshape(1, H4)
    w2_c = w2.astype(mm)
    b22 = b2.reshape(1, C)
    ln1_g2, ln1_b2 = ln1_g.reshape(1, C), ln1_b.reshape(1, C)
    ln2_g2, ln2_b2 = ln2_g.reshape(1, C), ln2_b.reshape(1, C)

    # Advisory cost hint (weights counted once; causal attention ~T^2*C each way).
    flops = int(B * (24 * T * C * C + 2 * T * T * C))
    transcendentals = int(B * (n_head * T * T // 2 + 4 * T * C + 2 * T))
    bytes_accessed = int(2 * B * T * C * 4 + 12 * C * C * 2 + 13 * C * 4)

    kernel = functools.partial(transformer_block_kernel, n_head=n_head, q_tile=q_tile)

    def build(single_buffer_weights):
        def const(shape):
            kw = {}
            if single_buffer_weights:
                # Grid-invariant inputs: the 2nd pipeline buffer is pure VMEM waste.
                kw["pipeline_mode"] = pl.Buffered(1)
            return pl.BlockSpec(shape, lambda b, qi: (0,) * len(shape), **kw)

        in_specs = [
            # TODO(synk): on v7x, single-buffer x or split it into a per-tile block
            # plus a memory_space=pl.ANY full-sequence ref used only in the qi==0 branch.
            pl.BlockSpec((1, T, C), lambda b, qi: (b, 0, 0)),     # x (full sequence)
            const((1, C)), const((1, C)),                         # ln1 gamma/beta
            const((C, C)), const((1, C)),                         # Wq (scaled), bq
            const((C, 2 * C)), const((1, 2 * C)),                 # Wkv, bkv (fused)
            const((n_head, dh, C)), const((1, C)),                # Wproj (per-head), bproj
            const((1, C)), const((1, C)),                         # ln2 gamma/beta
            const((C, H4)), const((1, H4)),                       # W1, b1
            const((H4, C)), const((1, C)),                        # W2, b2
        ]
        weight_buffers = 1 if single_buffer_weights else 2
        return pl.pallas_call(
            kernel,
            out_shape=jax.ShapeDtypeStruct((B, T, C), x.dtype),
            grid=(B, n_q),
            in_specs=in_specs,
            out_specs=pl.BlockSpec((1, q_tile, C), lambda b, qi: (b, qi, 0)),
            scratch_shapes=[pltpu.VMEM((n_head, T, dh), mm),      # K scratch (per-head)
                            pltpu.VMEM((n_head, T, dh), mm)],     # V scratch (per-head)
            compiler_params=pltpu.CompilerParams(
                # qi MUST stay "arbitrary": K/V scratch written at qi==0 is reused
                # by later q tiles of the same batch element (sequential per core).
                dimension_semantics=("parallel", "arbitrary"),
                vmem_limit_bytes=_vmem_limit_bytes(T, C, q_tile, n_head, weight_buffers)),
            cost_estimate=pl.CostEstimate(flops=flops,
                                          transcendentals=transcendentals,
                                          bytes_accessed=bytes_accessed),
        )

    args = (x, ln1_g2, ln1_b2, wq_c, bq2, wkv_c, bkv2, wp_h, bp2,
            ln2_g2, ln2_b2, w1_c, b12, w2_c, b22)
    try:
        return jax.block_until_ready(build(True)(*args))
    except Exception:
        # pl.Buffered(1) on invariant inputs is a pure VMEM optimization; fall
        # back to default double buffering if this jax/libtpu rejects it.
        return build(False)(*args)


def transformer_block_ref(x, params, n_head):
    """Pure-JAX f32 reference with the module's exact math."""
    (ln1_g, ln1_b, wk, bk, wq, bq, wv, bv, wp, bp,
     ln2_g, ln2_b, w1, b1, w2, b2) = params
    B, T, C = x.shape
    dh = C // n_head

    h = _layernorm(x, ln1_g, ln1_b)
    k = (h @ wk + bk).reshape(B, T, n_head, dh).transpose(0, 2, 1, 3)
    q = (h @ wq + bq).reshape(B, T, n_head, dh).transpose(0, 2, 1, 3)
    v = (h @ wv + bv).reshape(B, T, n_head, dh).transpose(0, 2, 1, 3)
    att = jnp.einsum('bhtd,bhsd->bhts', q, k) / (dh ** 0.5)
    mask = jnp.tril(jnp.ones((T, T), bool))
    att = jnp.where(mask, att, -jnp.inf)
    att = jax.nn.softmax(att, axis=-1)
    y = jnp.einsum('bhts,bhsd->bhtd', att, v).transpose(0, 2, 1, 3).reshape(B, T, C)
    x = x + (y @ wp + bp)
    h2 = _layernorm(x, ln2_g, ln2_b)
    m = _gelu_exact(h2 @ w1 + b1)
    return x + (m @ w2 + b2)


if __name__ == "__main__":
    # Small config: block_size = T = 8, n_embed = 32, n_head = 4, batch = 2.
    B, T, C, n_head = 2, 8, 32, 4

    key = jax.random.PRNGKey(0)
    ks = jax.random.split(key, 16)
    std = 0.02

    ln1_g = 1.0 + 0.1 * jax.random.normal(ks[0], (C,), jnp.float32)
    ln1_b = 0.1 * jax.random.normal(ks[1], (C,), jnp.float32)
    wk = std * jax.random.normal(ks[2], (C, C), jnp.float32)
    bk = 0.01 * jax.random.normal(ks[3], (C,), jnp.float32)
    wq = std * jax.random.normal(ks[4], (C, C), jnp.float32)
    bq = 0.01 * jax.random.normal(ks[5], (C,), jnp.float32)
    wv = std * jax.random.normal(ks[6], (C, C), jnp.float32)
    bv = 0.01 * jax.random.normal(ks[7], (C,), jnp.float32)
    wp = std * jax.random.normal(ks[8], (C, C), jnp.float32)
    bp = 0.01 * jax.random.normal(ks[9], (C,), jnp.float32)
    ln2_g = 1.0 + 0.1 * jax.random.normal(ks[10], (C,), jnp.float32)
    ln2_b = 0.1 * jax.random.normal(ks[11], (C,), jnp.float32)
    w1 = std * jax.random.normal(ks[12], (C, 4 * C), jnp.float32)
    b1 = 0.01 * jax.random.normal(ks[13], (4 * C,), jnp.float32)
    w2 = std * jax.random.normal(ks[14], (4 * C, C), jnp.float32)
    b2 = 0.01 * jax.random.normal(ks[15], (C,), jnp.float32)

    params = (ln1_g, ln1_b, wk, bk, wq, bq, wv, bv, wp, bp,
              ln2_g, ln2_b, w1, b1, w2, b2)

    x = jax.random.normal(jax.random.PRNGKey(1), (B, T, C), jnp.float32)

    out = transformer_block(x, params, n_head)
    out = jax.block_until_ready(out)

    ref = transformer_block_ref(x, params, n_head)
    assert out.shape == (B, T, C)
    # bf16 MXU inputs + bf16 K/V + approx reciprocal are a deliberate precision
    # trade vs. the f32 reference -> loosened tolerance.
    assert jnp.allclose(out, ref, atol=1e-2, rtol=1e-2), (
        f"max abs diff {jnp.max(jnp.abs(out - ref))}")

    print("KERNEL_OK")
</pallas_src>

<mosaic_0001>
module attributes {stable_mosaic.version = 11 : i64} {
  func.func @transformer_block_kernel(%arg0: i32, %arg1: i32, %arg2: memref<1x8x32xf32, #tpu.memory_space<vmem>>, %arg3: memref<1x32xf32, #tpu.memory_space<vmem>>, %arg4: memref<1x32xf32, #tpu.memory_space<vmem>>, %arg5: memref<32x32xbf16, #tpu.memory_space<vmem>>, %arg6: memref<1x32xf32, #tpu.memory_space<vmem>>, %arg7: memref<32x64xbf16, #tpu.memory_space<vmem>>, %arg8: memref<1x64xf32, #tpu.memory_space<vmem>>, %arg9: memref<4x8x32xbf16, #tpu.memory_space<vmem>>, %arg10: memref<1x32xf32, #tpu.memory_space<vmem>>, %arg11: memref<1x32xf32, #tpu.memory_space<vmem>>, %arg12: memref<1x32xf32, #tpu.memory_space<vmem>>, %arg13: memref<32x128xbf16, #tpu.memory_space<vmem>>, %arg14: memref<1x128xf32, #tpu.memory_space<vmem>>, %arg15: memref<128x32xbf16, #tpu.memory_space<vmem>>, %arg16: memref<1x32xf32, #tpu.memory_space<vmem>>, %arg17: memref<1x8x32xf32, #tpu.memory_space<vmem>>, %arg18: memref<4x8x8xbf16, #tpu.memory_space<vmem>>, %arg19: memref<4x8x8xbf16, #tpu.memory_space<vmem>>) attributes {dimension_semantics = [#tpu.dimension_semantics<parallel>, #tpu.dimension_semantics<arbitrary>], iteration_bounds = array<i64: 2, 1>, scalar_prefetch = 0 : i64, scratch_operands = 2 : i64, tpu.core_type = #tpu.core_type<tc>, window_params = [{transform_indices = @transform_0, window_bounds = array<i64: 1, 8, 32>}, {pipeline_mode = #tpu.pipeline_mode<synchronous>, transform_indices = @transform_1, window_bounds = array<i64: 1, 32>}, {pipeline_mode = #tpu.pipeline_mode<synchronous>, transform_indices = @transform_2, window_bounds = array<i64: 1, 32>}, {pipeline_mode = #tpu.pipeline_mode<synchronous>, transform_indices = @transform_3, window_bounds = array<i64: 32, 32>}, {pipeline_mode = #tpu.pipeline_mode<synchronous>, transform_indices = @transform_4, window_bounds = array<i64: 1, 32>}, {pipeline_mode = #tpu.pipeline_mode<synchronous>, transform_indices = @transform_5, window_bounds = array<i64: 32, 64>}, {pipeline_mode = #tpu.pipeline_mode<synchronous>, transform_indices = @transform_6, window_bounds = array<i64: 1, 64>}, {pipeline_mode = #tpu.pipeline_mode<synchronous>, transform_indices = @transform_7, window_bounds = array<i64: 4, 8, 32>}, {pipeline_mode = #tpu.pipeline_mode<synchronous>, transform_indices = @transform_8, window_bounds = array<i64: 1, 32>}, {pipeline_mode = #tpu.pipeline_mode<synchronous>, transform_indices = @transform_9, window_bounds = array<i64: 1, 32>}, {pipeline_mode = #tpu.pipeline_mode<synchronous>, transform_indices = @transform_10, window_bounds = array<i64: 1, 32>}, {pipeline_mode = #tpu.pipeline_mode<synchronous>, transform_indices = @transform_11, window_bounds = array<i64: 32, 128>}, {pipeline_mode = #tpu.pipeline_mode<synchronous>, transform_indices = @transform_12, window_bounds = array<i64: 1, 128>}, {pipeline_mode = #tpu.pipeline_mode<synchronous>, transform_indices = @transform_13, window_bounds = array<i64: 128, 32>}, {pipeline_mode = #tpu.pipeline_mode<synchronous>, transform_indices = @transform_14, window_bounds = array<i64: 1, 32>}, {transform_indices = @transform_15, window_bounds = array<i64: 1, 8, 32>}]} {
    %c0_i32 = arith.constant 0 : i32
    %0 = arith.cmpi eq, %arg1, %c0_i32 : i32
    %1 = arith.extui %0 : i1 to i32
    %c0_i32_0 = arith.constant 0 : i32
    %2 = arith.cmpi ne, %1, %c0_i32_0 : i32
    scf.if %2 {
      %c0_i32_52 = arith.constant 0 : i32
      %c1_i32_53 = arith.constant 1 : i32
      %107 = arith.muli %c0_i32_52, %c1_i32_53 : i32
      %c0_i32_54 = arith.constant 0 : i32
      %108 = arith.addi %c0_i32_54, %107 : i32
      %c8_i32_55 = arith.constant 8 : i32
      %109 = arith.muli %108, %c8_i32_55 : i32
      %110 = tpu.assume_multiple %109, 8 : i32
      %c0_56 = arith.constant 0 : index
      %111 = arith.index_cast %110 : i32 to index
      %c0_57 = arith.constant 0 : index
      %112 = vector.load %arg2[%c0_56, %111, %c0_57] : memref<1x8x32xf32, #tpu.memory_space<vmem>>, vector<1x8x32xf32>
      %113 = vector.shape_cast %112 : vector<1x8x32xf32> to vector<8x32xf32>
      %c0_58 = arith.constant 0 : index
      %c0_59 = arith.constant 0 : index
      %114 = vector.load %arg3[%c0_58, %c0_59] : memref<1x32xf32, #tpu.memory_space<vmem>>, vector<1x32xf32>
      %c0_60 = arith.constant 0 : index
      %c0_61 = arith.constant 0 : index
      %115 = vector.load %arg4[%c0_60, %c0_61] : memref<1x32xf32, #tpu.memory_space<vmem>>, vector<1x32xf32>
      %cst_62 = arith.constant dense<0.000000e+00> : vector<8xf32>
      %116 = vector.multi_reduction <add>, %113, %cst_62 [1] : vector<8x32xf32> to vector<8xf32>
      %117 = vector.shape_cast %116 : vector<8xf32> to vector<8x1xf32>
      %cst_63 = arith.constant 3.200000e+01 : f32
      %118 = vector.broadcast %cst_63 : f32 to vector<8x1xf32>
      %119 = arith.divf %117, %118 : vector<8x1xf32>
      %120 = vector.broadcast %119 : vector<8x1xf32> to vector<8x32xf32>
      %121 = arith.subf %113, %120 : vector<8x32xf32>
      %122 = arith.mulf %121, %121 : vector<8x32xf32>
      %cst_64 = arith.constant dense<0.000000e+00> : vector<8xf32>
      %123 = vector.multi_reduction <add>, %122, %cst_64 [1] : vector<8x32xf32> to vector<8xf32>
      %124 = vector.shape_cast %123 : vector<8xf32> to vector<8x1xf32>
      %cst_65 = arith.constant 3.200000e+01 : f32
      %125 = vector.broadcast %cst_65 : f32 to vector<8x1xf32>
      %126 = arith.divf %124, %125 : vector<8x1xf32>
      %127 = vector.broadcast %119 : vector<8x1xf32> to vector<8x32xf32>
      %128 = arith.subf %113, %127 : vector<8x32xf32>
      %cst_66 = arith.constant 9.99999974E-6 : f32
      %129 = vector.broadcast %cst_66 : f32 to vector<8x1xf32>
      %130 = arith.addf %126, %129 : vector<8x1xf32>
      %131 = math.rsqrt %130 : vector<8x1xf32>
      %132 = vector.broadcast %131 : vector<8x1xf32> to vector<8x32xf32>
      %133 = arith.mulf %128, %132 : vector<8x32xf32>
      %134 = vector.broadcast %114 : vector<1x32xf32> to vector<8x32xf32>
      %135 = arith.mulf %133, %134 : vector<8x32xf32>
      %136 = vector.broadcast %115 : vector<1x32xf32> to vector<8x32xf32>
      %137 = arith.addf %135, %136 : vector<8x32xf32>
      %138 = arith.truncf %137 : vector<8x32xf32> to vector<8x32xbf16>
      %c0_67 = arith.constant 0 : index
      %c0_68 = arith.constant 0 : index
      %139 = vector.load %arg7[%c0_67, %c0_68] : memref<32x64xbf16, #tpu.memory_space<vmem>>, vector<32x64xbf16>
      %cst_69 = arith.constant dense<0.000000e+00> : vector<8x64xf32>
      %140 = tpu.matmul %138, %139, %cst_69 {dimension_numbers = #tpu.dot_dimension_numbers<[1], [0], [0], [1], [0, 0, 1, 1], [], []>} : vector<8x32xbf16>, vector<32x64xbf16>, vector<8x64xf32> -> vector<8x64xf32>
      %c0_70 = arith.constant 0 : index
      %c0_71 = arith.constant 0 : index
      %141 = vector.load %arg8[%c0_70, %c0_71] : memref<1x64xf32, #tpu.memory_space<vmem>>, vector<1x64xf32>
      %142 = vector.broadcast %141 : vector<1x64xf32> to vector<8x64xf32>
      %143 = arith.addf %140, %142 : vector<8x64xf32>
      %144 = vector.extract_strided_slice %143 {offsets = [0, 0], sizes = [8, 8], strides = [1, 1]} : vector<8x64xf32> to vector<8x8xf32>
      %145 = arith.truncf %144 : vector<8x8xf32> to vector<8x8xbf16>
      %c0_72 = arith.constant 0 : index
      %146 = arith.index_cast %110 : i32 to index
      %c0_73 = arith.constant 0 : index
      %147 = vector.load %arg18[%c0_72, %146, %c0_73] : memref<4x8x8xbf16, #tpu.memory_space<vmem>>, vector<1x8x8xbf16>
      %148 = vector.shape_cast %147 : vector<1x8x8xbf16> to vector<8x8xbf16>
      %149 = vector.shape_cast %145 : vector<8x8xbf16> to vector<1x8x8xbf16>
      tpu.vector_store %arg18[%c0_72, %146, %c0_73], %149 {strides = array<i32>} : memref<4x8x8xbf16, #tpu.memory_space<vmem>>, vector<1x8x8xbf16>,
      %150 = vector.extract_strided_slice %143 {offsets = [0, 32], sizes = [8, 8], strides = [1, 1]} : vector<8x64xf32> to vector<8x8xf32>
      %151 = arith.truncf %150 : vector<8x8xf32> to vector<8x8xbf16>
      %c0_74 = arith.constant 0 : index
      %152 = arith.index_cast %110 : i32 to index
      %c0_75 = arith.constant 0 : index
      %153 = vector.load %arg19[%c0_74, %152, %c0_75] : memref<4x8x8xbf16, #tpu.memory_space<vmem>>, vector<1x8x8xbf16>
      %154 = vector.shape_cast %153 : vector<1x8x8xbf16> to vector<8x8xbf16>
      %155 = vector.shape_cast %151 : vector<8x8xbf16> to vector<1x8x8xbf16>
      tpu.vector_store %arg19[%c0_74, %152, %c0_75], %155 {strides = array<i32>} : memref<4x8x8xbf16, #tpu.memory_space<vmem>>, vector<1x8x8xbf16>,
      %156 = vector.extract_strided_slice %143 {offsets = [0, 8], sizes = [8, 8], strides = [1, 1]} : vector<8x64xf32> to vector<8x8xf32>
      %157 = arith.truncf %156 : vector<8x8xf32> to vector<8x8xbf16>
      %c1 = arith.constant 1 : index
      %158 = arith.index_cast %110 : i32 to index
      %c0_76 = arith.constant 0 : index
      %159 = vector.load %arg18[%c1, %158, %c0_76] : memref<4x8x8xbf16, #tpu.memory_space<vmem>>, vector<1x8x8xbf16>
      %160 = vector.shape_cast %159 : vector<1x8x8xbf16> to vector<8x8xbf16>
      %161 = vector.shape_cast %157 : vector<8x8xbf16> to vector<1x8x8xbf16>
      tpu.vector_store %arg18[%c1, %158, %c0_76], %161 {strides = array<i32>} : memref<4x8x8xbf16, #tpu.memory_space<vmem>>, vector<1x8x8xbf16>,
      %162 = vector.extract_strided_slice %143 {offsets = [0, 40], sizes = [8, 8], strides = [1, 1]} : vector<8x64xf32> to vector<8x8xf32>
      %163 = arith.truncf %162 : vector<8x8xf32> to vector<8x8xbf16>
      %c1_77 = arith.constant 1 : index
      %164 = arith.index_cast %110 : i32 to index
      %c0_78 = arith.constant 0 : index
      %165 = vector.load %arg19[%c1_77, %164, %c0_78] : memref<4x8x8xbf16, #tpu.memory_space<vmem>>, vector<1x8x8xbf16>
      %166 = vector.shape_cast %165 : vector<1x8x8xbf16> to vector<8x8xbf16>
      %167 = vector.shape_cast %163 : vector<8x8xbf16> to vector<1x8x8xbf16>
      tpu.vector_store %arg19[%c1_77, %164, %c0_78], %167 {strides = array<i32>} : memref<4x8x8xbf16, #tpu.memory_space<vmem>>, vector<1x8x8xbf16>,
      %168 = vector.extract_strided_slice %143 {offsets = [0, 16], sizes = [8, 8], strides = [1, 1]} : vector<8x64xf32> to vector<8x8xf32>
      %169 = arith.truncf %168 : vector<8x8xf32> to vector<8x8xbf16>
      %c2 = arith.constant 2 : index
      %170 = arith.index_cast %110 : i32 to index
      %c0_79 = arith.constant 0 : index
      %171 = vector.load %arg18[%c2, %170, %c0_79] : memref<4x8x8xbf16, #tpu.memory_space<vmem>>, vector<1x8x8xbf16>
      %172 = vector.shape_cast %171 : vector<1x8x8xbf16> to vector<8x8xbf16>
      %173 = vector.shape_cast %169 : vector<8x8xbf16> to vector<1x8x8xbf16>
      tpu.vector_store %arg18[%c2, %170, %c0_79], %173 {strides = array<i32>} : memref<4x8x8xbf16, #tpu.memory_space<vmem>>, vector<1x8x8xbf16>,
      %174 = vector.extract_strided_slice %143 {offsets = [0, 48], sizes = [8, 8], strides = [1, 1]} : vector<8x64xf32> to vector<8x8xf32>
      %175 = arith.truncf %174 : vector<8x8xf32> to vector<8x8xbf16>
      %c2_80 = arith.constant 2 : index
      %176 = arith.index_cast %110 : i32 to index
      %c0_81 = arith.constant 0 : index
      %177 = vector.load %arg19[%c2_80, %176, %c0_81] : memref<4x8x8xbf16, #tpu.memory_space<vmem>>, vector<1x8x8xbf16>
      %178 = vector.shape_cast %177 : vector<1x8x8xbf16> to vector<8x8xbf16>
      %179 = vector.shape_cast %175 : vector<8x8xbf16> to vector<1x8x8xbf16>
      tpu.vector_store %arg19[%c2_80, %176, %c0_81], %179 {strides = array<i32>} : memref<4x8x8xbf16, #tpu.memory_space<vmem>>, vector<1x8x8xbf16>,
      %180 = vector.extract_strided_slice %143 {offsets = [0, 24], sizes = [8, 8], strides = [1, 1]} : vector<8x64xf32> to vector<8x8xf32>
      %181 = arith.truncf %180 : vector<8x8xf32> to vector<8x8xbf16>
      %c3 = arith.constant 3 : index
      %182 = arith.index_cast %110 : i32 to index
      %c0_82 = arith.constant 0 : index
      %183 = vector.load %arg18[%c3, %182, %c0_82] : memref<4x8x8xbf16, #tpu.memory_space<vmem>>, vector<1x8x8xbf16>
      %184 = vector.shape_cast %183 : vector<1x8x8xbf16> to vector<8x8xbf16>
      %185 = vector.shape_cast %181 : vector<8x8xbf16> to vector<1x8x8xbf16>
      tpu.vector_store %arg18[%c3, %182, %c0_82], %185 {strides = array<i32>} : memref<4x8x8xbf16, #tpu.memory_space<vmem>>, vector<1x8x8xbf16>,
      %186 = vector.extract_strided_slice %143 {offsets = [0, 56], sizes = [8, 8], strides = [1, 1]} : vector<8x64xf32> to vector<8x8xf32>
      %187 = arith.truncf %186 : vector<8x8xf32> to vector<8x8xbf16>
      %c3_83 = arith.constant 3 : index
      %188 = arith.index_cast %110 : i32 to index
      %c0_84 = arith.constant 0 : index
      %189 = vector.load %arg19[%c3_83, %188, %c0_84] : memref<4x8x8xbf16, #tpu.memory_space<vmem>>, vector<1x8x8xbf16>
      %190 = vector.shape_cast %189 : vector<1x8x8xbf16> to vector<8x8xbf16>
      %191 = vector.shape_cast %187 : vector<8x8xbf16> to vector<1x8x8xbf16>
      tpu.vector_store %arg19[%c3_83, %188, %c0_84], %191 {strides = array<i32>} : memref<4x8x8xbf16, #tpu.memory_space<vmem>>, vector<1x8x8xbf16>,
      %c1_i32_85 = arith.constant 1 : i32
    } else {
    }
    %c8_i32 = arith.constant 8 : i32
    %3 = arith.muli %arg1, %c8_i32 : i32
    %4 = tpu.assume_multiple %3, 8 : i32
    %c0 = arith.constant 0 : index
    %5 = arith.index_cast %4 : i32 to index
    %c0_1 = arith.constant 0 : index
    %6 = vector.load %arg2[%c0, %5, %c0_1] : memref<1x8x32xf32, #tpu.memory_space<vmem>>, vector<1x8x32xf32>
    %7 = vector.shape_cast %6 : vector<1x8x32xf32> to vector<8x32xf32>
    %c0_2 = arith.constant 0 : index
    %c0_3 = arith.constant 0 : index
    %8 = vector.load %arg3[%c0_2, %c0_3] : memref<1x32xf32, #tpu.memory_space<vmem>>, vector<1x32xf32>
    %c0_4 = arith.constant 0 : index
    %c0_5 = arith.constant 0 : index
    %9 = vector.load %arg4[%c0_4, %c0_5] : memref<1x32xf32, #tpu.memory_space<vmem>>, vector<1x32xf32>
    %cst = arith.constant dense<0.000000e+00> : vector<8xf32>
    %10 = vector.multi_reduction <add>, %7, %cst [1] : vector<8x32xf32> to vector<8xf32>
    %11 = vector.shape_cast %10 : vector<8xf32> to vector<8x1xf32>
    %cst_6 = arith.constant 3.200000e+01 : f32
    %12 = vector.broadcast %cst_6 : f32 to vector<8x1xf32>
    %13 = arith.divf %11, %12 : vector<8x1xf32>
    %14 = vector.broadcast %13 : vector<8x1xf32> to vector<8x32xf32>
    %15 = arith.subf %7, %14 : vector<8x32xf32>
    %16 = arith.mulf %15, %15 : vector<8x32xf32>
    %cst_7 = arith.constant dense<0.000000e+00> : vector<8xf32>
    %17 = vector.multi_reduction <add>, %16, %cst_7 [1] : vector<8x32xf32> to vector<8xf32>
    %18 = vector.shape_cast %17 : vector<8xf32> to vector<8x1xf32>
    %cst_8 = arith.constant 3.200000e+01 : f32
    %19 = vector.broadcast %cst_8 : f32 to vector<8x1xf32>
    %20 = arith.divf %18, %19 : vector<8x1xf32>
    %21 = vector.broadcast %13 : vector<8x1xf32> to vector<8x32xf32>
    %22 = arith.subf %7, %21 : vector<8x32xf32>
    %cst_9 = arith.constant 9.99999974E-6 : f32
    %23 = vector.broadcast %cst_9 : f32 to vector<8x1xf32>
    %24 = arith.addf %20, %23 : vector<8x1xf32>
    %25 = math.rsqrt %24 : vector<8x1xf32>
    %26 = vector.broadcast %25 : vector<8x1xf32> to vector<8x32xf32>
    %27 = arith.mulf %22, %26 : vector<8x32xf32>
    %28 = vector.broadcast %8 : vector<1x32xf32> to vector<8x32xf32>
    %29 = arith.mulf %27, %28 : vector<8x32xf32>
    %30 = vector.broadcast %9 : vector<1x32xf32> to vector<8x32xf32>
    %31 = arith.addf %29, %30 : vector<8x32xf32>
    %32 = arith.truncf %31 : vector<8x32xf32> to vector<8x32xbf16>
    %c0_10 = arith.constant 0 : index
    %c0_11 = arith.constant 0 : index
    %33 = vector.load %arg5[%c0_10, %c0_11] : memref<32x32xbf16, #tpu.memory_space<vmem>>, vector<32x32xbf16>
    %cst_12 = arith.constant dense<0.000000e+00> : vector<8x32xf32>
    %34 = tpu.matmul %32, %33, %cst_12 {dimension_numbers = #tpu.dot_dimension_numbers<[1], [0], [0], [1], [0, 0, 1, 1], [], []>} : vector<8x32xbf16>, vector<32x32xbf16>, vector<8x32xf32> -> vector<8x32xf32>
    %c0_13 = arith.constant 0 : index
    %c0_14 = arith.constant 0 : index
    %35 = vector.load %arg6[%c0_13, %c0_14] : memref<1x32xf32, #tpu.memory_space<vmem>>, vector<1x32xf32>
    %36 = vector.broadcast %35 : vector<1x32xf32> to vector<8x32xf32>
    %37 = arith.addf %34, %36 : vector<8x32xf32>
    %38 = vector.shape_cast %37 : vector<8x32xf32> to vector<8x4x8xf32>
    %39 = tpu.transpose %38, [1, 0, 2] : vector<8x4x8xf32> -> vector<4x8x8xf32>
    %40 = arith.truncf %39 : vector<4x8x8xf32> to vector<4x8x8xbf16>
    %cst_15 = arith.constant -1.000000e+30 : f32
    %41 = vector.broadcast %cst_15 : f32 to vector<4x8x1xf32>
    %cst_16 = arith.constant 0.000000e+00 : f32
    %42 = vector.broadcast %cst_16 : f32 to vector<4x8x1xf32>
    %cst_17 = arith.constant 0.000000e+00 : f32
    %43 = vector.broadcast %cst_17 : f32 to vector<4x8x8xf32>
    %c1_i32 = arith.constant 1 : i32
    %44 = arith.addi %arg1, %c1_i32 : i32
    %c0_i32_18 = arith.constant 0 : i32
    %45 = arith.subi %44, %c0_i32_18 : i32
    %46 = arith.addi %c0_i32_18, %45 : i32
    %c1_i32_19 = arith.constant 1 : i32
    %47:3 = scf.for %arg20 = %c0_i32_18 to %46 step %c1_i32_19 iter_args(%arg21 = %41, %arg22 = %42, %arg23 = %43) -> (vector<4x8x1xf32>, vector<4x8x1xf32>, vector<4x8x8xf32>)  : i32 {
      %c8_i32_52 = arith.constant 8 : i32
      %107 = arith.muli %arg20, %c8_i32_52 : i32
      %108 = tpu.assume_multiple %107, 8 : i32
      %c0_53 = arith.constant 0 : index
      %109 = arith.index_cast %108 : i32 to index
      %c0_54 = arith.constant 0 : index
      %110 = vector.load %arg18[%c0_53, %109, %c0_54] : memref<4x8x8xbf16, #tpu.memory_space<vmem>>, vector<4x8x8xbf16>
      %c0_55 = arith.constant 0 : index
      %111 = arith.index_cast %108 : i32 to index
      %c0_56 = arith.constant 0 : index
      %112 = vector.load %arg19[%c0_55, %111, %c0_56] : memref<4x8x8xbf16, #tpu.memory_space<vmem>>, vector<4x8x8xbf16>
      "tpu.trace_start"() <{level = 10 : i32, message = "hqd,hkd->hqk"}> : () -> ()
      %cst_57 = arith.constant dense<0.000000e+00> : vector<4x8x8xf32>
      %113 = tpu.matmul %40, %110, %cst_57 {dimension_numbers = #tpu.dot_dimension_numbers<[2], [2], [1], [1], [0, 0, 0, 1, 1, 1], [0], [0]>} : vector<4x8x8xbf16>, vector<4x8x8xbf16>, vector<4x8x8xf32> -> vector<4x8x8xf32>
      "tpu.trace_stop"() : () -> ()
      %114 = tpu.iota {dimensions = array<i32: 0>} : vector<8x8xi32>
      %115 = vector.broadcast %4 : i32 to vector<8x8xi32>
      %116 = arith.addi %115, %114 : vector<8x8xi32>
      %117 = tpu.iota {dimensions = array<i32: 1>} : vector<8x8xi32>
      %118 = vector.broadcast %108 : i32 to vector<8x8xi32>
      %119 = arith.addi %118, %117 : vector<8x8xi32>
      %120 = arith.cmpi sge, %116, %119 : vector<8x8xi32>
      %cst_58 = arith.constant -1.000000e+30 : f32
      %121 = vector.shape_cast %120 : vector<8x8xi1> to vector<1x8x8xi1>
      %122 = vector.broadcast %121 : vector<1x8x8xi1> to vector<4x8x8xi1>
      %123 = vector.broadcast %cst_58 : f32 to vector<4x8x8xf32>
      %124 = arith.select %122, %113, %123 : vector<4x8x8xi1>, vector<4x8x8xf32>
      %cst_59 = arith.constant dense<0xFF800000> : vector<4x8xf32>
      %125 = vector.multi_reduction <maximumf>, %124, %cst_59 [2] : vector<4x8x8xf32> to vector<4x8xf32>
      %126 = vector.shape_cast %125 : vector<4x8xf32> to vector<4x8x1xf32>
      %127 = arith.maximumf %arg21, %126 : vector<4x8x1xf32>
      %128 = arith.subf %arg21, %127 : vector<4x8x1xf32>
      %129 = math.exp %128 : vector<4x8x1xf32>
      %130 = vector.broadcast %127 : vector<4x8x1xf32> to vector<4x8x8xf32>
      %131 = arith.subf %124, %130 : vector<4x8x8xf32>
      %132 = math.exp %131 : vector<4x8x8xf32>
      %133 = arith.mulf %129, %arg22 : vector<4x8x1xf32>
      %cst_60 = arith.constant dense<0.000000e+00> : vector<4x8xf32>
      %134 = vector.multi_reduction <add>, %132, %cst_60 [2] : vector<4x8x8xf32> to vector<4x8xf32>
      %135 = vector.shape_cast %134 : vector<4x8xf32> to vector<4x8x1xf32>
      %136 = arith.addf %133, %135 : vector<4x8x1xf32>
      %137 = vector.broadcast %129 : vector<4x8x1xf32> to vector<4x8x8xf32>
      %138 = arith.mulf %137, %arg23 : vector<4x8x8xf32>
      %139 = arith.truncf %132 : vector<4x8x8xf32> to vector<4x8x8xbf16>
      "tpu.trace_start"() <{level = 10 : i32, message = "hqk,hkd->hqd"}> : () -> ()
      %cst_61 = arith.constant dense<0.000000e+00> : vector<4x8x8xf32>
      %140 = tpu.matmul %139, %112, %cst_61 {dimension_numbers = #tpu.dot_dimension_numbers<[2], [1], [1], [2], [0, 0, 0, 1, 1, 2], [0], [0]>} : vector<4x8x8xbf16>, vector<4x8x8xbf16>, vector<4x8x8xf32> -> vector<4x8x8xf32>
      "tpu.trace_stop"() : () -> ()
      %141 = arith.addf %138, %140 : vector<4x8x8xf32>
      scf.yield %127, %136, %141 : vector<4x8x1xf32>, vector<4x8x1xf32>, vector<4x8x8xf32>
    }
    %48 = tpu.reciprocal %47#1 {approx = true} : vector<4x8x1xf32> -> vector<4x8x1xf32>
    %49 = vector.broadcast %48 : vector<4x8x1xf32> to vector<4x8x8xf32>
    %50 = arith.mulf %47#2, %49 : vector<4x8x8xf32>
    %51 = arith.truncf %50 : vector<4x8x8xf32> to vector<4x8x8xbf16>
    %c0_20 = arith.constant 0 : index
    %c0_21 = arith.constant 0 : index
    %c0_22 = arith.constant 0 : index
    %52 = vector.load %arg9[%c0_20, %c0_21, %c0_22] : memref<4x8x32xbf16, #tpu.memory_space<vmem>>, vector<4x8x32xbf16>
    "tpu.trace_start"() <{level = 10 : i32, message = "hqd,hdc->hqc"}> : () -> ()
    %cst_23 = arith.constant dense<0.000000e+00> : vector<4x8x32xf32>
    %53 = tpu.matmul %51, %52, %cst_23 {dimension_numbers = #tpu.dot_dimension_numbers<[2], [1], [1], [2], [0, 0, 0, 1, 1, 2], [0], [0]>} : vector<4x8x8xbf16>, vector<4x8x32xbf16>, vector<4x8x32xf32> -> vector<4x8x32xf32>
    "tpu.trace_stop"() : () -> ()
    %cst_24 = arith.constant dense<0.000000e+00> : vector<8x32xf32>
    %54 = vector.multi_reduction <add>, %53, %cst_24 [0] : vector<4x8x32xf32> to vector<8x32xf32>
    %c0_25 = arith.constant 0 : index
    %c0_26 = arith.constant 0 : index
    %55 = vector.load %arg10[%c0_25, %c0_26] : memref<1x32xf32, #tpu.memory_space<vmem>>, vector<1x32xf32>
    %56 = vector.broadcast %55 : vector<1x32xf32> to vector<8x32xf32>
    %57 = arith.addf %54, %56 : vector<8x32xf32>
    %58 = arith.addf %7, %57 : vector<8x32xf32>
    %c0_27 = arith.constant 0 : index
    %c0_28 = arith.constant 0 : index
    %59 = vector.load %arg11[%c0_27, %c0_28] : memref<1x32xf32, #tpu.memory_space<vmem>>, vector<1x32xf32>
    %c0_29 = arith.constant 0 : index
    %c0_30 = arith.constant 0 : index
    %60 = vector.load %arg12[%c0_29, %c0_30] : memref<1x32xf32, #tpu.memory_space<vmem>>, vector<1x32xf32>
    %cst_31 = arith.constant dense<0.000000e+00> : vector<8xf32>
    %61 = vector.multi_reduction <add>, %58, %cst_31 [1] : vector<8x32xf32> to vector<8xf32>
    %62 = vector.shape_cast %61 : vector<8xf32> to vector<8x1xf32>
    %cst_32 = arith.constant 3.200000e+01 : f32
    %63 = vector.broadcast %cst_32 : f32 to vector<8x1xf32>
    %64 = arith.divf %62, %63 : vector<8x1xf32>
    %65 = vector.broadcast %64 : vector<8x1xf32> to vector<8x32xf32>
    %66 = arith.subf %58, %65 : vector<8x32xf32>
    %67 = arith.mulf %66, %66 : vector<8x32xf32>
    %cst_33 = arith.constant dense<0.000000e+00> : vector<8xf32>
    %68 = vector.multi_reduction <add>, %67, %cst_33 [1] : vector<8x32xf32> to vector<8xf32>
    %69 = vector.shape_cast %68 : vector<8xf32> to vector<8x1xf32>
    %cst_34 = arith.constant 3.200000e+01 : f32
    %70 = vector.broadcast %cst_34 : f32 to vector<8x1xf32>
    %71 = arith.divf %69, %70 : vector<8x1xf32>
    %72 = vector.broadcast %64 : vector<8x1xf32> to vector<8x32xf32>
    %73 = arith.subf %58, %72 : vector<8x32xf32>
    %cst_35 = arith.constant 9.99999974E-6 : f32
    %74 = vector.broadcast %cst_35 : f32 to vector<8x1xf32>
    %75 = arith.addf %71, %74 : vector<8x1xf32>
    %76 = math.rsqrt %75 : vector<8x1xf32>
    %77 = vector.broadcast %76 : vector<8x1xf32> to vector<8x32xf32>
    %78 = arith.mulf %73, %77 : vector<8x32xf32>
    %79 = vector.broadcast %59 : vector<1x32xf32> to vector<8x32xf32>
    %80 = arith.mulf %78, %79 : vector<8x32xf32>
    %81 = vector.broadcast %60 : vector<1x32xf32> to vector<8x32xf32>
    %82 = arith.addf %80, %81 : vector<8x32xf32>
    %83 = arith.truncf %82 : vector<8x32xf32> to vector<8x32xbf16>
    %c0_36 = arith.constant 0 : index
    %c0_37 = arith.constant 0 : index
    %84 = vector.load %arg13[%c0_36, %c0_37] : memref<32x128xbf16, #tpu.memory_space<vmem>>, vector<32x128xbf16>
    %cst_38 = arith.constant dense<0.000000e+00> : vector<8x128xf32>
    %85 = tpu.matmul %83, %84, %cst_38 {dimension_numbers = #tpu.dot_dimension_numbers<[1], [0], [0], [1], [0, 0, 1, 1], [], []>} : vector<8x32xbf16>, vector<32x128xbf16>, vector<8x128xf32> -> vector<8x128xf32>
    %c0_39 = arith.constant 0 : index
    %c0_40 = arith.constant 0 : index
    %86 = vector.load %arg14[%c0_39, %c0_40] : memref<1x128xf32, #tpu.memory_space<vmem>>, vector<1x128xf32>
    %87 = vector.broadcast %86 : vector<1x128xf32> to vector<8x128xf32>
    %88 = arith.addf %85, %87 : vector<8x128xf32>
    %cst_41 = arith.constant 5.000000e-01 : f32
    %89 = vector.broadcast %cst_41 : f32 to vector<8x128xf32>
    %90 = arith.mulf %89, %88 : vector<8x128xf32>
    %cst_42 = arith.constant 0.707106769 : f32
    %91 = vector.broadcast %cst_42 : f32 to vector<8x128xf32>
    %92 = arith.mulf %88, %91 : vector<8x128xf32>
    %93 = math.erf %92 : vector<8x128xf32>
    %cst_43 = arith.constant 1.000000e+00 : f32
    %94 = vector.broadcast %cst_43 : f32 to vector<8x128xf32>
    %95 = arith.addf %94, %93 : vector<8x128xf32>
    %96 = arith.mulf %90, %95 : vector<8x128xf32>
    %97 = arith.truncf %96 : vector<8x128xf32> to vector<8x128xbf16>
    %c0_44 = arith.constant 0 : index
    %c0_45 = arith.constant 0 : index
    %98 = vector.load %arg15[%c0_44, %c0_45] : memref<128x32xbf16, #tpu.memory_space<vmem>>, vector<128x32xbf16>
    %cst_46 = arith.constant dense<0.000000e+00> : vector<8x32xf32>
    %99 = tpu.matmul %97, %98, %cst_46 {dimension_numbers = #tpu.dot_dimension_numbers<[1], [0], [0], [1], [0, 0, 1, 1], [], []>} : vector<8x128xbf16>, vector<128x32xbf16>, vector<8x32xf32> -> vector<8x32xf32>
    %c0_47 = arith.constant 0 : index
    %c0_48 = arith.constant 0 : index
    %100 = vector.load %arg16[%c0_47, %c0_48] : memref<1x32xf32, #tpu.memory_space<vmem>>, vector<1x32xf32>
    %101 = vector.broadcast %100 : vector<1x32xf32> to vector<8x32xf32>
    %102 = arith.addf %99, %101 : vector<8x32xf32>
    %103 = arith.addf %58, %102 : vector<8x32xf32>
    %c0_49 = arith.constant 0 : index
    %c0_50 = arith.constant 0 : index
    %c0_51 = arith.constant 0 : index
    %104 = vector.load %arg17[%c0_49, %c0_50, %c0_51] : memref<1x8x32xf32, #tpu.memory_space<vmem>>, vector<1x8x32xf32>
    %105 = vector.shape_cast %104 : vector<1x8x32xf32> to vector<8x32xf32>
    %106 = vector.shape_cast %103 : vector<8x32xf32> to vector<1x8x32xf32>
    tpu.vector_store %arg17[%c0_49, %c0_50, %c0_51], %106 {strides = array<i32>} : memref<1x8x32xf32, #tpu.memory_space<vmem>>, vector<1x8x32xf32>,
    return
  }
  func.func @transform_0(%arg0: i32, %arg1: i32) -> (i32, i32, i32) {
    %c0_i32 = arith.constant 0 : i32
    %c0_i32_0 = arith.constant 0 : i32
    %c0_i32_1 = arith.constant 0 : i32
    return %arg0, %c0_i32, %c0_i32_0 : i32, i32, i32
  }
  func.func @transform_1(%arg0: i32, %arg1: i32) -> (i32, i32) {
    %c0_i32 = arith.constant 0 : i32
    %c0_i32_0 = arith.constant 0 : i32
    %c0_i32_1 = arith.constant 0 : i32
    return %c0_i32, %c0_i32_0 : i32, i32
  }
  func.func @transform_2(%arg0: i32, %arg1: i32) -> (i32, i32) {
    %c0_i32 = arith.constant 0 : i32
    %c0_i32_0 = arith.constant 0 : i32
    %c0_i32_1 = arith.constant 0 : i32
    return %c0_i32, %c0_i32_0 : i32, i32
  }
  func.func @transform_3(%arg0: i32, %arg1: i32) -> (i32, i32) {
    %c0_i32 = arith.constant 0 : i32
    %c0_i32_0 = arith.constant 0 : i32
    %c0_i32_1 = arith.constant 0 : i32
    return %c0_i32, %c0_i32_0 : i32, i32
  }
  func.func @transform_4(%arg0: i32, %arg1: i32) -> (i32, i32) {
    %c0_i32 = arith.constant 0 : i32
    %c0_i32_0 = arith.constant 0 : i32
    %c0_i32_1 = arith.constant 0 : i32
    return %c0_i32, %c0_i32_0 : i32, i32
  }
  func.func @transform_5(%arg0: i32, %arg1: i32) -> (i32, i32) {
    %c0_i32 = arith.constant 0 : i32
    %c0_i32_0 = arith.constant 0 : i32
    %c0_i32_1 = arith.constant 0 : i32
    return %c0_i32, %c0_i32_0 : i32, i32
  }
  func.func @transform_6(%arg0: i32, %arg1: i32) -> (i32, i32) {
    %c0_i32 = arith.constant 0 : i32
    %c0_i32_0 = arith.constant 0 : i32
    %c0_i32_1 = arith.constant 0 : i32
    return %c0_i32, %c0_i32_0 : i32, i32
  }
  func.func @transform_7(%arg0: i32, %arg1: i32) -> (i32, i32, i32) {
    %c0_i32 = arith.constant 0 : i32
    %c0_i32_0 = arith.constant 0 : i32
    %c0_i32_1 = arith.constant 0 : i32
    %c0_i32_2 = arith.constant 0 : i32
    return %c0_i32, %c0_i32_0, %c0_i32_1 : i32, i32, i32
  }
  func.func @transform_8(%arg0: i32, %arg1: i32) -> (i32, i32) {
    %c0_i32 = arith.constant 0 : i32
    %c0_i32_0 = arith.constant 0 : i32
    %c0_i32_1 = arith.constant 0 : i32
    return %c0_i32, %c0_i32_0 : i32, i32
  }
  func.func @transform_9(%arg0: i32, %arg1: i32) -> (i32, i32) {
    %c0_i32 = arith.constant 0 : i32
    %c0_i32_0 = arith.constant 0 : i32
    %c0_i32_1 = arith.constant 0 : i32
    return %c0_i32, %c0_i32_0 : i32, i32
  }
  func.func @transform_10(%arg0: i32, %arg1: i32) -> (i32, i32) {
    %c0_i32 = arith.constant 0 : i32
    %c0_i32_0 = arith.constant 0 : i32
    %c0_i32_1 = arith.constant 0 : i32
    return %c0_i32, %c0_i32_0 : i32, i32
  }
  func.func @transform_11(%arg0: i32, %arg1: i32) -> (i32, i32) {
    %c0_i32 = arith.constant 0 : i32
    %c0_i32_0 = arith.constant 0 : i32
    %c0_i32_1 = arith.constant 0 : i32
    return %c0_i32, %c0_i32_0 : i32, i32
  }
  func.func @transform_12(%arg0: i32, %arg1: i32) -> (i32, i32) {
    %c0_i32 = arith.constant 0 : i32
    %c0_i32_0 = arith.constant 0 : i32
    %c0_i32_1 = arith.constant 0 : i32
    return %c0_i32, %c0_i32_0 : i32, i32
  }
  func.func @transform_13(%arg0: i32, %arg1: i32) -> (i32, i32) {
    %c0_i32 = arith.constant 0 : i32
    %c0_i32_0 = arith.constant 0 : i32
    %c0_i32_1 = arith.constant 0 : i32
    return %c0_i32, %c0_i32_0 : i32, i32
  }
  func.func @transform_14(%arg0: i32, %arg1: i32) -> (i32, i32) {
    %c0_i32 = arith.constant 0 : i32
    %c0_i32_0 = arith.constant 0 : i32
    %c0_i32_1 = arith.constant 0 : i32
    return %c0_i32, %c0_i32_0 : i32, i32
  }
  func.func @transform_15(%arg0: i32, %arg1: i32) -> (i32, i32, i32) {
    %c0_i32 = arith.constant 0 : i32
    %c0_i32_0 = arith.constant 0 : i32
    return %arg0, %arg1, %c0_i32 : i32, i32, i32
  }
}

module attributes {stable_mosaic.version = 11 : i64} {
  func.func @transformer_block_kernel(%arg0: i32, %arg1: i32, %arg2: memref<1x8x32xf32, #tpu.memory_space<vmem>>, %arg3: memref<1x32xf32, #tpu.memory_space<vmem>>, %arg4: memref<1x32xf32, #tpu.memory_space<vmem>>, %arg5: memref<32x32xbf16, #tpu.memory_space<vmem>>, %arg6: memref<1x32xf32, #tpu.memory_space<vmem>>, %arg7: memref<32x64xbf16, #tpu.memory_space<vmem>>, %arg8: memref<1x64xf32, #tpu.memory_space<vmem>>, %arg9: memref<4x8x32xbf16, #tpu.memory_space<vmem>>, %arg10: memref<1x32xf32, #tpu.memory_space<vmem>>, %arg11: memref<1x32xf32, #tpu.memory_space<vmem>>, %arg12: memref<1x32xf32, #tpu.memory_space<vmem>>, %arg13: memref<32x128xbf16, #tpu.memory_space<vmem>>, %arg14: memref<1x128xf32, #tpu.memory_space<vmem>>, %arg15: memref<128x32xbf16, #tpu.memory_space<vmem>>, %arg16: memref<1x32xf32, #tpu.memory_space<vmem>>, %arg17: memref<1x8x32xf32, #tpu.memory_space<vmem>>, %arg18: memref<4x8x8xbf16, #tpu.memory_space<vmem>>, %arg19: memref<4x8x8xbf16, #tpu.memory_space<vmem>>) attributes {dimension_semantics = [#tpu.dimension_semantics<parallel>, #tpu.dimension_semantics<arbitrary>], iteration_bounds = array<i64: 2, 1>, scalar_prefetch = 0 : i64, scratch_operands = 2 : i64, tpu.core_type = #tpu.core_type<tc>, window_params = [{transform_indices = @transform_0, window_bounds = array<i64: 1, 8, 32>}, {pipeline_mode = #tpu.pipeline_mode<synchronous>, transform_indices = @transform_1, window_bounds = array<i64: 1, 32>}, {pipeline_mode = #tpu.pipeline_mode<synchronous>, transform_indices = @transform_2, window_bounds = array<i64: 1, 32>}, {pipeline_mode = #tpu.pipeline_mode<synchronous>, transform_indices = @transform_3, window_bounds = array<i64: 32, 32>}, {pipeline_mode = #tpu.pipeline_mode<synchronous>, transform_indices = @transform_4, window_bounds = array<i64: 1, 32>}, {pipeline_mode = #tpu.pipeline_mode<synchronous>, transform_indices = @transform_5, window_bounds = array<i64: 32, 64>}, {pipeline_mode = #tpu.pipeline_mode<synchronous>, transform_indices = @transform_6, window_bounds = array<i64: 1, 64>}, {pipeline_mode = #tpu.pipeline_mode<synchronous>, transform_indices = @transform_7, window_bounds = array<i64: 4, 8, 32>}, {pipeline_mode = #tpu.pipeline_mode<synchronous>, transform_indices = @transform_8, window_bounds = array<i64: 1, 32>}, {pipeline_mode = #tpu.pipeline_mode<synchronous>, transform_indices = @transform_9, window_bounds = array<i64: 1, 32>}, {pipeline_mode = #tpu.pipeline_mode<synchronous>, transform_indices = @transform_10, window_bounds = array<i64: 1, 32>}, {pipeline_mode = #tpu.pipeline_mode<synchronous>, transform_indices = @transform_11, window_bounds = array<i64: 32, 128>}, {pipeline_mode = #tpu.pipeline_mode<synchronous>, transform_indices = @transform_12, window_bounds = array<i64: 1, 128>}, {pipeline_mode = #tpu.pipeline_mode<synchronous>, transform_indices = @transform_13, window_bounds = array<i64: 128, 32>}, {pipeline_mode = #tpu.pipeline_mode<synchronous>, transform_indices = @transform_14, window_bounds = array<i64: 1, 32>}, {transform_indices = @transform_15, window_bounds = array<i64: 1, 8, 32>}]} {
    %c0_i32 = arith.constant 0 : i32
    %0 = arith.cmpi eq, %arg1, %c0_i32 : i32
    %1 = arith.extui %0 : i1 to i32
    %c0_i32_0 = arith.constant 0 : i32
    %2 = arith.cmpi ne, %1, %c0_i32_0 : i32
    scf.if %2 {
      %c0_i32_52 = arith.constant 0 : i32
      %c1_i32_53 = arith.constant 1 : i32
      %107 = arith.muli %c0_i32_52, %c1_i32_53 : i32
      %c0_i32_54 = arith.constant 0 : i32
      %108 = arith.addi %c0_i32_54, %107 : i32
      %c8_i32_55 = arith.constant 8 : i32
      %109 = arith.muli %108, %c8_i32_55 : i32
      %110 = tpu.assume_multiple %109, 8 : i32
      %c0_56 = arith.constant 0 : index
      %111 = arith.index_cast %110 : i32 to index
      %c0_57 = arith.constant 0 : index
      %112 = vector.load %arg2[%c0_56, %111, %c0_57] : memref<1x8x32xf32, #tpu.memory_space<vmem>>, vector<1x8x32xf32>
      %113 = vector.shape_cast %112 : vector<1x8x32xf32> to vector<8x32xf32>
      %c0_58 = arith.constant 0 : index
      %c0_59 = arith.constant 0 : index
      %114 = vector.load %arg3[%c0_58, %c0_59] : memref<1x32xf32, #tpu.memory_space<vmem>>, vector<1x32xf32>
      %c0_60 = arith.constant 0 : index
      %c0_61 = arith.constant 0 : index
      %115 = vector.load %arg4[%c0_60, %c0_61] : memref<1x32xf32, #tpu.memory_space<vmem>>, vector<1x32xf32>
      %cst_62 = arith.constant dense<0.000000e+00> : vector<8xf32>
      %116 = vector.multi_reduction <add>, %113, %cst_62 [1] : vector<8x32xf32> to vector<8xf32>
      %117 = vector.shape_cast %116 : vector<8xf32> to vector<8x1xf32>
      %cst_63 = arith.constant 3.200000e+01 : f32
      %118 = vector.broadcast %cst_63 : f32 to vector<8x1xf32>
      %119 = arith.divf %117, %118 : vector<8x1xf32>
      %120 = vector.broadcast %119 : vector<8x1xf32> to vector<8x32xf32>
      %121 = arith.subf %113, %120 : vector<8x32xf32>
      %122 = arith.mulf %121, %121 : vector<8x32xf32>
      %cst_64 = arith.constant dense<0.000000e+00> : vector<8xf32>
      %123 = vector.multi_reduction <add>, %122, %cst_64 [1] : vector<8x32xf32> to vector<8xf32>
      %124 = vector.shape_cast %123 : vector<8xf32> to vector<8x1xf32>
      %cst_65 = arith.constant 3.200000e+01 : f32
      %125 = vector.broadcast %cst_65 : f32 to vector<8x1xf32>
      %126 = arith.divf %124, %125 : vector<8x1xf32>
      %127 = vector.broadcast %119 : vector<8x1xf32> to vector<8x32xf32>
      %128 = arith.subf %113, %127 : vector<8x32xf32>
      %cst_66 = arith.constant 9.99999974E-6 : f32
      %129 = vector.broadcast %cst_66 : f32 to vector<8x1xf32>
      %130 = arith.addf %126, %129 : vector<8x1xf32>
      %131 = math.rsqrt %130 : vector<8x1xf32>
      %132 = vector.broadcast %131 : vector<8x1xf32> to vector<8x32xf32>
      %133 = arith.mulf %128, %132 : vector<8x32xf32>
      %134 = vector.broadcast %114 : vector<1x32xf32> to vector<8x32xf32>
      %135 = arith.mulf %133, %134 : vector<8x32xf32>
      %136 = vector.broadcast %115 : vector<1x32xf32> to vector<8x32xf32>
      %137 = arith.addf %135, %136 : vector<8x32xf32>
      %138 = arith.truncf %137 : vector<8x32xf32> to vector<8x32xbf16>
      %c0_67 = arith.constant 0 : index
      %c0_68 = arith.constant 0 : index
      %139 = vector.load %arg7[%c0_67, %c0_68] : memref<32x64xbf16, #tpu.memory_space<vmem>>, vector<32x64xbf16>
      %cst_69 = arith.constant dense<0.000000e+00> : vector<8x64xf32>
      %140 = tpu.matmul %138, %139, %cst_69 {dimension_numbers = #tpu.dot_dimension_numbers<[1], [0], [0], [1], [0, 0, 1, 1], [], []>} : vector<8x32xbf16>, vector<32x64xbf16>, vector<8x64xf32> -> vector<8x64xf32>
      %c0_70 = arith.constant 0 : index
      %c0_71 = arith.constant 0 : index
      %141 = vector.load %arg8[%c0_70, %c0_71] : memref<1x64xf32, #tpu.memory_space<vmem>>, vector<1x64xf32>
      %142 = vector.broadcast %141 : vector<1x64xf32> to vector<8x64xf32>
      %143 = arith.addf %140, %142 : vector<8x64xf32>
      %144 = vector.extract_strided_slice %143 {offsets = [0, 0], sizes = [8, 8], strides = [1, 1]} : vector<8x64xf32> to vector<8x8xf32>
      %145 = arith.truncf %144 : vector<8x8xf32> to vector<8x8xbf16>
      %c0_72 = arith.constant 0 : index
      %146 = arith.index_cast %110 : i32 to index
      %c0_73 = arith.constant 0 : index
      %147 = vector.load %arg18[%c0_72, %146, %c0_73] : memref<4x8x8xbf16, #tpu.memory_space<vmem>>, vector<1x8x8xbf16>
      %148 = vector.shape_cast %147 : vector<1x8x8xbf16> to vector<8x8xbf16>
      %149 = vector.shape_cast %145 : vector<8x8xbf16> to vector<1x8x8xbf16>
      tpu.vector_store %arg18[%c0_72, %146, %c0_73], %149 {strides = array<i32>} : memref<4x8x8xbf16, #tpu.memory_space<vmem>>, vector<1x8x8xbf16>,
      %150 = vector.extract_strided_slice %143 {offsets = [0, 32], sizes = [8, 8], strides = [1, 1]} : vector<8x64xf32> to vector<8x8xf32>
      %151 = arith.truncf %150 : vector<8x8xf32> to vector<8x8xbf16>
      %c0_74 = arith.constant 0 : index
      %152 = arith.index_cast %110 : i32 to index
      %c0_75 = arith.constant 0 : index
      %153 = vector.load %arg19[%c0_74, %152, %c0_75] : memref<4x8x8xbf16, #tpu.memory_space<vmem>>, vector<1x8x8xbf16>
      %154 = vector.shape_cast %153 : vector<1x8x8xbf16> to vector<8x8xbf16>
      %155 = vector.shape_cast %151 : vector<8x8xbf16> to vector<1x8x8xbf16>
      tpu.vector_store %arg19[%c0_74, %152, %c0_75], %155 {strides = array<i32>} : memref<4x8x8xbf16, #tpu.memory_space<vmem>>, vector<1x8x8xbf16>,
      %156 = vector.extract_strided_slice %143 {offsets = [0, 8], sizes = [8, 8], strides = [1, 1]} : vector<8x64xf32> to vector<8x8xf32>
      %157 = arith.truncf %156 : vector<8x8xf32> to vector<8x8xbf16>
      %c1 = arith.constant 1 : index
      %158 = arith.index_cast %110 : i32 to index
      %c0_76 = arith.constant 0 : index
      %159 = vector.load %arg18[%c1, %158, %c0_76] : memref<4x8x8xbf16, #tpu.memory_space<vmem>>, vector<1x8x8xbf16>
      %160 = vector.shape_cast %159 : vector<1x8x8xbf16> to vector<8x8xbf16>
      %161 = vector.shape_cast %157 : vector<8x8xbf16> to vector<1x8x8xbf16>
      tpu.vector_store %arg18[%c1, %158, %c0_76], %161 {strides = array<i32>} : memref<4x8x8xbf16, #tpu.memory_space<vmem>>, vector<1x8x8xbf16>,
      %162 = vector.extract_strided_slice %143 {offsets = [0, 40], sizes = [8, 8], strides = [1, 1]} : vector<8x64xf32> to vector<8x8xf32>
      %163 = arith.truncf %162 : vector<8x8xf32> to vector<8x8xbf16>
      %c1_77 = arith.constant 1 : index
      %164 = arith.index_cast %110 : i32 to index
      %c0_78 = arith.constant 0 : index
      %165 = vector.load %arg19[%c1_77, %164, %c0_78] : memref<4x8x8xbf16, #tpu.memory_space<vmem>>, vector<1x8x8xbf16>
      %166 = vector.shape_cast %165 : vector<1x8x8xbf16> to vector<8x8xbf16>
      %167 = vector.shape_cast %163 : vector<8x8xbf16> to vector<1x8x8xbf16>
      tpu.vector_store %arg19[%c1_77, %164, %c0_78], %167 {strides = array<i32>} : memref<4x8x8xbf16, #tpu.memory_space<vmem>>, vector<1x8x8xbf16>,
      %168 = vector.extract_strided_slice %143 {offsets = [0, 16], sizes = [8, 8], strides = [1, 1]} : vector<8x64xf32> to vector<8x8xf32>
      %169 = arith.truncf %168 : vector<8x8xf32> to vector<8x8xbf16>
      %c2 = arith.constant 2 : index
      %170 = arith.index_cast %110 : i32 to index
      %c0_79 = arith.constant 0 : index
      %171 = vector.load %arg18[%c2, %170, %c0_79] : memref<4x8x8xbf16, #tpu.memory_space<vmem>>, vector<1x8x8xbf16>
      %172 = vector.shape_cast %171 : vector<1x8x8xbf16> to vector<8x8xbf16>
      %173 = vector.shape_cast %169 : vector<8x8xbf16> to vector<1x8x8xbf16>
      tpu.vector_store %arg18[%c2, %170, %c0_79], %173 {strides = array<i32>} : memref<4x8x8xbf16, #tpu.memory_space<vmem>>, vector<1x8x8xbf16>,
      %174 = vector.extract_strided_slice %143 {offsets = [0, 48], sizes = [8, 8], strides = [1, 1]} : vector<8x64xf32> to vector<8x8xf32>
      %175 = arith.truncf %174 : vector<8x8xf32> to vector<8x8xbf16>
      %c2_80 = arith.constant 2 : index
      %176 = arith.index_cast %110 : i32 to index
      %c0_81 = arith.constant 0 : index
      %177 = vector.load %arg19[%c2_80, %176, %c0_81] : memref<4x8x8xbf16, #tpu.memory_space<vmem>>, vector<1x8x8xbf16>
      %178 = vector.shape_cast %177 : vector<1x8x8xbf16> to vector<8x8xbf16>
      %179 = vector.shape_cast %175 : vector<8x8xbf16> to vector<1x8x8xbf16>
      tpu.vector_store %arg19[%c2_80, %176, %c0_81], %179 {strides = array<i32>} : memref<4x8x8xbf16, #tpu.memory_space<vmem>>, vector<1x8x8xbf16>,
      %180 = vector.extract_strided_slice %143 {offsets = [0, 24], sizes = [8, 8], strides = [1, 1]} : vector<8x64xf32> to vector<8x8xf32>
      %181 = arith.truncf %180 : vector<8x8xf32> to vector<8x8xbf16>
      %c3 = arith.constant 3 : index
      %182 = arith.index_cast %110 : i32 to index
      %c0_82 = arith.constant 0 : index
      %183 = vector.load %arg18[%c3, %182, %c0_82] : memref<4x8x8xbf16, #tpu.memory_space<vmem>>, vector<1x8x8xbf16>
      %184 = vector.shape_cast %183 : vector<1x8x8xbf16> to vector<8x8xbf16>
      %185 = vector.shape_cast %181 : vector<8x8xbf16> to vector<1x8x8xbf16>
      tpu.vector_store %arg18[%c3, %182, %c0_82], %185 {strides = array<i32>} : memref<4x8x8xbf16, #tpu.memory_space<vmem>>, vector<1x8x8xbf16>,
      %186 = vector.extract_strided_slice %143 {offsets = [0, 56], sizes = [8, 8], strides = [1, 1]} : vector<8x64xf32> to vector<8x8xf32>
      %187 = arith.truncf %186 : vector<8x8xf32> to vector<8x8xbf16>
      %c3_83 = arith.constant 3 : index
      %188 = arith.index_cast %110 : i32 to index
      %c0_84 = arith.constant 0 : index
      %189 = vector.load %arg19[%c3_83, %188, %c0_84] : memref<4x8x8xbf16, #tpu.memory_space<vmem>>, vector<1x8x8xbf16>
      %190 = vector.shape_cast %189 : vector<1x8x8xbf16> to vector<8x8xbf16>
      %191 = vector.shape_cast %187 : vector<8x8xbf16> to vector<1x8x8xbf16>
      tpu.vector_store %arg19[%c3_83, %188, %c0_84], %191 {strides = array<i32>} : memref<4x8x8xbf16, #tpu.memory_space<vmem>>, vector<1x8x8xbf16>,
      %c1_i32_85 = arith.constant 1 : i32
    } else {
    }
    %c8_i32 = arith.constant 8 : i32
    %3 = arith.muli %arg1, %c8_i32 : i32
    %4 = tpu.assume_multiple %3, 8 : i32
    %c0 = arith.constant 0 : index
    %5 = arith.index_cast %4 : i32 to index
    %c0_1 = arith.constant 0 : index
    %6 = vector.load %arg2[%c0, %5, %c0_1] : memref<1x8x32xf32, #tpu.memory_space<vmem>>, vector<1x8x32xf32>
    %7 = vector.shape_cast %6 : vector<1x8x32xf32> to vector<8x32xf32>
    %c0_2 = arith.constant 0 : index
    %c0_3 = arith.constant 0 : index
    %8 = vector.load %arg3[%c0_2, %c0_3] : memref<1x32xf32, #tpu.memory_space<vmem>>, vector<1x32xf32>
    %c0_4 = arith.constant 0 : index
    %c0_5 = arith.constant 0 : index
    %9 = vector.load %arg4[%c0_4, %c0_5] : memref<1x32xf32, #tpu.memory_space<vmem>>, vector<1x32xf32>
    %cst = arith.constant dense<0.000000e+00> : vector<8xf32>
    %10 = vector.multi_reduction <add>, %7, %cst [1] : vector<8x32xf32> to vector<8xf32>
    %11 = vector.shape_cast %10 : vector<8xf32> to vector<8x1xf32>
    %cst_6 = arith.constant 3.200000e+01 : f32
    %12 = vector.broadcast %cst_6 : f32 to vector<8x1xf32>
    %13 = arith.divf %11, %12 : vector<8x1xf32>
    %14 = vector.broadcast %13 : vector<8x1xf32> to vector<8x32xf32>
    %15 = arith.subf %7, %14 : vector<8x32xf32>
    %16 = arith.mulf %15, %15 : vector<8x32xf32>
    %cst_7 = arith.constant dense<0.000000e+00> : vector<8xf32>
    %17 = vector.multi_reduction <add>, %16, %cst_7 [1] : vector<8x32xf32> to vector<8xf32>
    %18 = vector.shape_cast %17 : vector<8xf32> to vector<8x1xf32>
    %cst_8 = arith.constant 3.200000e+01 : f32
    %19 = vector.broadcast %cst_8 : f32 to vector<8x1xf32>
    %20 = arith.divf %18, %19 : vector<8x1xf32>
    %21 = vector.broadcast %13 : vector<8x1xf32> to vector<8x32xf32>
    %22 = arith.subf %7, %21 : vector<8x32xf32>
    %cst_9 = arith.constant 9.99999974E-6 : f32
    %23 = vector.broadcast %cst_9 : f32 to vector<8x1xf32>
    %24 = arith.addf %20, %23 : vector<8x1xf32>
    %25 = math.rsqrt %24 : vector<8x1xf32>
    %26 = vector.broadcast %25 : vector<8x1xf32> to vector<8x32xf32>
    %27 = arith.mulf %22, %26 : vector<8x32xf32>
    %28 = vector.broadcast %8 : vector<1x32xf32> to vector<8x32xf32>
    %29 = arith.mulf %27, %28 : vector<8x32xf32>
    %30 = vector.broadcast %9 : vector<1x32xf32> to vector<8x32xf32>
    %31 = arith.addf %29, %30 : vector<8x32xf32>
    %32 = arith.truncf %31 : vector<8x32xf32> to vector<8x32xbf16>
    %c0_10 = arith.constant 0 : index
    %c0_11 = arith.constant 0 : index
    %33 = vector.load %arg5[%c0_10, %c0_11] : memref<32x32xbf16, #tpu.memory_space<vmem>>, vector<32x32xbf16>
    %cst_12 = arith.constant dense<0.000000e+00> : vector<8x32xf32>
    %34 = tpu.matmul %32, %33, %cst_12 {dimension_numbers = #tpu.dot_dimension_numbers<[1], [0], [0], [1], [0, 0, 1, 1], [], []>} : vector<8x32xbf16>, vector<32x32xbf16>, vector<8x32xf32> -> vector<8x32xf32>
    %c0_13 = arith.constant 0 : index
    %c0_14 = arith.constant 0 : index
    %35 = vector.load %arg6[%c0_13, %c0_14] : memref<1x32xf32, #tpu.memory_space<vmem>>, vector<1x32xf32>
    %36 = vector.broadcast %35 : vector<1x32xf32> to vector<8x32xf32>
    %37 = arith.addf %34, %36 : vector<8x32xf32>
    %38 = vector.shape_cast %37 : vector<8x32xf32> to vector<8x4x8xf32>
    %39 = tpu.transpose %38, [1, 0, 2] : vector<8x4x8xf32> -> vector<4x8x8xf32>
    %40 = arith.truncf %39 : vector<4x8x8xf32> to vector<4x8x8xbf16>
    %cst_15 = arith.constant -1.000000e+30 : f32
    %41 = vector.broadcast %cst_15 : f32 to vector<4x8x1xf32>
    %cst_16 = arith.constant 0.000000e+00 : f32
    %42 = vector.broadcast %cst_16 : f32 to vector<4x8x1xf32>
    %cst_17 = arith.constant 0.000000e+00 : f32
    %43 = vector.broadcast %cst_17 : f32 to vector<4x8x8xf32>
    %c1_i32 = arith.constant 1 : i32
    %44 = arith.addi %arg1, %c1_i32 : i32
    %c0_i32_18 = arith.constant 0 : i32
    %45 = arith.subi %44, %c0_i32_18 : i32
    %46 = arith.addi %c0_i32_18, %45 : i32
    %c1_i32_19 = arith.constant 1 : i32
    %47:3 = scf.for %arg20 = %c0_i32_18 to %46 step %c1_i32_19 iter_args(%arg21 = %41, %arg22 = %42, %arg23 = %43) -> (vector<4x8x1xf32>, vector<4x8x1xf32>, vector<4x8x8xf32>)  : i32 {
      %c8_i32_52 = arith.constant 8 : i32
      %107 = arith.muli %arg20, %c8_i32_52 : i32
      %108 = tpu.assume_multiple %107, 8 : i32
      %c0_53 = arith.constant 0 : index
      %109 = arith.index_cast %108 : i32 to index
      %c0_54 = arith.constant 0 : index
      %110 = vector.load %arg18[%c0_53, %109, %c0_54] : memref<4x8x8xbf16, #tpu.memory_space<vmem>>, vector<4x8x8xbf16>
      %c0_55 = arith.constant 0 : index
      %111 = arith.index_cast %108 : i32 to index
      %c0_56 = arith.constant 0 : index
      %112 = vector.load %arg19[%c0_55, %111, %c0_56] : memref<4x8x8xbf16, #tpu.memory_space<vmem>>, vector<4x8x8xbf16>
      "tpu.trace_start"() <{level = 10 : i32, message = "hqd,hkd->hqk"}> : () -> ()
      %cst_57 = arith.constant dense<0.000000e+00> : vector<4x8x8xf32>
      %113 = tpu.matmul %40, %110, %cst_57 {dimension_numbers = #tpu.dot_dimension_numbers<[2], [2], [1], [1], [0, 0, 0, 1, 1, 1], [0], [0]>} : vector<4x8x8xbf16>, vector<4x8x8xbf16>, vector<4x8x8xf32> -> vector<4x8x8xf32>
      "tpu.trace_stop"() : () -> ()
      %114 = tpu.iota {dimensions = array<i32: 0>} : vector<8x8xi32>
      %115 = vector.broadcast %4 : i32 to vector<8x8xi32>
      %116 = arith.addi %115, %114 : vector<8x8xi32>
      %117 = tpu.iota {dimensions = array<i32: 1>} : vector<8x8xi32>
      %118 = vector.broadcast %108 : i32 to vector<8x8xi32>
      %119 = arith.addi %118, %117 : vector<8x8xi32>
      %120 = arith.cmpi sge, %116, %119 : vector<8x8xi32>
      %cst_58 = arith.constant -1.000000e+30 : f32
      %121 = vector.shape_cast %120 : vector<8x8xi1> to vector<1x8x8xi1>
      %122 = vector.broadcast %121 : vector<1x8x8xi1> to vector<4x8x8xi1>
      %123 = vector.broadcast %cst_58 : f32 to vector<4x8x8xf32>
      %124 = arith.select %122, %113, %123 : vector<4x8x8xi1>, vector<4x8x8xf32>
      %cst_59 = arith.constant dense<0xFF800000> : vector<4x8xf32>
      %125 = vector.multi_reduction <maximumf>, %124, %cst_59 [2] : vector<4x8x8xf32> to vector<4x8xf32>
      %126 = vector.shape_cast %125 : vector<4x8xf32> to vector<4x8x1xf32>
      %127 = arith.maximumf %arg21, %126 : vector<4x8x1xf32>
      %128 = arith.subf %arg21, %127 : vector<4x8x1xf32>
      %129 = math.exp %128 : vector<4x8x1xf32>
      %130 = vector.broadcast %127 : vector<4x8x1xf32> to vector<4x8x8xf32>
      %131 = arith.subf %124, %130 : vector<4x8x8xf32>
      %132 = math.exp %131 : vector<4x8x8xf32>
      %133 = arith.mulf %129, %arg22 : vector<4x8x1xf32>
      %cst_60 = arith.constant dense<0.000000e+00> : vector<4x8xf32>
      %134 = vector.multi_reduction <add>, %132, %cst_60 [2] : vector<4x8x8xf32> to vector<4x8xf32>
      %135 = vector.shape_cast %134 : vector<4x8xf32> to vector<4x8x1xf32>
      %136 = arith.addf %133, %135 : vector<4x8x1xf32>
      %137 = vector.broadcast %129 : vector<4x8x1xf32> to vector<4x8x8xf32>
      %138 = arith.mulf %137, %arg23 : vector<4x8x8xf32>
      %139 = arith.truncf %132 : vector<4x8x8xf32> to vector<4x8x8xbf16>
      "tpu.trace_start"() <{level = 10 : i32, message = "hqk,hkd->hqd"}> : () -> ()
      %cst_61 = arith.constant dense<0.000000e+00> : vector<4x8x8xf32>
      %140 = tpu.matmul %139, %112, %cst_61 {dimension_numbers = #tpu.dot_dimension_numbers<[2], [1], [1], [2], [0, 0, 0, 1, 1, 2], [0], [0]>} : vector<4x8x8xbf16>, vector<4x8x8xbf16>, vector<4x8x8xf32> -> vector<4x8x8xf32>
      "tpu.trace_stop"() : () -> ()
      %141 = arith.addf %138, %140 : vector<4x8x8xf32>
      scf.yield %127, %136, %141 : vector<4x8x1xf32>, vector<4x8x1xf32>, vector<4x8x8xf32>
    }
    %48 = tpu.reciprocal %47#1 {approx = true} : vector<4x8x1xf32> -> vector<4x8x1xf32>
    %49 = vector.broadcast %48 : vector<4x8x1xf32> to vector<4x8x8xf32>
    %50 = arith.mulf %47#2, %49 : vector<4x8x8xf32>
    %51 = arith.truncf %50 : vector<4x8x8xf32> to vector<4x8x8xbf16>
    %c0_20 = arith.constant 0 : index
    %c0_21 = arith.constant 0 : index
    %c0_22 = arith.constant 0 : index
    %52 = vector.load %arg9[%c0_20, %c0_21, %c0_22] : memref<4x8x32xbf16, #tpu.memory_space<vmem>>, vector<4x8x32xbf16>
    "tpu.trace_start"() <{level = 10 : i32, message = "hqd,hdc->hqc"}> : () -> ()
    %cst_23 = arith.constant dense<0.000000e+00> : vector<4x8x32xf32>
    %53 = tpu.matmul %51, %52, %cst_23 {dimension_numbers = #tpu.dot_dimension_numbers<[2], [1], [1], [2], [0, 0, 0, 1, 1, 2], [0], [0]>} : vector<4x8x8xbf16>, vector<4x8x32xbf16>, vector<4x8x32xf32> -> vector<4x8x32xf32>
    "tpu.trace_stop"() : () -> ()
    %cst_24 = arith.constant dense<0.000000e+00> : vector<8x32xf32>
    %54 = vector.multi_reduction <add>, %53, %cst_24 [0] : vector<4x8x32xf32> to vector<8x32xf32>
    %c0_25 = arith.constant 0 : index
    %c0_26 = arith.constant 0 : index
    %55 = vector.load %arg10[%c0_25, %c0_26] : memref<1x32xf32, #tpu.memory_space<vmem>>, vector<1x32xf32>
    %56 = vector.broadcast %55 : vector<1x32xf32> to vector<8x32xf32>
    %57 = arith.addf %54, %56 : vector<8x32xf32>
    %58 = arith.addf %7, %57 : vector<8x32xf32>
    %c0_27 = arith.constant 0 : index
    %c0_28 = arith.constant 0 : index
    %59 = vector.load %arg11[%c0_27, %c0_28] : memref<1x32xf32, #tpu.memory_space<vmem>>, vector<1x32xf32>
    %c0_29 = arith.constant 0 : index
    %c0_30 = arith.constant 0 : index
    %60 = vector.load %arg12[%c0_29, %c0_30] : memref<1x32xf32, #tpu.memory_space<vmem>>, vector<1x32xf32>
    %cst_31 = arith.constant dense<0.000000e+00> : vector<8xf32>
    %61 = vector.multi_reduction <add>, %58, %cst_31 [1] : vector<8x32xf32> to vector<8xf32>
    %62 = vector.shape_cast %61 : vector<8xf32> to vector<8x1xf32>
    %cst_32 = arith.constant 3.200000e+01 : f32
    %63 = vector.broadcast %cst_32 : f32 to vector<8x1xf32>
    %64 = arith.divf %62, %63 : vector<8x1xf32>
    %65 = vector.broadcast %64 : vector<8x1xf32> to vector<8x32xf32>
    %66 = arith.subf %58, %65 : vector<8x32xf32>
    %67 = arith.mulf %66, %66 : vector<8x32xf32>
    %cst_33 = arith.constant dense<0.000000e+00> : vector<8xf32>
    %68 = vector.multi_reduction <add>, %67, %cst_33 [1] : vector<8x32xf32> to vector<8xf32>
    %69 = vector.shape_cast %68 : vector<8xf32> to vector<8x1xf32>
    %cst_34 = arith.constant 3.200000e+01 : f32
    %70 = vector.broadcast %cst_34 : f32 to vector<8x1xf32>
    %71 = arith.divf %69, %70 : vector<8x1xf32>
    %72 = vector.broadcast %64 : vector<8x1xf32> to vector<8x32xf32>
    %73 = arith.subf %58, %72 : vector<8x32xf32>
    %cst_35 = arith.constant 9.99999974E-6 : f32
    %74 = vector.broadcast %cst_35 : f32 to vector<8x1xf32>
    %75 = arith.addf %71, %74 : vector<8x1xf32>
    %76 = math.rsqrt %75 : vector<8x1xf32>
    %77 = vector.broadcast %76 : vector<8x1xf32> to vector<8x32xf32>
    %78 = arith.mulf %73, %77 : vector<8x32xf32>
    %79 = vector.broadcast %59 : vector<1x32xf32> to vector<8x32xf32>
    %80 = arith.mulf %78, %79 : vector<8x32xf32>
    %81 = vector.broadcast %60 : vector<1x32xf32> to vector<8x32xf32>
    %82 = arith.addf %80, %81 : vector<8x32xf32>
    %83 = arith.truncf %82 : vector<8x32xf32> to vector<8x32xbf16>
    %c0_36 = arith.constant 0 : index
    %c0_37 = arith.constant 0 : index
    %84 = vector.load %arg13[%c0_36, %c0_37] : memref<32x128xbf16, #tpu.memory_space<vmem>>, vector<32x128xbf16>
    %cst_38 = arith.constant dense<0.000000e+00> : vector<8x128xf32>
    %85 = tpu.matmul %83, %84, %cst_38 {dimension_numbers = #tpu.dot_dimension_numbers<[1], [0], [0], [1], [0, 0, 1, 1], [], []>} : vector<8x32xbf16>, vector<32x128xbf16>, vector<8x128xf32> -> vector<8x128xf32>
    %c0_39 = arith.constant 0 : index
    %c0_40 = arith.constant 0 : index
    %86 = vector.load %arg14[%c0_39, %c0_40] : memref<1x128xf32, #tpu.memory_space<vmem>>, vector<1x128xf32>
    %87 = vector.broadcast %86 : vector<1x128xf32> to vector<8x128xf32>
    %88 = arith.addf %85, %87 : vector<8x128xf32>
    %cst_41 = arith.constant 5.000000e-01 : f32
    %89 = vector.broadcast %cst_41 : f32 to vector<8x128xf32>
    %90 = arith.mulf %89, %88 : vector<8x128xf32>
    %cst_42 = arith.constant 0.707106769 : f32
    %91 = vector.broadcast %cst_42 : f32 to vector<8x128xf32>
    %92 = arith.mulf %88, %91 : vector<8x128xf32>
    %93 = math.erf %92 : vector<8x128xf32>
    %cst_43 = arith.constant 1.000000e+00 : f32
    %94 = vector.broadcast %cst_43 : f32 to vector<8x128xf32>
    %95 = arith.addf %94, %93 : vector<8x128xf32>
    %96 = arith.mulf %90, %95 : vector<8x128xf32>
    %97 = arith.truncf %96 : vector<8x128xf32> to vector<8x128xbf16>
    %c0_44 = arith.constant 0 : index
    %c0_45 = arith.constant 0 : index
    %98 = vector.load %arg15[%c0_44, %c0_45] : memref<128x32xbf16, #tpu.memory_space<vmem>>, vector<128x32xbf16>
    %cst_46 = arith.constant dense<0.000000e+00> : vector<8x32xf32>
    %99 = tpu.matmul %97, %98, %cst_46 {dimension_numbers = #tpu.dot_dimension_numbers<[1], [0], [0], [1], [0, 0, 1, 1], [], []>} : vector<8x128xbf16>, vector<128x32xbf16>, vector<8x32xf32> -> vector<8x32xf32>
    %c0_47 = arith.constant 0 : index
    %c0_48 = arith.constant 0 : index
    %100 = vector.load %arg16[%c0_47, %c0_48] : memref<1x32xf32, #tpu.memory_space<vmem>>, vector<1x32xf32>
    %101 = vector.broadcast %100 : vector<1x32xf32> to vector<8x32xf32>
    %102 = arith.addf %99, %101 : vector<8x32xf32>
    %103 = arith.addf %58, %102 : vector<8x32xf32>
    %c0_49 = arith.constant 0 : index
    %c0_50 = arith.constant 0 : index
    %c0_51 = arith.constant 0 : index
    %104 = vector.load %arg17[%c0_49, %c0_50, %c0_51] : memref<1x8x32xf32, #tpu.memory_space<vmem>>, vector<1x8x32xf32>
    %105 = vector.shape_cast %104 : vector<1x8x32xf32> to vector<8x32xf32>
    %106 = vector.shape_cast %103 : vector<8x32xf32> to vector<1x8x32xf32>
    tpu.vector_store %arg17[%c0_49, %c0_50, %c0_51], %106 {strides = array<i32>} : memref<1x8x32xf32, #tpu.memory_space<vmem>>, vector<1x8x32xf32>,
    return
  }
  func.func @transform_0(%arg0: i32, %arg1: i32) -> (i32, i32, i32) {
    %c0_i32 = arith.constant 0 : i32
    %c0_i32_0 = arith.constant 0 : i32
    %c0_i32_1 = arith.constant 0 : i32
    return %arg0, %c0_i32, %c0_i32_0 : i32, i32, i32
  }
  func.func @transform_1(%arg0: i32, %arg1: i32) -> (i32, i32) {
    %c0_i32 = arith.constant 0 : i32
    %c0_i32_0 = arith.constant 0 : i32
    %c0_i32_1 = arith.constant 0 : i32
    return %c0_i32, %c0_i32_0 : i32, i32
  }
  func.func @transform_2(%arg0: i32, %arg1: i32) -> (i32, i32) {
    %c0_i32 = arith.constant 0 : i32
    %c0_i32_0 = arith.constant 0 : i32
    %c0_i32_1 = arith.constant 0 : i32
    return %c0_i32, %c0_i32_0 : i32, i32
  }
  func.func @transform_3(%arg0: i32, %arg1: i32) -> (i32, i32) {
    %c0_i32 = arith.constant 0 : i32
    %c0_i32_0 = arith.constant 0 : i32
    %c0_i32_1 = arith.constant 0 : i32
    return %c0_i32, %c0_i32_0 : i32, i32
  }
  func.func @transform_4(%arg0: i32, %arg1: i32) -> (i32, i32) {
    %c0_i32 = arith.constant 0 : i32
    %c0_i32_0 = arith.constant 0 : i32
    %c0_i32_1 = arith.constant 0 : i32
    return %c0_i32, %c0_i32_0 : i32, i32
  }
  func.func @transform_5(%arg0: i32, %arg1: i32) -> (i32, i32) {
    %c0_i32 = arith.constant 0 : i32
    %c0_i32_0 = arith.constant 0 : i32
    %c0_i32_1 = arith.constant 0 : i32
    return %c0_i32, %c0_i32_0 : i32, i32
  }
  func.func @transform_6(%arg0: i32, %arg1: i32) -> (i32, i32) {
    %c0_i32 = arith.constant 0 : i32
    %c0_i32_0 = arith.constant 0 : i32
    %c0_i32_1 = arith.constant 0 : i32
    return %c0_i32, %c0_i32_0 : i32, i32
  }
  func.func @transform_7(%arg0: i32, %arg1: i32) -> (i32, i32, i32) {
    %c0_i32 = arith.constant 0 : i32
    %c0_i32_0 = arith.constant 0 : i32
    %c0_i32_1 = arith.constant 0 : i32
    %c0_i32_2 = arith.constant 0 : i32
    return %c0_i32, %c0_i32_0, %c0_i32_1 : i32, i32, i32
  }
  func.func @transform_8(%arg0: i32, %arg1: i32) -> (i32, i32) {
    %c0_i32 = arith.constant 0 : i32
    %c0_i32_0 = arith.constant 0 : i32
    %c0_i32_1 = arith.constant 0 : i32
    return %c0_i32, %c0_i32_0 : i32, i32
  }
  func.func @transform_9(%arg0: i32, %arg1: i32) -> (i32, i32) {
    %c0_i32 = arith.constant 0 : i32
    %c0_i32_0 = arith.constant 0 : i32
    %c0_i32_1 = arith.constant 0 : i32
    return %c0_i32, %c0_i32_0 : i32, i32
  }
  func.func @transform_10(%arg0: i32, %arg1: i32) -> (i32, i32) {
    %c0_i32 = arith.constant 0 : i32
    %c0_i32_0 = arith.constant 0 : i32
    %c0_i32_1 = arith.constant 0 : i32
    return %c0_i32, %c0_i32_0 : i32, i32
  }
  func.func @transform_11(%arg0: i32, %arg1: i32) -> (i32, i32) {
    %c0_i32 = arith.constant 0 : i32
    %c0_i32_0 = arith.constant 0 : i32
    %c0_i32_1 = arith.constant 0 : i32
    return %c0_i32, %c0_i32_0 : i32, i32
  }
  func.func @transform_12(%arg0: i32, %arg1: i32) -> (i32, i32) {
    %c0_i32 = arith.constant 0 : i32
    %c0_i32_0 = arith.constant 0 : i32
    %c0_i32_1 = arith.constant 0 : i32
    return %c0_i32, %c0_i32_0 : i32, i32
  }
  func.func @transform_13(%arg0: i32, %arg1: i32) -> (i32, i32) {
    %c0_i32 = arith.constant 0 : i32
    %c0_i32_0 = arith.constant 0 : i32
    %c0_i32_1 = arith.constant 0 : i32
    return %c0_i32, %c0_i32_0 : i32, i32
  }
  func.func @transform_14(%arg0: i32, %arg1: i32) -> (i32, i32) {
    %c0_i32 = arith.constant 0 : i32
    %c0_i32_0 = arith.constant 0 : i32
    %c0_i32_1 = arith.constant 0 : i32
    return %c0_i32, %c0_i32_0 : i32, i32
  }
  func.func @transform_15(%arg0: i32, %arg1: i32) -> (i32, i32, i32) {
    %c0_i32 = arith.constant 0 : i32
    %c0_i32_0 = arith.constant 0 : i32
    return %arg0, %arg1, %c0_i32 : i32, i32, i32
  }
}

</mosaic_0001>

<bundles_post_ra>
// kernel: tpu_custom_call.1
= control target key start
LH: loop header
LB: loop body
LE: loop exit
PB: predicated region body
PF: predicated region fallthrough
CT: control target
= control target key end

     0   :  { %s3199_s0 = inlined_call_operand.vmem [shape: f32[2,8,32], index: 0, kind: input, shape index: {}]   ;;  %s3200_s1 = inlined_call_operand.vmem [shape: f32[1,32], index: 1, kind: input, shape index: {}]   ;;  %s3201_s2 = inlined_call_operand.vmem [shape: f32[1,32], index: 2, kind: input, shape index: {}]   ;;  %s3202_s3 = inlined_call_operand.vmem [shape: bf16[32,32], index: 3, kind: input, shape index: {}]   ;;  %s3203_s4 = inlined_call_operand.vmem [shape: f32[1,32], index: 4, kind: input, shape index: {}]   ;;  %s3204_s5 = inlined_call_operand.vmem [shape: bf16[32,64], index: 5, kind: input, shape index: {}]   ;;  %s3205_s6 = inlined_call_operand.vmem [shape: f32[1,64], index: 6, kind: input, shape index: {}]   ;;  %s3206_s7 = inlined_call_operand.vmem [shape: bf16[4,8,32], index: 7, kind: input, shape index: {}]   ;;  %s3207_s8 = inlined_call_operand.vmem [shape: f32[1,32], index: 8, kind: input, shape index: {}]   ;;  %s3208_s9 = inlined_call_operand.vmem [shape: f32[1,32], index: 9, kind: input, shape index: {}]   ;;  %s3209_s10 = inlined_call_operand.vmem [shape: f32[1,32], index: 10, kind: input, shape index: {}]   ;;  %s3210_s11 = inlined_call_operand.vmem [shape: bf16[32,128], index: 11, kind: input, shape index: {}]   ;;  %s3211_s12 = inlined_call_operand.vmem [shape: f32[1,128], index: 12, kind: input, shape index: {}]   ;;  %s3212_s13 = inlined_call_operand.vmem [shape: bf16[128,32], index: 13, kind: input, shape index: {}]   ;;  %s3213_s14 = inlined_call_operand.vmem [shape: f32[1,32], index: 14, kind: input, shape index: {}]   ;;  %s3214_s15 = inlined_call_operand.hbm [shape: f32[2,8,32], index: 15, kind: output, shape index: {}]  }
   0x1   :  { %3218 = sst [smem:[#allocation9_spill]] %s3199_s0 }
   0x2   :  { %3219 = sst [smem:[#allocation10_spill]] %s3200_s1 }
   0x3   :  { %3220 = sst [smem:[#allocation11_spill]] %s3201_s2 }
   0x4   :  { %3221 = sst [smem:[#allocation12_spill]] %s3202_s3 }
   0x5   :  { %20 = vsyncpa [#allocation5], 0 }
   0x6   :  { %22 = vsyncpa [#allocation5 + $0x1], 0  ;;  %s2680_s18 = smov 0   ;;  %s2682_s19 = smov 0  }
   0x7   :  { %s2684_s20 = smov 0   ;;  %s2686_s21 = smov 0  }
   0x8   :  { %s2688_s22 = smov 0   ;;  %s2690_s23 = smov 0  }
   0x9 LB: > { %3222 = sst [smem:[#allocation7_spill]] %s2512_s18  ;;  %s1968_s24 = sadd.s32 4294967295, %s2532_s23   ;;  %s2532_s23 = sphi %s2690_s23, %s28_s23   ;;  %s2528_s22 = sphi %s2688_s22, %s3253_s22   ;;  %s2524_s21 = sphi %s2686_s21, %s3252_s21   ;;  %s2520_s20 = sphi %s2684_s20, %s3251_s20   ;;  %s2516_s19 = sphi %s2682_s19, %s3250_s19   ;;  %s2512_s18 = sphi %s2680_s18, %s3249_s18  }
   0xa   : > { %s1969_s25 = sadd.s32 4294967294, %s2532_s23   ;;  %s40_s26 = sadd.s32 1, %s2528_s22 }
   0xb   : > { %s369_s27 = sadd.s32 1, %s2520_s20  ;;  %p42_p0 = scmp.ge.s32.totalorder %s40_s26, 2 }
   0xc   : > { %p379_p1 = scmp.ne.s32.totalorder %s2520_s20, %s2516_s19  ;;  %p380_p2 = scmp.eq.s32.totalorder %s1968_s24, 1 }
   0xd   : > { %p385_p3 = scmp.ne.s32.totalorder %s2516_s19, %s2512_s18  ;;  %s3255_s26 = smov (%p42_p0, %s40_s26), 0 }
   0xe   : > { %3223 = sst [smem:[#allocation8_spill]] %s3255_s26  ;;  %p2720_p4 = por %p380_p2, %p379_p1 }
   0xf   : > { %p386_p5 = scmp.eq.s32.totalorder %s1969_s25, 1  ;;  %s364_s29 = ssub.s32 %s2528_s22, %s3255_s26 }
  0x10   : > { %p1972_p6 = scmp.ge.s32.totalorder %s2532_s23, 1  ;;  %p367_p7 = scmp.eq.s32.totalorder %s364_s29, 0 }
  0x11   : > { %p2727_p8 = por %p386_p5, %p385_p3  ;;  %p453_p9 = scmp.lt.s32.totalorder %s2532_s23, 3 }
  0x12   : > { %s2733_s16 = scalar_select %p367_p7, %s2520_s20, %s369_s27  }
  0x13   : > { %p454_p10 = pnand %p1972_p6, %p453_p9 }
  0x14   : > { %p500_p11 = scmp.lt.s32.totalorder (!%p454_p10), %s2524_s21, 1  ;;  %vm512_vm0 = vcmask (!%p454_p10), 261120   ;;  %s3226_s0 = sld [smem:[#allocation9_spill]] (!%p454_p10)  ;;  %v2357_v13 = vld [vmem:[%s3204_s5] sm:$0xff] (!%p454_p10)   ;;  %v2586_v14 = vmov (!%p454_p10), 0.0   ;;  %vm2587_vm1 = vmmov (!%p454_p10), 0   ;;  %v773_v50 = vlaneseq (!%p454_p10) }
  0x15   : > { %457 = sbr.rel (%p454_p10) target bundleno = 2329 (0x919), region = 80  ;;  %s3227_s3 = sld [smem:[#allocation12_spill]] (!%p454_p10)  ;;  %2076 = vmatprep.subr.bf16.mxu1 (!%p454_p10), %v2586_v14  ;;  %2068 = vmatprep.subr.bf16.mxu0 (!%p454_p10), %v2586_v14  ;;  %v2359_v16 = vld [vmem:[%s3204_s5 + $0x8] sm:$0xff] (!%p454_p10)   ;;  %v1984_v35 = vld [vmem:[%s3203_s4] ss:$0 sm:$0xff] (!%p454_p10)  ;;  %vm609_vm2 = vcmask (!%p454_p10), 60416  }
  0x16   : > { %s3217_s27 = sand.u32 (!%p454_p10), 1, %s2516_s19   ;;  %2069 = vmatpush3.bf16.msra.mxu0 (!%p454_p10), %v2357_v13  ;;  %2080 = vmatprep.mubr.msk.bf16.mxu1 (!%p454_p10), %vm2587_vm1, %v2586_v14  ;;  %s3228_s1 = sld [smem:[#allocation10_spill]] (!%p454_p10)  ;;  %v1977_v40 = vld [vmem:[%s3205_s6] ss:$0 sm:$0xff] (!%p454_p10)  ;;  %v2595_v48 = vmov (!%p454_p10), 1983009808  }
  0x17   : > { %2070 = vmatprep.subr.bf16.mxu0 (!%p454_p10), %v2586_v14  ;;  %2072 = vmatprep.mubr.msk.bf16.mxu0 (!%p454_p10), %vm2587_vm1, %v2586_v14  ;;  %s3229_s2 = sld [smem:[#allocation11_spill]] (!%p454_p10)  ;;  %s2589_s25 = smov (!%p454_p10), 112   ;;  %v771_v49 = vunpack.c.l.s4 (!%p454_p10), %v2595_v48  ;;  %v2596_v51 = vmov (!%p454_p10), 1934713408   ;;  %v2789_v54 = vshrl.u32 (!%p454_p10), %v773_v50, 7  ;;  %v2821_v48 = vmov (!%p454_p10), 0.0  }
  0x18   : > { %s2590_s18 = smov (!%p454_p10), 104   ;;  %s2593_s29 = smov (!%p454_p10), 80   ;;  %v803_v52 = vunpack.c.l.s4 (!%p454_p10), %v2596_v51  ;;  %v2825_v51 = vmov (!%p454_p10), 0.0  }
  0x19   : > { %v772_v53 = vunpack.c.0.s8 (!%p454_p10), %v771_v49  ;;  %v2823_v49 = vmov (!%p454_p10), 0.0  }
  0x1a   : > { %2071 = vmatpush3.bf16.msra.mxu0 (!%p454_p10), %v2359_v16  ;;  %v804_v57 = vunpack.c.0.s8 (!%p454_p10), %v803_v52  ;;  %v2827_v52 = vmov (!%p454_p10), 0.0  }
  0x1b   : > { %v2356_v12 = vld [vmem:[%s3227_s3] sm:$0xff] (!%p454_p10)   ;;  %v2358_v15 = vld [vmem:[%s3227_s3 + $0x8] sm:$0xff] (!%p454_p10)   ;;  %v775_v58 = vsub.s32 (!%p454_p10), %v772_v53, %v2789_v54  ;;  %v2829_v53 = vmov (!%p454_p10), 0.0  }
  0x1c   : > { %s501_s17 = scalar_select %p500_p11, %s2524_s21, 1  ;;  %2077 = vmatpush3.bf16.msra.mxu1 %v2356_v12  ;;  %v1982_v24 = vld [vmem:[%s3228_s1] ss:$0 sm:$0xff] }
  0x1d   : > { %2078 = vmatprep.subr.bf16.mxu1 %v2586_v14  ;;  %v1983_v26 = vld [vmem:[%s3229_s2] ss:$0 sm:$0xff] }
  0x1e   : > { %s1974_s24 = sshll.u32 %s501_s17, 3  ;;  %s2588_s17 = smov 120  }
  0x1f   : > { %s503_s26 = scalar_lea.vmem %s3226_s0, %s1974_s24  ;;  %s2758_s24 = sshll.u32 %s3217_s27, 3 }
  0x20   : > { %v2740_v0 = vld [vmem:[%s503_s26] sm:$0xff]  ;;  %2079 = vmatpush3.bf16.msra.mxu1 %v2358_v15  ;;  %s2591_s26 = smov 96   ;;  %s2592_s0 = smov 88  }
  0x21   : > { %v663_v1 = vsel %vm512_vm0, %v2740_v0, 0.0  ;;  %s2594_s27 = smov 72  }
  0x22   : > { %664 = vadd.xlane.f32.xlu0 %v663_v1 }
  0x26   : > { %514 = vadd.xlane.f32.xlu0 %v663_v1  ;;  %v807_v1 = vsub.s32 %v804_v57, %v2789_v54  ;;  %v2835_v57 = vmov -1e+30  }
  0xaf   : > { %v665_v2 = vpop.xlane.xlu0 %664 }
  0xb0   : > { %v667_v3 = vmul.f32 0.03125, %v665_v2 }
  0xb2   : > { %v668_v4 = vsub.f32 %v2740_v0, %v667_v3 }
  0xb3   : > { %v515_v5 = vpop.xlane.xlu0 %514 }
  0xb4   : > { %v517_v6 = vmul.f32 0.03125, %v515_v5  ;;  %v669_v7 = vmul.f32 %v668_v4, %v668_v4 }
  0xb6   : > { %v518_v8 = vsub.f32 %v2740_v0, %v517_v6  ;;  %v670_v9 = vsel %vm512_vm0, %v669_v7, 0.0 }
  0xb7   : > { %671 = vadd.xlane.f32.xlu1 %v670_v9 }
  0xb8   : > { %v519_v10 = vmul.f32 %v518_v8, %v518_v8 }
  0xba   : > { %v520_v11 = vsel %vm512_vm0, %v519_v10, 0.0 }
  0xbb   : > { %521 = vadd.xlane.f32.xlu1 %v520_v11 }
 0x144   : > { %v672_v17 = vpop.xlane.xlu1 %671 }
 0x145   : > { %v673_v18 = vmul.f32 0.03125, %v672_v17 }
 0x147   : > { %v674_v19 = vadd.f32 1e-05, %v673_v18 }
 0x148   : > { %v522_v20 = vpop.xlane.xlu1 %521 }
 0x149   : > { %2360 = vrsqrt.f32 %v674_v19  ;;  %v523_v21 = vmul.f32 0.03125, %v522_v20 }
 0x14b   : > { %v524_v22 = vadd.f32 1e-05, %v523_v21 }
 0x14d   : > { %2362 = vrsqrt.f32 %v524_v22 }
 0x153   : > { %v2361_v23 = vpop.eup %2360 }
 0x154   : > { %v676_v25 = vmul.f32 %v2361_v23, %v668_v4 }
 0x156   : > { %v683_v27 = vmul.f32 %v1982_v24, %v676_v25 }
 0x157   : > { %v2363_v28 = vpop.eup %2362 }
 0x158   : > { %v690_v29 = vadd.f32 %v1983_v26, %v683_v27  ;;  %v526_v30 = vmul.f32 %v2363_v28, %v518_v8 }
 0x15a   : > { %v691_v31 = vpack.c.bf16 %v690_v29, %v690_v29  ;;  %v533_v32 = vmul.f32 %v1982_v24, %v526_v30 }
 0x15c   : > { %2081 = vmatmul.mubr.msk.bf16.vlgmr.msra.gmra.mrb[0].mxu1 %vm512_vm0, %v691_v31  ;;  %v540_v33 = vadd.f32 %v1983_v26, %v533_v32 }
 0x15e   : > { %v541_v34 = vpack.c.bf16 %v540_v33, %v540_v33 }
 0x160   : > { %2073 = vmatmul.mubr.msk.bf16.vlgmr.msra.gmra.mrb[0].mxu0 %vm512_vm0, %v541_v34 }
 0x22f   : > { %v752_v36 = vpop.f32.mrb[0].mxu1 }
 0x230   : > { %v753_v37 = vadd.f32 %v1984_v35, %v752_v36  ;;  %v2082_v38 = vpop.f32.mrb[1].mxu1 }
 0x231   : > { %v755_v39 = vpop.f32.mrb[2].mxu1 }
 0x232   : > { %v2083_v41 = vpop.f32.mrb[3].mxu1  ;;  %759 = vrot.lane.b32.xlu0 %v753_v37, %s2588_s17  ;;  %762 = vrot.lane.b32.xlu1 %v753_v37, %s2589_s25 }
 0x233   : > { %v602_v42 = vpop.f32.mrb[0].mxu0 }
 0x234   : > { %v603_v43 = vadd.f32 %v1977_v40, %v602_v42  ;;  %v2074_v44 = vpop.f32.mrb[1].mxu0 }
 0x235   : > { %v605_v45 = vpop.f32.mrb[2].mxu0 }
 0x236   : > { %v608_v46 = vpack.c.bf16 %v603_v43, %v603_v43  ;;  %765 = vrot.lane.b32.xlu1 %v753_v37, %s2590_s18  ;;  %v2075_v47 = vpop.f32.mrb[3].mxu0 }
 0x237   : > { %v2819_v47 = vmov 0.0  }
 0x238   : > { %618 = vrot.lane.b32.xlu0 %v608_v46, %s2588_s17  ;;  %610 = vst.msk [vmem:[#allocation2] sm:$0xf] %vm609_vm2, %v608_v46  ;;  %s2841_s17 = smov 0  }
 0x23a   : > { %614 = vrot.lane.b32.xlu1 %v608_v46, %s2591_s26 }
 0x23c   : > { %631 = vrot.lane.b32.xlu0 %v608_v46, %s2589_s25 }
 0x23e   : > { %625 = vrot.lane.b32.xlu1 %v608_v46, %s2592_s0 }
 0x240   : > { %644 = vrot.lane.b32.xlu0 %v608_v46, %s2590_s18 }
 0x242   : > { %638 = vrot.lane.b32.xlu1 %v608_v46, %s2593_s29 }
 0x246   : > { %651 = vrot.lane.b32.xlu1 %v608_v46, %s2594_s27  ;;  %v2817_v46 = vmov 0.0  }
 0x2a4   : > { %v763_v55 = vpop.permute.xlu1 %762  ;;  %v760_v56 = vpop.permute.xlu0 %759 }
 0x2a5   : > { %v768_v59 = vcombine.low %v753_v37, %v763_v55  ;;  %v769_v60 = vcombine.high %v753_v37, %v763_v55  ;;  %v2831_v55 = vmov 0.0  }
 0x2a7   : > { %v776_v3 = vrot.slane %v768_v59, %v775_v58  ;;  %v783_v4 = vrot.slane %v769_v60, %v775_v58  ;;  %v2839_v59 = vmov -1e+30  }
 0x2a8   : > { %v766_v61 = vpop.permute.xlu1 %765 }
 0x2a9   : > { %v784_v62 = vcombine.low %v760_v56, %v766_v61  ;;  %v785_v63 = vcombine.high %v760_v56, %v766_v61  ;;  %v2833_v56 = vmov -1e+30  }
 0x2aa   : > { %v619_v2 = vpop.permute.xlu0 %618 }
 0x2ab   : > { %v792_v5 = vrot.slane %v784_v62, %v775_v58  ;;  %v799_v6 = vrot.slane %v785_v63, %v775_v58  ;;  %624 = vst.msk [vmem:[#allocation2 + $0x4] sm:$0xf] %vm609_vm2, %v619_v2 }
 0x2ac   : > { %v615_v7 = vpop.permute.xlu1 %614 }
 0x2ad   : > { %v800_v8 = vcombine.low %v776_v3, %v792_v5  ;;  %v801_v9 = vcombine.high %v776_v3, %v792_v5  ;;  %v816_v10 = vcombine.low %v783_v4, %v799_v6  ;;  %v817_v11 = vcombine.high %v783_v4, %v799_v6  ;;  %617 = vst.msk [vmem:[#allocation3] sm:$0xf] %vm609_vm2, %v615_v7 }
 0x2ae   : > { %v632_v12 = vpop.permute.xlu0 %631 }
 0x2af   : > { %v808_v13 = vrot.slane %v800_v8, %v807_v1  ;;  %v815_v15 = vrot.slane %v801_v9, %v807_v1  ;;  %v824_v16 = vrot.slane %v816_v10, %v807_v1  ;;  %v831_v17 = vrot.slane %v817_v11, %v807_v1  ;;  %637 = vst.msk [vmem:[#allocation2 + $0x8] sm:$0xf] %vm609_vm2, %v632_v12 }
 0x2b0   : > { %v626_v18 = vpop.permute.xlu1 %625 }
 0x2b1   : > { %v836_v19 = vcombine.low %v808_v13, %v815_v15  ;;  %v1988_v20 = vcombine.high %v808_v13, %v815_v15  ;;  %v852_v21 = vcombine.low %v824_v16, %v831_v17  ;;  %v1989_v22 = vcombine.high %v824_v16, %v831_v17  ;;  %630 = vst.msk [vmem:[#allocation3 + $0x4] sm:$0xf] %vm609_vm2, %v626_v18 }
 0x2b2   : > { %v645_v23 = vpop.permute.xlu0 %644 }
 0x2b3   : > { %v843_v24 = vrot.slane %v836_v19, %v775_v58  ;;  %v851_v25 = vrot.slane %v1988_v20, %v775_v58  ;;  %v859_v26 = vrot.slane %v852_v21, %v775_v58  ;;  %v867_v27 = vrot.slane %v1989_v22, %v775_v58  ;;  %650 = vst.msk [vmem:[#allocation2 + $0xc] sm:$0xf] %vm609_vm2, %v645_v23 }
 0x2b4   : > { %v639_v28 = vpop.permute.xlu1 %638  ;;  %v2837_v58 = vmov -1e+30  }
 0x2b5   : > { %v868_v29 = vcombine.low %v843_v24, %v851_v25  ;;  %v869_v30 = vcombine.high %v843_v24, %v851_v25  ;;  %v884_v31 = vcombine.low %v859_v26, %v867_v27  ;;  %v885_v32 = vcombine.high %v859_v26, %v867_v27  ;;  %643 = vst.msk [vmem:[#allocation3 + $0x8] sm:$0xf] %vm609_vm2, %v639_v28 }
 0x2b7   : > { %v876_v33 = vrot.slane %v868_v29, %v807_v1  ;;  %v883_v34 = vrot.slane %v869_v30, %v807_v1  ;;  %v892_v35 = vrot.slane %v884_v31, %v807_v1  ;;  %v899_v36 = vrot.slane %v885_v32, %v807_v1 }
 0x2b8   : > { %v652_v37 = vpop.permute.xlu1 %651 }
 0x2b9   : > { %v2799_v38 = vcombine.low %v876_v33, %v892_v35  ;;  %v2801_v39 = vcombine.high %v876_v33, %v892_v35  ;;  %v2803_v40 = vcombine.low %v883_v34, %v899_v36  ;;  %v2805_v41 = vcombine.high %v883_v34, %v899_v36  ;;  %656 = vst.msk [vmem:[#allocation3 + $0xc] sm:$0xf] %vm609_vm2, %v652_v37 }
 0x2bb   : > { %v904_v42 = vpack.c.bf16 %v2799_v38, %v2799_v38  ;;  %v905_v43 = vpack.c.bf16 %v2801_v39, %v2801_v39  ;;  %v906_v44 = vpack.c.bf16 %v2803_v40, %v2803_v40  ;;  %v907_v45 = vpack.c.bf16 %v2805_v41, %v2805_v41 }
 0x2bc LB: >> { %v2597_v60 = vmov 0.0   ;;  %s1990_s25 = sshll.u32 %s2584_s17, 3  ;;  %vm2598_vm3 = vmmov 0   ;;  %vm942_vm4 = vcmask 64512   ;;  %v1132_v6 = vand.u32 127, %v773_v50  ;;  %s912_s17 = sadd.s32 1, %s2584_s17   ;;  %s2584_s17 = sphi %s2841_s17, %s912_s17   ;;  %v2580_v59 = vphi %v2839_v59, %v3243_v59   ;;  %v2576_v58 = vphi %v2837_v58, %v3242_v58   ;;  %v2572_v57 = vphi %v2835_v57, %v3241_v57   ;;  %v2568_v56 = vphi %v2833_v56, %v3240_v56   ;;  %v2564_v55 = vphi %v2831_v55, %v3239_v55   ;;  %v2560_v53 = vphi %v2829_v53, %v3238_v53   ;;  %v2556_v52 = vphi %v2827_v52, %v3237_v52   ;;  %v2552_v51 = vphi %v2825_v51, %v3236_v51   ;;  %v2548_v49 = vphi %v2823_v49, %v3235_v49   ;;  %v2544_v48 = vphi %v2821_v48, %v3234_v48   ;;  %v2540_v47 = vphi %v2819_v47, %v3233_v47   ;;  %v2536_v46 = vphi %v2817_v46, %v3232_v46  }
 0x2bd   : >> { %2084 = vmatprep.subr.bf16.mxu0 %v2597_v60  ;;  %2090 = vmatprep.subr.bf16.mxu1 %v2597_v60  ;;  %s2891_s18 = sshra.s32 %s1990_s25, 3  ;;  %v1133_v7 = vstv %s1990_s25  ;;  %vm1213_vm6 = vcmask 1043456   ;;  %p2999_p12 = scmp.ge.s32.totalorder %s912_s17, 1 }
 0x2be   : >> { %2086 = vmatprep.mubr.msk.bf16.mxu0 %vm2598_vm3, %v2597_v60  ;;  %2092 = vmatprep.mubr.msk.bf16.mxu1 %vm2598_vm3, %v2597_v60  ;;  %s1991_s26 = sshll.u32 %s2891_s18, 2  ;;  %v1134_v8 = vadd.s32 %v1133_v7, %v1132_v6  ;;  %v1412_v38 = vld [vmem:[%s3206_s7 + $0x4] sm:$0xf] (%p2999_p12)  ;;  %s2022_s27 = sshll.u32 (%p2999_p12), %s2524_s21, 7 }
 0x2bf   : >> { %s931_s0 = scalar_lea.vmem [#allocation2], %s1991_s26  ;;  %s937_s29 = scalar_lea.vmem [#allocation3], %s1991_s26 }
 0x2c0   : >> { %v932_v61 = vld [vmem:[%s931_s0] sm:$0xf]  ;;  %v933_v62 = vld [vmem:[%s931_s0 + $0x4] sm:$0xf]  ;;  %v934_v2 = vld [vmem:[%s931_s0 + $0x8] sm:$0xf]  ;;  %vm1135_vm5 = vcmp.ge.s32.totalorder %v2789_v54, %v1134_v8  ;;  %s3147_s25 = scalar_lea.hbm (%p2999_p12), %s3214_s15, %s2022_s27 }
 0x2c1   : >> { %v947_v63 = vsel %vm942_vm4, %v932_v61, 0  ;;  %v993_v1 = vsel %vm942_vm4, %v933_v62, 0  ;;  %v935_v3 = vld [vmem:[%s931_s0 + $0xc] sm:$0xf]  ;;  %v1039_v4 = vsel %vm942_vm4, %v934_v2, 0  ;;  %s3244_s26 = scalar_lea.vmem (%p2999_p12), [#allocation4], %s2758_s24 }
 0x2c2   : >> { %2085 = vmatpush3.bf16.xpose.msra.mxu0 %v947_v63  ;;  %2091 = vmatpush3.bf16.xpose.msra.mxu1 %v993_v1  ;;  %v1085_v5 = vsel %vm942_vm4, %v935_v3, 0  ;;  %v938_v34 = vld [vmem:[%s937_s29] sm:$0xf]  ;;  %v939_v36 = vld [vmem:[%s937_s29 + $0x4] sm:$0xf]  ;;  %s1847_s0 = sshll.u32 (%p2999_p12), %s3244_s26, 4  ;;  %s3245_s18 = smov (%p2999_p12), %s3244_s26  ;;  %s3149_s0 = int_to_ptr.vmem [resolvable:$true] %s1847_s0 }
 0x2c3   : >> { %2096 = vmatprep.subr.bf16.mxu0 %v2597_v60  ;;  %2102 = vmatprep.subr.bf16.mxu1 %v2597_v60  ;;  %v1215_v35 = vsel %vm1213_vm6, %v938_v34, 0  ;;  %v1261_v37 = vsel %vm1213_vm6, %v939_v36, 0  ;;  %v940_v61 = vld [vmem:[%s937_s29 + $0x8] sm:$0xf]  ;;  %v941_v63 = vld [vmem:[%s937_s29 + $0xc] sm:$0xf] }
 0x2c4   : >> { %v1307_v62 = vsel %vm1213_vm6, %v940_v61, 0  ;;  %v1353_v1 = vsel %vm1213_vm6, %v941_v63, 0  ;;  %s3246_s21 = sand.u32 (%p2999_p12), 1, %s2516_s19   ;;  %s2402_s26 = scalar_lea.vmem (%p2999_p12), %s3149_s0, 128 }
 0x2c5   : > { %s1833_s1 = scalar_lea.sflag (%p2999_p12), [#allocation5], %s3246_s21  ;;  %p2403_p13 = scmp.ne.s32.totalorder (%p2999_p12), %s3149_s0, %s2402_s26 }
 0x2c6   : > { %s2599_s2 = smov (%p2999_p12), [#allocation4]  }
 0x2c7   : > { %p2404_p0 = pnand (%p2999_p12), %p2403_p13, %p2720_p4  ;;  %s2406_s3 = sshll.u32 (%p2999_p12), %s2599_s2, 4  ;;  %s2407_s3 = int_to_ptr.vmem [resolvable:$false] %s2406_s3 }
 0x2c8   : > { %s2408_s27 = scalar_lea.vmem (%p2999_p12), %s2407_s3, 256  ;;  %p2409_p2 = scmp.lt.s32.totalorder (%p2999_p12), %s3149_s0, %s2407_s3 }
 0x2c9   : >> { %2087 = vmatmul.mubr.msk.bf16.vlgmr.msra.gmra.mrb[0].mxu0 %vm942_vm4, %v904_v42  ;;  %2093 = vmatmul.mubr.msk.bf16.vlgmr.msra.gmra.mrb[0].mxu1 %vm942_vm4, %v905_v43  ;;  %v1467_v43 = vsel (%p2999_p12), %vm1213_vm6, %v1412_v38, 0  ;;  %v2386_v38 = vld [vmem:[%s3212_s13 + $0x20] sm:$0xff] (%p2999_p12)   ;;  %p2405_p1 = pneg (%p2999_p12), %p2404_p0  ;;  %p2410_p3 = scmp.lt.s32.totalorder (%p2999_p12), %s2408_s27, %s2402_s26 }
 0x2ca   : >> { %2097 = vmatpush3.bf16.xpose.msra.mxu0 %v1039_v4  ;;  %2103 = vmatpush3.bf16.xpose.msra.mxu1 %v1085_v5 }
 0x2cb   : >> { %2098 = vmatprep.mubr.msk.bf16.mxu0 %vm2598_vm3, %v2597_v60  ;;  %2104 = vmatprep.mubr.msk.bf16.mxu1 %vm2598_vm3, %v2597_v60  ;;  %p2411_p5 = por (%p2999_p12), %p2410_p3, %p2409_p2 }
 0x2cc   : >> { %2108 = vmatprep.subr.bf16.mxu0 %v2597_v60  ;;  %2114 = vmatprep.subr.bf16.mxu1 %v2597_v60 }
 0x2cd   : > { %p2412_p6 = pnand (%p2999_p12), %p2411_p5, %p2405_p1 }
 0x2d1   : >> { %2099 = vmatmul.mubr.msk.bf16.vlgmr.msra.gmra.mrb[4].mxu0 %vm942_vm4, %v906_v44  ;;  %2105 = vmatmul.mubr.msk.bf16.vlgmr.msra.gmra.mrb[4].mxu1 %vm942_vm4, %v907_v45 }
 0x2d2   : >> { %2110 = vmatprep.mubr.msk.bf16.mxu0 %vm2598_vm3, %v2597_v60  ;;  %2116 = vmatprep.mubr.msk.bf16.mxu1 %vm2598_vm3, %v2597_v60 }
 0x2d3   : >> { %2109 = vmatpush3.bf16.msra.mxu0 %v1215_v35  ;;  %2115 = vmatpush3.bf16.msra.mxu1 %v1261_v37 }
 0x2d4   : >> { %2120 = vmatprep.subr.bf16.mxu0 %v2597_v60  ;;  %2126 = vmatprep.subr.bf16.mxu1 %v2597_v60 }
 0x39c   : >> { %v983_v9 = vpop.f32.mrb[0].mxu0  ;;  %v1029_v10 = vpop.f32.mrb[0].mxu1 }
 0x39d   : >> { %v1138_v11 = vsel %vm1135_vm5, %v983_v9, -1e+30  ;;  %v2088_v12 = vpop.f32.mrb[1].mxu0  ;;  %v1139_v13 = vsel %vm1135_vm5, %v1029_v10, -1e+30  ;;  %v2094_v15 = vpop.f32.mrb[1].mxu1 }
 0x39e   : >> { %v986_v16 = vpop.f32.mrb[2].mxu0  ;;  %v1142_v17 = vsel %vm942_vm4, %v1138_v11, -inf  ;;  %v1032_v18 = vpop.f32.mrb[2].mxu1  ;;  %v1145_v21 = vsel %vm942_vm4, %v1139_v13, -inf }
 0x39f   : >> { %1143 = vmax.xlane.f32.xlu0 %v1142_v17  ;;  %v2089_v19 = vpop.f32.mrb[3].mxu0  ;;  %v2095_v20 = vpop.f32.mrb[3].mxu1 }
 0x3a3   : >> { %1146 = vmax.xlane.f32.xlu0 %v1145_v21 }
 0x3a4   : >> { %v1075_v22 = vpop.f32.mrb[4].mxu0  ;;  %v1121_v23 = vpop.f32.mrb[4].mxu1 }
 0x3a5   : >> { %v1140_v24 = vsel %vm1135_vm5, %v1075_v22, -1e+30  ;;  %v2100_v25 = vpop.f32.mrb[5].mxu0  ;;  %v1141_v26 = vsel %vm1135_vm5, %v1121_v23, -1e+30  ;;  %v2106_v27 = vpop.f32.mrb[5].mxu1 }
 0x3a6   : >> { %v1078_v28 = vpop.f32.mrb[6].mxu0  ;;  %v1148_v29 = vsel %vm942_vm4, %v1140_v24, -inf  ;;  %v1124_v30 = vpop.f32.mrb[6].mxu1  ;;  %v1151_v33 = vsel %vm942_vm4, %v1141_v26, -inf }
 0x3a7   : >> { %1149 = vmax.xlane.f32.xlu1 %v1148_v29  ;;  %v2101_v31 = vpop.f32.mrb[7].mxu0  ;;  %v2107_v32 = vpop.f32.mrb[7].mxu1 }
 0x3ab   : >> { %1152 = vmax.xlane.f32.xlu1 %v1151_v33 }
 0x42c   : >> { %v1144_v2 = vpop.xlane.xlu0 %1143 }
 0x42d   : >> { %v2953_v3 = vmax.f32 %v2580_v59, %v1144_v2  }
 0x42f   : >> { %v1158_v4 = vsub.f32 %v2580_v59, %v2953_v3  ;;  %v1170_v5 = vsub.f32 %v1138_v11, %v2953_v3 }
 0x430   : >> { %v1147_v6 = vpop.xlane.xlu0 %1146 }
 0x431   : >> { %v1174_v7 = vmul.f32 1.442695, %v1170_v5  ;;  %v2959_v8 = vmax.f32 %v2576_v58, %v1147_v6   ;;  %v1162_v31 = vmul.f32 1.442695, %v1158_v4 }
 0x433   : >> { %v1159_v9 = vsub.f32 %v2576_v58, %v2959_v8  ;;  %v1171_v10 = vsub.f32 %v1139_v13, %v2959_v8  ;;  %2364 = vpow2.f32 %v1174_v7 }
 0x434   : >> { %v1150_v12 = vpop.xlane.xlu1 %1149 }
 0x435   : >> { %v1176_v15 = vmul.f32 1.442695, %v1171_v10  ;;  %v2965_v16 = vmax.f32 %v2572_v57, %v1150_v12   ;;  %v1164_v32 = vmul.f32 1.442695, %v1159_v9 }
 0x437   : >> { %v1160_v59 = vsub.f32 %v2572_v57, %v2965_v16  ;;  %v1172_v11 = vsub.f32 %v1140_v24, %v2965_v16  ;;  %2366 = vpow2.f32 %v1176_v15 }
 0x438   : >> { %v1153_v17 = vpop.xlane.xlu1 %1152 }
 0x439   : >> { %v1178_v18 = vmul.f32 1.442695, %v1172_v11  ;;  %v2971_v19 = vmax.f32 %v2568_v56, %v1153_v17   ;;  %v1166_v33 = vmul.f32 1.442695, %v1160_v59 }
 0x43b   : >> { %v1161_v58 = vsub.f32 %v2568_v56, %v2971_v19  ;;  %v1173_v13 = vsub.f32 %v1141_v26, %v2971_v19  ;;  %2368 = vpow2.f32 %v1178_v18 }
 0x43d   : >> { %v1180_v20 = vmul.f32 1.442695, %v1173_v13  ;;  %v2365_v21 = vpop.eup %2364 }
 0x43e   : >> { %v1186_v22 = vsel %vm942_vm4, %v2365_v21, 0.0  ;;  %v1206_v23 = vpack.c.bf16 %v2365_v21, %v2365_v21 }
 0x43f   : >> { %2370 = vpow2.f32 %v1180_v20  ;;  %1187 = vadd.xlane.f32.xlu0 %v1186_v22 }
 0x440   : >> { %2111 = vmatmul.mubr.msk.bf16.vlgmr.msra.gmra.mrb[8].mxu0 %vm942_vm4, %v1206_v23  ;;  %2372 = vpow2.f32 %v1162_v31 }
 0x441   : >> { %v2367_v57 = vpop.eup %2366  ;;  %2121 = vmatpush3.bf16.msra.mxu0 %v1307_v62  ;;  %2122 = vmatprep.mubr.msk.bf16.mxu0 %vm2598_vm3, %v2597_v60  ;;  %2374 = vpow2.f32 %v1164_v32 }
 0x442   : >> { %v1189_v24 = vsel %vm942_vm4, %v2367_v57, 0.0  ;;  %v1207_v56 = vpack.c.bf16 %v2367_v57, %v2367_v57  ;;  %2376 = vpow2.f32 %v1166_v33  ;;  %2132 = vmatprep.subr.bf16.mxu0 (%p2999_p12), %v2586_v14 }
 0x443   : >> { %1190 = vadd.xlane.f32.xlu1 %v1189_v24 }
 0x444   : >> { %2117 = vmatmul.mubr.msk.bf16.vlgmr.msra.gmra.mrb[8].mxu1 %vm942_vm4, %v1207_v56 }
 0x445   : >> { %v2369_v25 = vpop.eup %2368  ;;  %2127 = vmatpush3.bf16.msra.mxu1 %v1353_v1  ;;  %2128 = vmatprep.mubr.msk.bf16.mxu1 %vm2598_vm3, %v2597_v60  ;;  %v1168_v60 = vmul.f32 1.442695, %v1161_v58 }
 0x446   : >> { %v1192_v26 = vsel %vm942_vm4, %v2369_v25, 0.0  ;;  %v1208_v27 = vpack.c.bf16 %v2369_v25, %v2369_v25  ;;  %2150 = vmatprep.subr.bf16.mxu1 (%p2999_p12), %v2586_v14 }
 0x447   : >> { %1193 = vadd.xlane.f32.xlu0 %v1192_v26  ;;  %2378 = vpow2.f32 %v1168_v60 }
 0x448   : >> { %2123 = vmatmul.mubr.msk.bf16.vlgmr.msra.gmra.mrb[12].mxu0 %vm942_vm4, %v1208_v27 }
 0x449   : >> { %v2371_v28 = vpop.eup %2370  ;;  %2134 = vmatprep.mubr.msk.bf16.mxu0 (%p2999_p12), %vm2587_vm1, %v2586_v14 }
 0x44a   : >> { %v1195_v29 = vsel %vm942_vm4, %v2371_v28, 0.0  ;;  %v1209_v30 = vpack.c.bf16 %v2371_v28, %v2371_v28  ;;  %v2373_v34 = vpop.eup %2372 }
 0x44b   : >> { %1196 = vadd.xlane.f32.xlu1 %v1195_v29  ;;  %v1182_v35 = vmul.f32 %v2564_v55, %v2373_v34  ;;  %v2375_v36 = vpop.eup %2374  ;;  %v1202_v15 = vmul.f32 %v2548_v49, %v2373_v34  ;;  %v1411_v29 = vld [vmem:[%s3206_s7] sm:$0xf] (%p2999_p12) }
 0x44c   : >> { %2129 = vmatmul.mubr.msk.bf16.vlgmr.msra.gmra.mrb[12].mxu1 %vm942_vm4, %v1209_v30  ;;  %v1183_v62 = vmul.f32 %v2560_v53, %v2375_v36  ;;  %v2377_v63 = vpop.eup %2376  ;;  %v1203_v53 = vmul.f32 %v2544_v48, %v2375_v36 }
 0x44d   : >> { %v1184_v4 = vmul.f32 %v2556_v52, %v2377_v63  ;;  %v1204_v22 = vmul.f32 %v2540_v47, %v2377_v63  ;;  %2152 = vmatprep.mubr.msk.bf16.mxu1 (%p2999_p12), %vm2587_vm1, %v2586_v14 }
 0x451   : >> { %v2379_v5 = vpop.eup %2378 }
 0x452   : >> { %v1185_v9 = vmul.f32 %v2552_v51, %v2379_v5  ;;  %v1205_v56 = vmul.f32 %v2536_v46, %v2379_v5 }
 0x4cc   : >> { %v1188_v37 = vpop.xlane.xlu0 %1187 }
 0x4cd   : >> { %v1198_v61 = vadd.f32 %v1188_v37, %v1182_v35  }
 0x4cf   : > { %2390 = vrcp.f32 (%p2999_p12), %v1198_v61 }
 0x4d0   : >> { %v1191_v1 = vpop.xlane.xlu1 %1190 }
 0x4d1   : >> { %v1199_v2 = vadd.f32 %v1191_v1, %v1183_v62  }
 0x4d3   : > { %2392 = vrcp.f32 (%p2999_p12), %v1199_v2 }
 0x4d4   : >> { %v1194_v6 = vpop.xlane.xlu0 %1193 }
 0x4d5   : >> { %v1200_v7 = vadd.f32 %v1194_v6, %v1184_v4  }
 0x4d8   : >> { %v1197_v10 = vpop.xlane.xlu1 %1196 }
 0x4d9   : >> { %v1201_v12 = vadd.f32 %v1197_v10, %v1185_v9   ;;  %v2391_v54 = vpop.eup (%p2999_p12), %2390 }
 0x4db   : > { %2394 = vrcp.f32 (%p2999_p12), %v1201_v12 }
 0x4dc   : > { %2396 = vrcp.f32 (%p2999_p12), %v1200_v7 }
 0x4dd   : > { %v2393_v39 = vpop.eup (%p2999_p12), %2392 }
 0x4e5   : > { %v2395_v41 = vpop.eup (%p2999_p12), %2394 }
 0x513   : >> { %v1251_v55 = vpop.f32.mrb[8].mxu0 }
 0x514   : >> { %v1395_v11 = vadd.f32 %v1251_v55, %v1202_v15   ;;  %v2112_v59 = vpop.f32.mrb[9].mxu0  ;;  %v3239_v55 = vmov %v1198_v61 }
 0x515   : >> { %v1254_v17 = vpop.f32.mrb[10].mxu0  ;;  %v3243_v59 = vmov %v2953_v3  ;;  %v1414_v3 = vld [vmem:[%s3206_s7 + $0xc] sm:$0xf] (%p2999_p12) }
 0x516   : >> { %v2113_v18 = vpop.f32.mrb[11].mxu0  ;;  %v1559_v50 = vsel (%p2999_p12), %vm1213_vm6, %v1414_v3, 0  ;;  %v1403_v40 = vmul.f32 (%p2999_p12), %v2391_v54, %v1395_v11  ;;  %v2005_v17 = vld [vmem:[%s3207_s8] ss:$0 sm:$0xff] (%p2999_p12)  ;;  %v2385_v54 = vld [vmem:[%s3212_s13 + $0x18] sm:$0xff] (%p2999_p12)  }
 0x517   : >> { %v1297_v58 = vpop.f32.mrb[8].mxu1  ;;  %2151 = vmatpush3.bf16.msra.mxu1 (%p2999_p12), %v1559_v50 }
 0x518   : >> { %v1396_v13 = vadd.f32 %v1297_v58, %v1203_v53   ;;  %v2118_v20 = vpop.f32.mrb[9].mxu1  ;;  %v3238_v53 = vmov %v1199_v2  ;;  %v3242_v58 = vmov %v2959_v8  ;;  %2164 = vmatprep.subr.bf16.mxu1 (%p2999_p12), %v2586_v14  ;;  %v1407_v42 = vpack.c.bf16 (%p2999_p12), %v1403_v40, %v1403_v40  ;;  %v2388_v40 = vld [vmem:[%s3212_s13 + $0x30] sm:$0xff] (%p2999_p12)  }
 0x519   : >> { %v1300_v52 = vpop.f32.mrb[10].mxu1 }
 0x51a   : >> { %v2119_v21 = vpop.f32.mrb[11].mxu1  ;;  %v3237_v52 = vmov %v1200_v7  ;;  %v1404_v45 = vmul.f32 (%p2999_p12), %v2393_v39, %v1396_v13  ;;  %v2387_v39 = vld [vmem:[%s3212_s13 + $0x28] sm:$0xff] (%p2999_p12)  }
 0x51b   : >> { %v1343_v23 = vpop.f32.mrb[12].mxu0 }
 0x51c   : >> { %v2995_v47 = vadd.f32 %v1343_v23, %v1204_v22   ;;  %v2124_v51 = vpop.f32.mrb[13].mxu0  ;;  %v1408_v8 = vpack.c.bf16 (%p2999_p12), %v1404_v45, %v1404_v45 }
 0x51d   : >> { %v1346_v57 = vpop.f32.mrb[14].mxu0  ;;  %v3236_v51 = vmov %v1201_v12  ;;  %914 = sbr.rel (!%p2999_p12) target bundleno = 700 (0x2bc), region = 135 }
 0x51e   : >> { %v3230_v24 = vmov %v2995_v47  ;;  %v2125_v49 = vpop.f32.mrb[15].mxu0  ;;  %v3241_v57 = vmov %v2965_v16  ;;  %v1421_v16 = vsel (%p2999_p12), %vm1213_vm6, %v1411_v29, 0  ;;  %v2382_v51 = vld [vmem:[%s3212_s13] sm:$0xff] (%p2999_p12)  }
 0x51f   : >> { %v1389_v25 = vpop.f32.mrb[12].mxu1  ;;  %v3233_v47 = vmov %v3230_v24  ;;  %v3235_v49 = vmov %v1395_v11  ;;  %2133 = vmatpush3.bf16.msra.mxu0 (%p2999_p12), %v1421_v16  ;;  %v2383_v57 = vld [vmem:[%s3212_s13 + $0x8] sm:$0xff] (%p2999_p12)   ;;  %v2007_v29 = vld [vmem:[%s3209_s10] ss:$0 sm:$0xff] (%p2999_p12) }
 0x520   : >> { %v1398_v26 = vadd.f32 %v1389_v25, %v1205_v56   ;;  %v2130_v27 = vpop.f32.mrb[13].mxu1  ;;  %v3240_v56 = vmov %v2971_v19  ;;  %2138 = vmatprep.subr.bf16.mxu0 (%p2999_p12), %v2586_v14  ;;  %v1413_v47 = vld [vmem:[%s3206_s7 + $0x8] sm:$0xf] (%p2999_p12)  ;;  %v2397_v19 = vpop.eup (%p2999_p12), %2396  ;;  %v2384_v49 = vld [vmem:[%s3212_s13 + $0x10] sm:$0xff] (%p2999_p12)  }
 0x521   : >> { %v1392_v28 = vpop.f32.mrb[14].mxu1  ;;  %v1513_v30 = vsel (%p2999_p12), %vm1213_vm6, %v1413_v47, 0  ;;  %v1405_v31 = vmul.f32 (%p2999_p12), %v2397_v19, %v3230_v24  ;;  %v2380_v24 = vld [vmem:[%s3210_s11] sm:$0xff] (%p2999_p12)  }
 0x522   : >> { %v2131_v48 = vpop.f32.mrb[15].mxu1  ;;  %v3232_v46 = vmov %v1398_v26  ;;  %v1406_v44 = vmul.f32 (%p2999_p12), %v2395_v41, %v1398_v26  ;;  %2135 = vmatmul.mubr.msk.bf16.vlgmr.msra.gmra.mrb[0].mxu0 (%p2999_p12), %vm942_vm4, %v1407_v42  ;;  %v2006_v28 = vld [vmem:[%s3208_s9] ss:$0 sm:$0xff] (%p2999_p12)  ;;  %v2389_v41 = vld [vmem:[%s3212_s13 + $0x38] sm:$0xff] (%p2999_p12)  }
 0x523   : >> { %v3234_v48 = vmov %v1396_v13  ;;  %2139 = vmatpush3.bf16.msra.mxu0 (%p2999_p12), %v1467_v43  ;;  %2140 = vmatprep.mubr.msk.bf16.mxu0 (%p2999_p12), %vm2587_vm1, %v2586_v14  ;;  %v1409_v32 = vpack.c.bf16 (%p2999_p12), %v1405_v31, %v1405_v31  ;;  %v2008_v42 = vld [vmem:[%s3211_s12] ss:$0 sm:$0xff] (%p2999_p12) }
 0x524   : > { %v1410_v46 = vpack.c.bf16 %v1406_v44, %v1406_v44  ;;  %2144 = vmatprep.subr.bf16.mxu0 %v2586_v14 }
 0x526   : > { %2153 = vmatmul.mubr.msk.bf16.vlgmr.msra.gmra.mrb[0].mxu1 %vm942_vm4, %v1410_v46 }
 0x527   : > { %2180 = vmatprep.mubr.msk.bf16.mxu1 %vm2587_vm1, %v2586_v14  ;;  %2165 = vmatpush3.bf16.msra.mxu1 %v2382_v51 }
 0x528   : > { %2166 = vmatprep.subr.bf16.mxu1 %v2586_v14 }
 0x52a   : > { %2141 = vmatmul.mubr.msk.bf16.vlgmr.msra.gmra.mrb[4].mxu0 %vm942_vm4, %v1408_v8 }
 0x52b   : > { %2145 = vmatpush3.bf16.msra.mxu0 %v1513_v30  ;;  %2146 = vmatprep.mubr.msk.bf16.mxu0 %vm2587_vm1, %v2586_v14 }
 0x52c   : > { %2156 = vmatprep.subr.bf16.mxu0 %v2586_v14  ;;  %2167 = vmatpush3.bf16.msra.mxu1 %v2383_v57 }
 0x52d   : > { %2168 = vmatprep.subr.bf16.mxu1 %v2586_v14 }
 0x530   : > { %2169 = vmatpush3.bf16.msra.mxu1 %v2384_v49 }
 0x531   : > { %2170 = vmatprep.subr.bf16.mxu1 %v2586_v14 }
 0x532   : > { %2147 = vmatmul.mubr.msk.bf16.vlgmr.msra.gmra.mrb[8].mxu0 %vm942_vm4, %v1409_v32 }
 0x533   : > { %2160 = vmatprep.mubr.msk.bf16.mxu0 %vm2587_vm1, %v2586_v14  ;;  %2157 = vmatpush3.bf16.msra.mxu0 %v2380_v24 }
 0x534   : > { %2158 = vmatprep.subr.bf16.mxu0 %v2586_v14  ;;  %2171 = vmatpush3.bf16.msra.mxu1 %v2385_v54 }
 0x535   : > { %2172 = vmatprep.subr.bf16.mxu1 %v2586_v14 }
 0x538   : > { %2173 = vmatpush3.bf16.msra.mxu1 %v2386_v38 }
 0x539   : > { %2174 = vmatprep.subr.bf16.mxu1 %v2586_v14 }
 0x53c   : > { %2175 = vmatpush3.bf16.msra.mxu1 %v2387_v39 }
 0x53d   : > { %2176 = vmatprep.subr.bf16.mxu1 %v2586_v14 }
 0x540   : > { %2177 = vmatpush3.bf16.msra.mxu1 %v2388_v40 }
 0x541   : > { %2178 = vmatprep.subr.bf16.mxu1 %v2586_v14 }
 0x544   : > { %2179 = vmatpush3.bf16.msra.mxu1 %v2389_v41 }
 0x5f5   : > { %v1457_v33 = vpop.f32.mrb[0].mxu0 }
 0x5f6   : > { %v2136_v60 = vpop.f32.mrb[1].mxu0  ;;  %v1601_v1 = vsel %vm512_vm0, %v1457_v33, 0.0  ;;  %v2012_v33 = vld [vmem:[%s3213_s14] ss:$0 sm:$0xff] }
 0x5f7   : > { %v1460_v34 = vpop.f32.mrb[2].mxu0 }
 0x5f8   : > { %v2137_v36 = vpop.f32.mrb[3].mxu0 }
 0x5f9   : > { %v1595_v35 = vpop.f32.mrb[0].mxu1 }
 0x5fa   : > { %v2154_v37 = vpop.f32.mrb[1].mxu1  ;;  %v1606_v10 = vsel %vm512_vm0, %v1595_v35, 0.0 }
 0x5fb   : > { %v1598_v61 = vpop.f32.mrb[2].mxu1 }
 0x5fc   : > { %v2155_v62 = vpop.f32.mrb[3].mxu1 }
 0x5fd   : > { %v1503_v63 = vpop.f32.mrb[4].mxu0 }
 0x5fe   : > { %v1602_v2 = vsel %vm512_vm0, %v1503_v63, 0.0  ;;  %v2142_v4 = vpop.f32.mrb[5].mxu0 }
 0x5ff   : > { %v1603_v5 = vadd.f32 %v1602_v2, %v1601_v1  ;;  %v1506_v6 = vpop.f32.mrb[6].mxu0 }
 0x600   : > { %v2143_v7 = vpop.f32.mrb[7].mxu0 }
 0x605   : > { %v1549_v9 = vpop.f32.mrb[8].mxu0 }
 0x606   : > { %v1604_v12 = vsel %vm512_vm0, %v1549_v9, 0.0  ;;  %v2148_v15 = vpop.f32.mrb[9].mxu0 }
 0x607   : > { %v1605_v55 = vadd.f32 %v1604_v12, %v1603_v5  ;;  %v1552_v11 = vpop.f32.mrb[10].mxu0 }
 0x608   : > { %v2149_v59 = vpop.f32.mrb[11].mxu0 }
 0x609   : > { %v1607_v18 = vadd.f32 %v1606_v10, %v1605_v55 }
 0x60b   : > { %v1615_v53 = vadd.f32 %v2005_v17, %v1607_v18 }
 0x60d   : > { %v3083_v58 = vadd.f32 %v1615_v53, %v2740_v0  ;;  %v2381_v0 = vld [vmem:[%s3210_s11 + $0x8] sm:$0xff]  }
 0x60e   : > { %2159 = vmatpush3.bf16.msra.mxu0 %v2381_v0 }
 0x60f   : > { %v1619_v13 = vsel %vm512_vm0, %v3083_v58, 0.0 }
 0x610   : > { %1620 = vadd.xlane.f32.xlu0 %v1619_v13 }
 0x69d   : > { %v1621_v20 = vpop.xlane.xlu0 %1620 }
 0x69e   : > { %v1622_v52 = vmul.f32 0.03125, %v1621_v20 }
 0x6a0   : > { %v1623_v21 = vsub.f32 %v3083_v58, %v1622_v52 }
 0x6a2   : > { %v1624_v22 = vmul.f32 %v1623_v21, %v1623_v21 }
 0x6a4   : > { %v1625_v23 = vsel %vm512_vm0, %v1624_v22, 0.0 }
 0x6a5   : > { %1626 = vadd.xlane.f32.xlu0 %v1625_v23 }
 0x732   : > { %v1627_v56 = vpop.xlane.xlu0 %1626 }
 0x733   : > { %v1628_v25 = vmul.f32 0.03125, %v1627_v56 }
 0x735   : > { %v1629_v26 = vadd.f32 1e-05, %v1628_v25 }
 0x737   : > { %2398 = vrsqrt.f32 %v1629_v26 }
 0x741   : > { %v2399_v27 = vpop.eup %2398 }
 0x742   : > { %v1631_v48 = vmul.f32 %v2399_v27, %v1623_v21 }
 0x744   : > { %v1638_v16 = vmul.f32 %v2006_v28, %v1631_v48 }
 0x746   : > { %v1645_v3 = vadd.f32 %v2007_v29, %v1638_v16 }
 0x748   : > { %v1646_v50 = vpack.c.bf16 %v1645_v3, %v1645_v3 }
 0x74a   : > { %2161 = vmatmul.mubr.msk.bf16.vlgmr.msra.gmra.mrb[12].mxu0 %vm512_vm0, %v1646_v50 }
 0x81d   : > { %v1707_v43 = vpop.f32.mrb[12].mxu0 }
 0x81e   : > { %v1708_v44 = vadd.f32 %v2008_v42, %v1707_v43  ;;  %v2162_v45 = vpop.f32.mrb[13].mxu0 }
 0x81f   : > { %v1710_v46 = vpop.f32.mrb[14].mxu0 }
 0x820   : > { %v1714_v47 = vmul.f32 0.70710677, %v1708_v44  ;;  %v2163_v8 = vpop.f32.mrb[15].mxu0  ;;  %v1713_v14 = vmul.f32 0.5, %v1708_v44 }
 0x822   : > { %2400 = verf.f32 %v1714_v47 }
 0x82c   : > { %v2401_v19 = vpop.eup %2400 }
 0x82d   : > { %v1716_v30 = vadd.f32 1.0, %v2401_v19 }
 0x82f   : > { %v1717_v31 = vmul.f32 %v1716_v30, %v1713_v14 }
 0x831   : > { %v1718_v32 = vpack.c.bf16 %v1717_v31, %v1717_v31 }
 0x833   : > { %2181 = vmatmul.mubr.bf16.vlgmr.msra.gmra.mrb[4].mxu1 %v1718_v32 }
 0x906   : > { %v1824_v60 = vpop.f32.mrb[4].mxu1 }
 0x907   : > { %v1825_v34 = vadd.f32 %v2012_v33, %v1824_v60  ;;  %v2182_v35 = vpop.f32.mrb[5].mxu1 }
 0x908   : > { %v1827_v36 = vpop.f32.mrb[6].mxu1 }
 0x909   : > { %v1830_v37 = vadd.f32 %v1825_v34, %v3083_v58  ;;  %v2183_v61 = vpop.f32.mrb[7].mxu1 }
 0x90b   : > { %1831 = vst.msk [vmem:[%s3245_s18] sm:$0xff] %vm512_vm0, %v1830_v37 }
 0x90c   : > { %2415 = shalt.err (!%p2412_p6)
}
 0x90d   : > { %s2416_s24 = scalar_lea.hbm %s3147_s25, 128  ;;  %s2420_s2 = scalar_lea.hbm %s3214_s15, 256 }
 0x90e   : > { %p2417_p7 = scmp.ne.s32.totalorder %s3147_s25, %s2416_s24  ;;  %p2421_p11 = scmp.lt.u32.totalorder %s3147_s25, %s3214_s15 }
 0x90f   : > { %p2422_p12 = scmp.lt.u32.totalorder %s2420_s2, %s2416_s24  ;;  %p2424_p0 = scmp.lt.u32.totalorder %s2416_s24, %s3147_s25 }
 0x910   : > { %p2418_p9 = pnand %p2417_p7, %p2720_p4 }
 0x911   : > { %p2423_p13 = por %p2422_p12, %p2421_p11 }
 0x912   : > { %p2419_p10 = pneg %p2418_p9 }
 0x913   : > { %p2425_p1 = por %p2424_p0, %p2423_p13 }
 0x915   : > { %p2426_p2 = pnand %p2425_p1, %p2419_p10 }
 0x917   : > { %2429 = shalt.err (!%p2426_p2)
}
 0x918   : > { %2184 = dma.vmem_to_hbm [thread:$0]  (%p2720_p4), %s3149_s0, 128, %s3147_s25, %s1833_s1  }
 0x919 PF: > { %s3247_s21 = sld [smem:[#allocation7_spill]]  ;;  %p2190_p3 = scmp.ge.s32.totalorder %s2532_s23, 2 }
 0x91b   : > { %p2187_p5 = pnand %p2190_p3, %p2727_p8 }
 0x91f   : > { %s1859_s26 = sand.u32 1, %s3247_s21  }
 0x920   : > { %s1860_s27 = scalar_lea.sflag [#allocation5], %s1859_s26 }
 0x921   : > { %2507 = dma.done.wait (!%p2187_p5), %s1860_s27, 128  }
 0x922   : > { %2509 = vsyncadd (!%p2187_p5), %s1860_s27, 4294967168  ;;  %s28_s23 = sadd.s32 1, %s2532_s23   ;;  %s3248_s28 = sld [smem:[#allocation8_spill]] }
 0x923   : > { %p25_p6 = scmp.ge.s32.totalorder %s28_s23, 4   ;;  %s3249_s18 = smov %s2516_s19 }
 0x924   : > { %s3250_s19 = smov %s2520_s20  ;;  %s3251_s20 = smov %s2733_s16 }
 0x925   : > { %s3252_s21 = smov %s2528_s22  ;;  %27 = sbr.rel (!%p25_p6) target bundleno = 9 (0x9), region = 146 }
 0x928   : > { %s3253_s22 = smov %s3248_s28 }
 0x92c   :  { %1865 = vsyncpa [#allocation5], 1 }
 0x92d   :  { %1867 = vsyncpa [#allocation5 + $0x1], 1 }

// kernel: tpu_custom_call.1
= control target key start
LH: loop header
LB: loop body
LE: loop exit
PB: predicated region body
PF: predicated region fallthrough
CT: control target
= control target key end

     0   :  { %s3199_s0 = inlined_call_operand.vmem [shape: f32[2,8,32], index: 0, kind: input, shape index: {}]   ;;  %s3200_s1 = inlined_call_operand.vmem [shape: f32[1,32], index: 1, kind: input, shape index: {}]   ;;  %s3201_s2 = inlined_call_operand.vmem [shape: f32[1,32], index: 2, kind: input, shape index: {}]   ;;  %s3202_s3 = inlined_call_operand.vmem [shape: bf16[32,32], index: 3, kind: input, shape index: {}]   ;;  %s3203_s4 = inlined_call_operand.vmem [shape: f32[1,32], index: 4, kind: input, shape index: {}]   ;;  %s3204_s5 = inlined_call_operand.vmem [shape: bf16[32,64], index: 5, kind: input, shape index: {}]   ;;  %s3205_s6 = inlined_call_operand.vmem [shape: f32[1,64], index: 6, kind: input, shape index: {}]   ;;  %s3206_s7 = inlined_call_operand.vmem [shape: bf16[4,8,32], index: 7, kind: input, shape index: {}]   ;;  %s3207_s8 = inlined_call_operand.vmem [shape: f32[1,32], index: 8, kind: input, shape index: {}]   ;;  %s3208_s9 = inlined_call_operand.vmem [shape: f32[1,32], index: 9, kind: input, shape index: {}]   ;;  %s3209_s10 = inlined_call_operand.vmem [shape: f32[1,32], index: 10, kind: input, shape index: {}]   ;;  %s3210_s11 = inlined_call_operand.vmem [shape: bf16[32,128], index: 11, kind: input, shape index: {}]   ;;  %s3211_s12 = inlined_call_operand.vmem [shape: f32[1,128], index: 12, kind: input, shape index: {}]   ;;  %s3212_s13 = inlined_call_operand.vmem [shape: bf16[128,32], index: 13, kind: input, shape index: {}]   ;;  %s3213_s14 = inlined_call_operand.vmem [shape: f32[1,32], index: 14, kind: input, shape index: {}]   ;;  %s3214_s15 = inlined_call_operand.hbm [shape: f32[2,8,32], index: 15, kind: output, shape index: {}]  }
   0x1   :  { %3218 = sst [smem:[#allocation9_spill]] %s3199_s0 }
   0x2   :  { %3219 = sst [smem:[#allocation10_spill]] %s3200_s1 }
   0x3   :  { %3220 = sst [smem:[#allocation11_spill]] %s3201_s2 }
   0x4   :  { %3221 = sst [smem:[#allocation12_spill]] %s3202_s3 }
   0x5   :  { %20 = vsyncpa [#allocation5], 0 }
   0x6   :  { %22 = vsyncpa [#allocation5 + $0x1], 0  ;;  %s2680_s18 = smov 0   ;;  %s2682_s19 = smov 0  }
   0x7   :  { %s2684_s20 = smov 0   ;;  %s2686_s21 = smov 0  }
   0x8   :  { %s2688_s22 = smov 0   ;;  %s2690_s23 = smov 0  }
   0x9 LB: > { %3222 = sst [smem:[#allocation7_spill]] %s2512_s18  ;;  %s1968_s24 = sadd.s32 4294967295, %s2532_s23   ;;  %s2532_s23 = sphi %s2690_s23, %s28_s23   ;;  %s2528_s22 = sphi %s2688_s22, %s3253_s22   ;;  %s2524_s21 = sphi %s2686_s21, %s3252_s21   ;;  %s2520_s20 = sphi %s2684_s20, %s3251_s20   ;;  %s2516_s19 = sphi %s2682_s19, %s3250_s19   ;;  %s2512_s18 = sphi %s2680_s18, %s3249_s18  }
   0xa   : > { %s1969_s25 = sadd.s32 4294967294, %s2532_s23   ;;  %s40_s26 = sadd.s32 1, %s2528_s22 }
   0xb   : > { %s369_s27 = sadd.s32 1, %s2520_s20  ;;  %p42_p0 = scmp.ge.s32.totalorder %s40_s26, 2 }
   0xc   : > { %p379_p1 = scmp.ne.s32.totalorder %s2520_s20, %s2516_s19  ;;  %p380_p2 = scmp.eq.s32.totalorder %s1968_s24, 1 }
   0xd   : > { %p385_p3 = scmp.ne.s32.totalorder %s2516_s19, %s2512_s18  ;;  %s3255_s26 = smov (%p42_p0, %s40_s26), 0 }
   0xe   : > { %3223 = sst [smem:[#allocation8_spill]] %s3255_s26  ;;  %p2720_p4 = por %p380_p2, %p379_p1 }
   0xf   : > { %p386_p5 = scmp.eq.s32.totalorder %s1969_s25, 1  ;;  %s364_s29 = ssub.s32 %s2528_s22, %s3255_s26 }
  0x10   : > { %p1972_p6 = scmp.ge.s32.totalorder %s2532_s23, 1  ;;  %p367_p7 = scmp.eq.s32.totalorder %s364_s29, 0 }
  0x11   : > { %p2727_p8 = por %p386_p5, %p385_p3  ;;  %p453_p9 = scmp.lt.s32.totalorder %s2532_s23, 3 }
  0x12   : > { %s2733_s16 = scalar_select %p367_p7, %s2520_s20, %s369_s27  }
  0x13   : > { %p454_p10 = pnand %p1972_p6, %p453_p9 }
  0x14   : > { %p500_p11 = scmp.lt.s32.totalorder (!%p454_p10), %s2524_s21, 1  ;;  %vm512_vm0 = vcmask (!%p454_p10), 261120   ;;  %s3226_s0 = sld [smem:[#allocation9_spill]] (!%p454_p10)  ;;  %v2357_v13 = vld [vmem:[%s3204_s5] sm:$0xff] (!%p454_p10)   ;;  %v2586_v14 = vmov (!%p454_p10), 0.0   ;;  %vm2587_vm1 = vmmov (!%p454_p10), 0   ;;  %v773_v50 = vlaneseq (!%p454_p10) }
  0x15   : > { %457 = sbr.rel (%p454_p10) target bundleno = 2329 (0x919), region = 80  ;;  %s3227_s3 = sld [smem:[#allocation12_spill]] (!%p454_p10)  ;;  %2076 = vmatprep.subr.bf16.mxu1 (!%p454_p10), %v2586_v14  ;;  %2068 = vmatprep.subr.bf16.mxu0 (!%p454_p10), %v2586_v14  ;;  %v2359_v16 = vld [vmem:[%s3204_s5 + $0x8] sm:$0xff] (!%p454_p10)   ;;  %v1984_v35 = vld [vmem:[%s3203_s4] ss:$0 sm:$0xff] (!%p454_p10)  ;;  %vm609_vm2 = vcmask (!%p454_p10), 60416  }
  0x16   : > { %s3217_s27 = sand.u32 (!%p454_p10), 1, %s2516_s19   ;;  %2069 = vmatpush3.bf16.msra.mxu0 (!%p454_p10), %v2357_v13  ;;  %2080 = vmatprep.mubr.msk.bf16.mxu1 (!%p454_p10), %vm2587_vm1, %v2586_v14  ;;  %s3228_s1 = sld [smem:[#allocation10_spill]] (!%p454_p10)  ;;  %v1977_v40 = vld [vmem:[%s3205_s6] ss:$0 sm:$0xff] (!%p454_p10)  ;;  %v2595_v48 = vmov (!%p454_p10), 1983009808  }
  0x17   : > { %2070 = vmatprep.subr.bf16.mxu0 (!%p454_p10), %v2586_v14  ;;  %2072 = vmatprep.mubr.msk.bf16.mxu0 (!%p454_p10), %vm2587_vm1, %v2586_v14  ;;  %s3229_s2 = sld [smem:[#allocation11_spill]] (!%p454_p10)  ;;  %s2589_s25 = smov (!%p454_p10), 112   ;;  %v771_v49 = vunpack.c.l.s4 (!%p454_p10), %v2595_v48  ;;  %v2596_v51 = vmov (!%p454_p10), 1934713408   ;;  %v2789_v54 = vshrl.u32 (!%p454_p10), %v773_v50, 7  ;;  %v2821_v48 = vmov (!%p454_p10), 0.0  }
  0x18   : > { %s2590_s18 = smov (!%p454_p10), 104   ;;  %s2593_s29 = smov (!%p454_p10), 80   ;;  %v803_v52 = vunpack.c.l.s4 (!%p454_p10), %v2596_v51  ;;  %v2825_v51 = vmov (!%p454_p10), 0.0  }
  0x19   : > { %v772_v53 = vunpack.c.0.s8 (!%p454_p10), %v771_v49  ;;  %v2823_v49 = vmov (!%p454_p10), 0.0  }
  0x1a   : > { %2071 = vmatpush3.bf16.msra.mxu0 (!%p454_p10), %v2359_v16  ;;  %v804_v57 = vunpack.c.0.s8 (!%p454_p10), %v803_v52  ;;  %v2827_v52 = vmov (!%p454_p10), 0.0  }
  0x1b   : > { %v2356_v12 = vld [vmem:[%s3227_s3] sm:$0xff] (!%p454_p10)   ;;  %v2358_v15 = vld [vmem:[%s3227_s3 + $0x8] sm:$0xff] (!%p454_p10)   ;;  %v775_v58 = vsub.s32 (!%p454_p10), %v772_v53, %v2789_v54  ;;  %v2829_v53 = vmov (!%p454_p10), 0.0  }
  0x1c   : > { %s501_s17 = scalar_select %p500_p11, %s2524_s21, 1  ;;  %2077 = vmatpush3.bf16.msra.mxu1 %v2356_v12  ;;  %v1982_v24 = vld [vmem:[%s3228_s1] ss:$0 sm:$0xff] }
  0x1d   : > { %2078 = vmatprep.subr.bf16.mxu1 %v2586_v14  ;;  %v1983_v26 = vld [vmem:[%s3229_s2] ss:$0 sm:$0xff] }
  0x1e   : > { %s1974_s24 = sshll.u32 %s501_s17, 3  ;;  %s2588_s17 = smov 120  }
  0x1f   : > { %s503_s26 = scalar_lea.vmem %s3226_s0, %s1974_s24  ;;  %s2758_s24 = sshll.u32 %s3217_s27, 3 }
  0x20   : > { %v2740_v0 = vld [vmem:[%s503_s26] sm:$0xff]  ;;  %2079 = vmatpush3.bf16.msra.mxu1 %v2358_v15  ;;  %s2591_s26 = smov 96   ;;  %s2592_s0 = smov 88  }
  0x21   : > { %v663_v1 = vsel %vm512_vm0, %v2740_v0, 0.0  ;;  %s2594_s27 = smov 72  }
  0x22   : > { %664 = vadd.xlane.f32.xlu0 %v663_v1 }
  0x26   : > { %514 = vadd.xlane.f32.xlu0 %v663_v1  ;;  %v807_v1 = vsub.s32 %v804_v57, %v2789_v54  ;;  %v2835_v57 = vmov -1e+30  }
  0xaf   : > { %v665_v2 = vpop.xlane.xlu0 %664 }
  0xb0   : > { %v667_v3 = vmul.f32 0.03125, %v665_v2 }
  0xb2   : > { %v668_v4 = vsub.f32 %v2740_v0, %v667_v3 }
  0xb3   : > { %v515_v5 = vpop.xlane.xlu0 %514 }
  0xb4   : > { %v517_v6 = vmul.f32 0.03125, %v515_v5  ;;  %v669_v7 = vmul.f32 %v668_v4, %v668_v4 }
  0xb6   : > { %v518_v8 = vsub.f32 %v2740_v0, %v517_v6  ;;  %v670_v9 = vsel %vm512_vm0, %v669_v7, 0.0 }
  0xb7   : > { %671 = vadd.xlane.f32.xlu1 %v670_v9 }
  0xb8   : > { %v519_v10 = vmul.f32 %v518_v8, %v518_v8 }
  0xba   : > { %v520_v11 = vsel %vm512_vm0, %v519_v10, 0.0 }
  0xbb   : > { %521 = vadd.xlane.f32.xlu1 %v520_v11 }
 0x144   : > { %v672_v17 = vpop.xlane.xlu1 %671 }
 0x145   : > { %v673_v18 = vmul.f32 0.03125, %v672_v17 }
 0x147   : > { %v674_v19 = vadd.f32 1e-05, %v673_v18 }
 0x148   : > { %v522_v20 = vpop.xlane.xlu1 %521 }
 0x149   : > { %2360 = vrsqrt.f32 %v674_v19  ;;  %v523_v21 = vmul.f32 0.03125, %v522_v20 }
 0x14b   : > { %v524_v22 = vadd.f32 1e-05, %v523_v21 }
 0x14d   : > { %2362 = vrsqrt.f32 %v524_v22 }
 0x153   : > { %v2361_v23 = vpop.eup %2360 }
 0x154   : > { %v676_v25 = vmul.f32 %v2361_v23, %v668_v4 }
 0x156   : > { %v683_v27 = vmul.f32 %v1982_v24, %v676_v25 }
 0x157   : > { %v2363_v28 = vpop.eup %2362 }
 0x158   : > { %v690_v29 = vadd.f32 %v1983_v26, %v683_v27  ;;  %v526_v30 = vmul.f32 %v2363_v28, %v518_v8 }
 0x15a   : > { %v691_v31 = vpack.c.bf16 %v690_v29, %v690_v29  ;;  %v533_v32 = vmul.f32 %v1982_v24, %v526_v30 }
 0x15c   : > { %2081 = vmatmul.mubr.msk.bf16.vlgmr.msra.gmra.mrb[0].mxu1 %vm512_vm0, %v691_v31  ;;  %v540_v33 = vadd.f32 %v1983_v26, %v533_v32 }
 0x15e   : > { %v541_v34 = vpack.c.bf16 %v540_v33, %v540_v33 }
 0x160   : > { %2073 = vmatmul.mubr.msk.bf16.vlgmr.msra.gmra.mrb[0].mxu0 %vm512_vm0, %v541_v34 }
 0x22f   : > { %v752_v36 = vpop.f32.mrb[0].mxu1 }
 0x230   : > { %v753_v37 = vadd.f32 %v1984_v35, %v752_v36  ;;  %v2082_v38 = vpop.f32.mrb[1].mxu1 }
 0x231   : > { %v755_v39 = vpop.f32.mrb[2].mxu1 }
 0x232   : > { %v2083_v41 = vpop.f32.mrb[3].mxu1  ;;  %759 = vrot.lane.b32.xlu0 %v753_v37, %s2588_s17  ;;  %762 = vrot.lane.b32.xlu1 %v753_v37, %s2589_s25 }
 0x233   : > { %v602_v42 = vpop.f32.mrb[0].mxu0 }
 0x234   : > { %v603_v43 = vadd.f32 %v1977_v40, %v602_v42  ;;  %v2074_v44 = vpop.f32.mrb[1].mxu0 }
 0x235   : > { %v605_v45 = vpop.f32.mrb[2].mxu0 }
 0x236   : > { %v608_v46 = vpack.c.bf16 %v603_v43, %v603_v43  ;;  %765 = vrot.lane.b32.xlu1 %v753_v37, %s2590_s18  ;;  %v2075_v47 = vpop.f32.mrb[3].mxu0 }
 0x237   : > { %v2819_v47 = vmov 0.0  }
 0x238   : > { %618 = vrot.lane.b32.xlu0 %v608_v46, %s2588_s17  ;;  %610 = vst.msk [vmem:[#allocation2] sm:$0xf] %vm609_vm2, %v608_v46  ;;  %s2841_s17 = smov 0  }
 0x23a   : > { %614 = vrot.lane.b32.xlu1 %v608_v46, %s2591_s26 }
 0x23c   : > { %631 = vrot.lane.b32.xlu0 %v608_v46, %s2589_s25 }
 0x23e   : > { %625 = vrot.lane.b32.xlu1 %v608_v46, %s2592_s0 }
 0x240   : > { %644 = vrot.lane.b32.xlu0 %v608_v46, %s2590_s18 }
 0x242   : > { %638 = vrot.lane.b32.xlu1 %v608_v46, %s2593_s29 }
 0x246   : > { %651 = vrot.lane.b32.xlu1 %v608_v46, %s2594_s27  ;;  %v2817_v46 = vmov 0.0  }
 0x2a4   : > { %v763_v55 = vpop.permute.xlu1 %762  ;;  %v760_v56 = vpop.permute.xlu0 %759 }
 0x2a5   : > { %v768_v59 = vcombine.low %v753_v37, %v763_v55  ;;  %v769_v60 = vcombine.high %v753_v37, %v763_v55  ;;  %v2831_v55 = vmov 0.0  }
 0x2a7   : > { %v776_v3 = vrot.slane %v768_v59, %v775_v58  ;;  %v783_v4 = vrot.slane %v769_v60, %v775_v58  ;;  %v2839_v59 = vmov -1e+30  }
 0x2a8   : > { %v766_v61 = vpop.permute.xlu1 %765 }
 0x2a9   : > { %v784_v62 = vcombine.low %v760_v56, %v766_v61  ;;  %v785_v63 = vcombine.high %v760_v56, %v766_v61  ;;  %v2833_v56 = vmov -1e+30  }
 0x2aa   : > { %v619_v2 = vpop.permute.xlu0 %618 }
 0x2ab   : > { %v792_v5 = vrot.slane %v784_v62, %v775_v58  ;;  %v799_v6 = vrot.slane %v785_v63, %v775_v58  ;;  %624 = vst.msk [vmem:[#allocation2 + $0x4] sm:$0xf] %vm609_vm2, %v619_v2 }
 0x2ac   : > { %v615_v7 = vpop.permute.xlu1 %614 }
 0x2ad   : > { %v800_v8 = vcombine.low %v776_v3, %v792_v5  ;;  %v801_v9 = vcombine.high %v776_v3, %v792_v5  ;;  %v816_v10 = vcombine.low %v783_v4, %v799_v6  ;;  %v817_v11 = vcombine.high %v783_v4, %v799_v6  ;;  %617 = vst.msk [vmem:[#allocation3] sm:$0xf] %vm609_vm2, %v615_v7 }
 0x2ae   : > { %v632_v12 = vpop.permute.xlu0 %631 }
 0x2af   : > { %v808_v13 = vrot.slane %v800_v8, %v807_v1  ;;  %v815_v15 = vrot.slane %v801_v9, %v807_v1  ;;  %v824_v16 = vrot.slane %v816_v10, %v807_v1  ;;  %v831_v17 = vrot.slane %v817_v11, %v807_v1  ;;  %637 = vst.msk [vmem:[#allocation2 + $0x8] sm:$0xf] %vm609_vm2, %v632_v12 }
 0x2b0   : > { %v626_v18 = vpop.permute.xlu1 %625 }
 0x2b1   : > { %v836_v19 = vcombine.low %v808_v13, %v815_v15  ;;  %v1988_v20 = vcombine.high %v808_v13, %v815_v15  ;;  %v852_v21 = vcombine.low %v824_v16, %v831_v17  ;;  %v1989_v22 = vcombine.high %v824_v16, %v831_v17  ;;  %630 = vst.msk [vmem:[#allocation3 + $0x4] sm:$0xf] %vm609_vm2, %v626_v18 }
 0x2b2   : > { %v645_v23 = vpop.permute.xlu0 %644 }
 0x2b3   : > { %v843_v24 = vrot.slane %v836_v19, %v775_v58  ;;  %v851_v25 = vrot.slane %v1988_v20, %v775_v58  ;;  %v859_v26 = vrot.slane %v852_v21, %v775_v58  ;;  %v867_v27 = vrot.slane %v1989_v22, %v775_v58  ;;  %650 = vst.msk [vmem:[#allocation2 + $0xc] sm:$0xf] %vm609_vm2, %v645_v23 }
 0x2b4   : > { %v639_v28 = vpop.permute.xlu1 %638  ;;  %v2837_v58 = vmov -1e+30  }
 0x2b5   : > { %v868_v29 = vcombine.low %v843_v24, %v851_v25  ;;  %v869_v30 = vcombine.high %v843_v24, %v851_v25  ;;  %v884_v31 = vcombine.low %v859_v26, %v867_v27  ;;  %v885_v32 = vcombine.high %v859_v26, %v867_v27  ;;  %643 = vst.msk [vmem:[#allocation3 + $0x8] sm:$0xf] %vm609_vm2, %v639_v28 }
 0x2b7   : > { %v876_v33 = vrot.slane %v868_v29, %v807_v1  ;;  %v883_v34 = vrot.slane %v869_v30, %v807_v1  ;;  %v892_v35 = vrot.slane %v884_v31, %v807_v1  ;;  %v899_v36 = vrot.slane %v885_v32, %v807_v1 }
 0x2b8   : > { %v652_v37 = vpop.permute.xlu1 %651 }
 0x2b9   : > { %v2799_v38 = vcombine.low %v876_v33, %v892_v35  ;;  %v2801_v39 = vcombine.high %v876_v33, %v892_v35  ;;  %v2803_v40 = vcombine.low %v883_v34, %v899_v36  ;;  %v2805_v41 = vcombine.high %v883_v34, %v899_v36  ;;  %656 = vst.msk [vmem:[#allocation3 + $0xc] sm:$0xf] %vm609_vm2, %v652_v37 }
 0x2bb   : > { %v904_v42 = vpack.c.bf16 %v2799_v38, %v2799_v38  ;;  %v905_v43 = vpack.c.bf16 %v2801_v39, %v2801_v39  ;;  %v906_v44 = vpack.c.bf16 %v2803_v40, %v2803_v40  ;;  %v907_v45 = vpack.c.bf16 %v2805_v41, %v2805_v41 }
 0x2bc LB: >> { %v2597_v60 = vmov 0.0   ;;  %s1990_s25 = sshll.u32 %s2584_s17, 3  ;;  %vm2598_vm3 = vmmov 0   ;;  %vm942_vm4 = vcmask 64512   ;;  %v1132_v6 = vand.u32 127, %v773_v50  ;;  %s912_s17 = sadd.s32 1, %s2584_s17   ;;  %s2584_s17 = sphi %s2841_s17, %s912_s17   ;;  %v2580_v59 = vphi %v2839_v59, %v3243_v59   ;;  %v2576_v58 = vphi %v2837_v58, %v3242_v58   ;;  %v2572_v57 = vphi %v2835_v57, %v3241_v57   ;;  %v2568_v56 = vphi %v2833_v56, %v3240_v56   ;;  %v2564_v55 = vphi %v2831_v55, %v3239_v55   ;;  %v2560_v53 = vphi %v2829_v53, %v3238_v53   ;;  %v2556_v52 = vphi %v2827_v52, %v3237_v52   ;;  %v2552_v51 = vphi %v2825_v51, %v3236_v51   ;;  %v2548_v49 = vphi %v2823_v49, %v3235_v49   ;;  %v2544_v48 = vphi %v2821_v48, %v3234_v48   ;;  %v2540_v47 = vphi %v2819_v47, %v3233_v47   ;;  %v2536_v46 = vphi %v2817_v46, %v3232_v46  }
 0x2bd   : >> { %2084 = vmatprep.subr.bf16.mxu0 %v2597_v60  ;;  %2090 = vmatprep.subr.bf16.mxu1 %v2597_v60  ;;  %s2891_s18 = sshra.s32 %s1990_s25, 3  ;;  %v1133_v7 = vstv %s1990_s25  ;;  %vm1213_vm6 = vcmask 1043456   ;;  %p2999_p12 = scmp.ge.s32.totalorder %s912_s17, 1 }
 0x2be   : >> { %2086 = vmatprep.mubr.msk.bf16.mxu0 %vm2598_vm3, %v2597_v60  ;;  %2092 = vmatprep.mubr.msk.bf16.mxu1 %vm2598_vm3, %v2597_v60  ;;  %s1991_s26 = sshll.u32 %s2891_s18, 2  ;;  %v1134_v8 = vadd.s32 %v1133_v7, %v1132_v6  ;;  %v1412_v38 = vld [vmem:[%s3206_s7 + $0x4] sm:$0xf] (%p2999_p12)  ;;  %s2022_s27 = sshll.u32 (%p2999_p12), %s2524_s21, 7 }
 0x2bf   : >> { %s931_s0 = scalar_lea.vmem [#allocation2], %s1991_s26  ;;  %s937_s29 = scalar_lea.vmem [#allocation3], %s1991_s26 }
 0x2c0   : >> { %v932_v61 = vld [vmem:[%s931_s0] sm:$0xf]  ;;  %v933_v62 = vld [vmem:[%s931_s0 + $0x4] sm:$0xf]  ;;  %v934_v2 = vld [vmem:[%s931_s0 + $0x8] sm:$0xf]  ;;  %vm1135_vm5 = vcmp.ge.s32.totalorder %v2789_v54, %v1134_v8  ;;  %s3147_s25 = scalar_lea.hbm (%p2999_p12), %s3214_s15, %s2022_s27 }
 0x2c1   : >> { %v947_v63 = vsel %vm942_vm4, %v932_v61, 0  ;;  %v993_v1 = vsel %vm942_vm4, %v933_v62, 0  ;;  %v935_v3 = vld [vmem:[%s931_s0 + $0xc] sm:$0xf]  ;;  %v1039_v4 = vsel %vm942_vm4, %v934_v2, 0  ;;  %s3244_s26 = scalar_lea.vmem (%p2999_p12), [#allocation4], %s2758_s24 }
 0x2c2   : >> { %2085 = vmatpush3.bf16.xpose.msra.mxu0 %v947_v63  ;;  %2091 = vmatpush3.bf16.xpose.msra.mxu1 %v993_v1  ;;  %v1085_v5 = vsel %vm942_vm4, %v935_v3, 0  ;;  %v938_v34 = vld [vmem:[%s937_s29] sm:$0xf]  ;;  %v939_v36 = vld [vmem:[%s937_s29 + $0x4] sm:$0xf]  ;;  %s1847_s0 = sshll.u32 (%p2999_p12), %s3244_s26, 4  ;;  %s3245_s18 = smov (%p2999_p12), %s3244_s26  ;;  %s3149_s0 = int_to_ptr.vmem [resolvable:$true] %s1847_s0 }
 0x2c3   : >> { %2096 = vmatprep.subr.bf16.mxu0 %v2597_v60  ;;  %2102 = vmatprep.subr.bf16.mxu1 %v2597_v60  ;;  %v1215_v35 = vsel %vm1213_vm6, %v938_v34, 0  ;;  %v1261_v37 = vsel %vm1213_vm6, %v939_v36, 0  ;;  %v940_v61 = vld [vmem:[%s937_s29 + $0x8] sm:$0xf]  ;;  %v941_v63 = vld [vmem:[%s937_s29 + $0xc] sm:$0xf] }
 0x2c4   : >> { %v1307_v62 = vsel %vm1213_vm6, %v940_v61, 0  ;;  %v1353_v1 = vsel %vm1213_vm6, %v941_v63, 0  ;;  %s3246_s21 = sand.u32 (%p2999_p12), 1, %s2516_s19   ;;  %s2402_s26 = scalar_lea.vmem (%p2999_p12), %s3149_s0, 128 }
 0x2c5   : > { %s1833_s1 = scalar_lea.sflag (%p2999_p12), [#allocation5], %s3246_s21  ;;  %p2403_p13 = scmp.ne.s32.totalorder (%p2999_p12), %s3149_s0, %s2402_s26 }
 0x2c6   : > { %s2599_s2 = smov (%p2999_p12), [#allocation4]  }
 0x2c7   : > { %p2404_p0 = pnand (%p2999_p12), %p2403_p13, %p2720_p4  ;;  %s2406_s3 = sshll.u32 (%p2999_p12), %s2599_s2, 4  ;;  %s2407_s3 = int_to_ptr.vmem [resolvable:$false] %s2406_s3 }
 0x2c8   : > { %s2408_s27 = scalar_lea.vmem (%p2999_p12), %s2407_s3, 256  ;;  %p2409_p2 = scmp.lt.s32.totalorder (%p2999_p12), %s3149_s0, %s2407_s3 }
 0x2c9   : >> { %2087 = vmatmul.mubr.msk.bf16.vlgmr.msra.gmra.mrb[0].mxu0 %vm942_vm4, %v904_v42  ;;  %2093 = vmatmul.mubr.msk.bf16.vlgmr.msra.gmra.mrb[0].mxu1 %vm942_vm4, %v905_v43  ;;  %v1467_v43 = vsel (%p2999_p12), %vm1213_vm6, %v1412_v38, 0  ;;  %v2386_v38 = vld [vmem:[%s3212_s13 + $0x20] sm:$0xff] (%p2999_p12)   ;;  %p2405_p1 = pneg (%p2999_p12), %p2404_p0  ;;  %p2410_p3 = scmp.lt.s32.totalorder (%p2999_p12), %s2408_s27, %s2402_s26 }
 0x2ca   : >> { %2097 = vmatpush3.bf16.xpose.msra.mxu0 %v1039_v4  ;;  %2103 = vmatpush3.bf16.xpose.msra.mxu1 %v1085_v5 }
 0x2cb   : >> { %2098 = vmatprep.mubr.msk.bf16.mxu0 %vm2598_vm3, %v2597_v60  ;;  %2104 = vmatprep.mubr.msk.bf16.mxu1 %vm2598_vm3, %v2597_v60  ;;  %p2411_p5 = por (%p2999_p12), %p2410_p3, %p2409_p2 }
 0x2cc   : >> { %2108 = vmatprep.subr.bf16.mxu0 %v2597_v60  ;;  %2114 = vmatprep.subr.bf16.mxu1 %v2597_v60 }
 0x2cd   : > { %p2412_p6 = pnand (%p2999_p12), %p2411_p5, %p2405_p1 }
 0x2d1   : >> { %2099 = vmatmul.mubr.msk.bf16.vlgmr.msra.gmra.mrb[4].mxu0 %vm942_vm4, %v906_v44  ;;  %2105 = vmatmul.mubr.msk.bf16.vlgmr.msra.gmra.mrb[4].mxu1 %vm942_vm4, %v907_v45 }
 0x2d2   : >> { %2110 = vmatprep.mubr.msk.bf16.mxu0 %vm2598_vm3, %v2597_v60  ;;  %2116 = vmatprep.mubr.msk.bf16.mxu1 %vm2598_vm3, %v2597_v60 }
 0x2d3   : >> { %2109 = vmatpush3.bf16.msra.mxu0 %v1215_v35  ;;  %2115 = vmatpush3.bf16.msra.mxu1 %v1261_v37 }
 0x2d4   : >> { %2120 = vmatprep.subr.bf16.mxu0 %v2597_v60  ;;  %2126 = vmatprep.subr.bf16.mxu1 %v2597_v60 }
 0x39c   : >> { %v983_v9 = vpop.f32.mrb[0].mxu0  ;;  %v1029_v10 = vpop.f32.mrb[0].mxu1 }
 0x39d   : >> { %v1138_v11 = vsel %vm1135_vm5, %v983_v9, -1e+30  ;;  %v2088_v12 = vpop.f32.mrb[1].mxu0  ;;  %v1139_v13 = vsel %vm1135_vm5, %v1029_v10, -1e+30  ;;  %v2094_v15 = vpop.f32.mrb[1].mxu1 }
 0x39e   : >> { %v986_v16 = vpop.f32.mrb[2].mxu0  ;;  %v1142_v17 = vsel %vm942_vm4, %v1138_v11, -inf  ;;  %v1032_v18 = vpop.f32.mrb[2].mxu1  ;;  %v1145_v21 = vsel %vm942_vm4, %v1139_v13, -inf }
 0x39f   : >> { %1143 = vmax.xlane.f32.xlu0 %v1142_v17  ;;  %v2089_v19 = vpop.f32.mrb[3].mxu0  ;;  %v2095_v20 = vpop.f32.mrb[3].mxu1 }
 0x3a3   : >> { %1146 = vmax.xlane.f32.xlu0 %v1145_v21 }
 0x3a4   : >> { %v1075_v22 = vpop.f32.mrb[4].mxu0  ;;  %v1121_v23 = vpop.f32.mrb[4].mxu1 }
 0x3a5   : >> { %v1140_v24 = vsel %vm1135_vm5, %v1075_v22, -1e+30  ;;  %v2100_v25 = vpop.f32.mrb[5].mxu0  ;;  %v1141_v26 = vsel %vm1135_vm5, %v1121_v23, -1e+30  ;;  %v2106_v27 = vpop.f32.mrb[5].mxu1 }
 0x3a6   : >> { %v1078_v28 = vpop.f32.mrb[6].mxu0  ;;  %v1148_v29 = vsel %vm942_vm4, %v1140_v24, -inf  ;;  %v1124_v30 = vpop.f32.mrb[6].mxu1  ;;  %v1151_v33 = vsel %vm942_vm4, %v1141_v26, -inf }
 0x3a7   : >> { %1149 = vmax.xlane.f32.xlu1 %v1148_v29  ;;  %v2101_v31 = vpop.f32.mrb[7].mxu0  ;;  %v2107_v32 = vpop.f32.mrb[7].mxu1 }
 0x3ab   : >> { %1152 = vmax.xlane.f32.xlu1 %v1151_v33 }
 0x42c   : >> { %v1144_v2 = vpop.xlane.xlu0 %1143 }
 0x42d   : >> { %v2953_v3 = vmax.f32 %v2580_v59, %v1144_v2  }
 0x42f   : >> { %v1158_v4 = vsub.f32 %v2580_v59, %v2953_v3  ;;  %v1170_v5 = vsub.f32 %v1138_v11, %v2953_v3 }
 0x430   : >> { %v1147_v6 = vpop.xlane.xlu0 %1146 }
 0x431   : >> { %v1174_v7 = vmul.f32 1.442695, %v1170_v5  ;;  %v2959_v8 = vmax.f32 %v2576_v58, %v1147_v6   ;;  %v1162_v31 = vmul.f32 1.442695, %v1158_v4 }
 0x433   : >> { %v1159_v9 = vsub.f32 %v2576_v58, %v2959_v8  ;;  %v1171_v10 = vsub.f32 %v1139_v13, %v2959_v8  ;;  %2364 = vpow2.f32 %v1174_v7 }
 0x434   : >> { %v1150_v12 = vpop.xlane.xlu1 %1149 }
 0x435   : >> { %v1176_v15 = vmul.f32 1.442695, %v1171_v10  ;;  %v2965_v16 = vmax.f32 %v2572_v57, %v1150_v12   ;;  %v1164_v32 = vmul.f32 1.442695, %v1159_v9 }
 0x437   : >> { %v1160_v59 = vsub.f32 %v2572_v57, %v2965_v16  ;;  %v1172_v11 = vsub.f32 %v1140_v24, %v2965_v16  ;;  %2366 = vpow2.f32 %v1176_v15 }
 0x438   : >> { %v1153_v17 = vpop.xlane.xlu1 %1152 }
 0x439   : >> { %v1178_v18 = vmul.f32 1.442695, %v1172_v11  ;;  %v2971_v19 = vmax.f32 %v2568_v56, %v1153_v17   ;;  %v1166_v33 = vmul.f32 1.442695, %v1160_v59 }
 0x43b   : >> { %v1161_v58 = vsub.f32 %v2568_v56, %v2971_v19  ;;  %v1173_v13 = vsub.f32 %v1141_v26, %v2971_v19  ;;  %2368 = vpow2.f32 %v1178_v18 }
 0x43d   : >> { %v1180_v20 = vmul.f32 1.442695, %v1173_v13  ;;  %v2365_v21 = vpop.eup %2364 }
 0x43e   : >> { %v1186_v22 = vsel %vm942_vm4, %v2365_v21, 0.0  ;;  %v1206_v23 = vpack.c.bf16 %v2365_v21, %v2365_v21 }
 0x43f   : >> { %2370 = vpow2.f32 %v1180_v20  ;;  %1187 = vadd.xlane.f32.xlu0 %v1186_v22 }
 0x440   : >> { %2111 = vmatmul.mubr.msk.bf16.vlgmr.msra.gmra.mrb[8].mxu0 %vm942_vm4, %v1206_v23  ;;  %2372 = vpow2.f32 %v1162_v31 }
 0x441   : >> { %v2367_v57 = vpop.eup %2366  ;;  %2121 = vmatpush3.bf16.msra.mxu0 %v1307_v62  ;;  %2122 = vmatprep.mubr.msk.bf16.mxu0 %vm2598_vm3, %v2597_v60  ;;  %2374 = vpow2.f32 %v1164_v32 }
 0x442   : >> { %v1189_v24 = vsel %vm942_vm4, %v2367_v57, 0.0  ;;  %v1207_v56 = vpack.c.bf16 %v2367_v57, %v2367_v57  ;;  %2376 = vpow2.f32 %v1166_v33  ;;  %2132 = vmatprep.subr.bf16.mxu0 (%p2999_p12), %v2586_v14 }
 0x443   : >> { %1190 = vadd.xlane.f32.xlu1 %v1189_v24 }
 0x444   : >> { %2117 = vmatmul.mubr.msk.bf16.vlgmr.msra.gmra.mrb[8].mxu1 %vm942_vm4, %v1207_v56 }
 0x445   : >> { %v2369_v25 = vpop.eup %2368  ;;  %2127 = vmatpush3.bf16.msra.mxu1 %v1353_v1  ;;  %2128 = vmatprep.mubr.msk.bf16.mxu1 %vm2598_vm3, %v2597_v60  ;;  %v1168_v60 = vmul.f32 1.442695, %v1161_v58 }
 0x446   : >> { %v1192_v26 = vsel %vm942_vm4, %v2369_v25, 0.0  ;;  %v1208_v27 = vpack.c.bf16 %v2369_v25, %v2369_v25  ;;  %2150 = vmatprep.subr.bf16.mxu1 (%p2999_p12), %v2586_v14 }
 0x447   : >> { %1193 = vadd.xlane.f32.xlu0 %v1192_v26  ;;  %2378 = vpow2.f32 %v1168_v60 }
 0x448   : >> { %2123 = vmatmul.mubr.msk.bf16.vlgmr.msra.gmra.mrb[12].mxu0 %vm942_vm4, %v1208_v27 }
 0x449   : >> { %v2371_v28 = vpop.eup %2370  ;;  %2134 = vmatprep.mubr.msk.bf16.mxu0 (%p2999_p12), %vm2587_vm1, %v2586_v14 }
 0x44a   : >> { %v1195_v29 = vsel %vm942_vm4, %v2371_v28, 0.0  ;;  %v1209_v30 = vpack.c.bf16 %v2371_v28, %v2371_v28  ;;  %v2373_v34 = vpop.eup %2372 }
 0x44b   : >> { %1196 = vadd.xlane.f32.xlu1 %v1195_v29  ;;  %v1182_v35 = vmul.f32 %v2564_v55, %v2373_v34  ;;  %v2375_v36 = vpop.eup %2374  ;;  %v1202_v15 = vmul.f32 %v2548_v49, %v2373_v34  ;;  %v1411_v29 = vld [vmem:[%s3206_s7] sm:$0xf] (%p2999_p12) }
 0x44c   : >> { %2129 = vmatmul.mubr.msk.bf16.vlgmr.msra.gmra.mrb[12].mxu1 %vm942_vm4, %v1209_v30  ;;  %v1183_v62 = vmul.f32 %v2560_v53, %v2375_v36  ;;  %v2377_v63 = vpop.eup %2376  ;;  %v1203_v53 = vmul.f32 %v2544_v48, %v2375_v36 }
 0x44d   : >> { %v1184_v4 = vmul.f32 %v2556_v52, %v2377_v63  ;;  %v1204_v22 = vmul.f32 %v2540_v47, %v2377_v63  ;;  %2152 = vmatprep.mubr.msk.bf16.mxu1 (%p2999_p12), %vm2587_vm1, %v2586_v14 }
 0x451   : >> { %v2379_v5 = vpop.eup %2378 }
 0x452   : >> { %v1185_v9 = vmul.f32 %v2552_v51, %v2379_v5  ;;  %v1205_v56 = vmul.f32 %v2536_v46, %v2379_v5 }
 0x4cc   : >> { %v1188_v37 = vpop.xlane.xlu0 %1187 }
 0x4cd   : >> { %v1198_v61 = vadd.f32 %v1188_v37, %v1182_v35  }
 0x4cf   : > { %2390 = vrcp.f32 (%p2999_p12), %v1198_v61 }
 0x4d0   : >> { %v1191_v1 = vpop.xlane.xlu1 %1190 }
 0x4d1   : >> { %v1199_v2 = vadd.f32 %v1191_v1, %v1183_v62  }
 0x4d3   : > { %2392 = vrcp.f32 (%p2999_p12), %v1199_v2 }
 0x4d4   : >> { %v1194_v6 = vpop.xlane.xlu0 %1193 }
 0x4d5   : >> { %v1200_v7 = vadd.f32 %v1194_v6, %v1184_v4  }
 0x4d8   : >> { %v1197_v10 = vpop.xlane.xlu1 %1196 }
 0x4d9   : >> { %v1201_v12 = vadd.f32 %v1197_v10, %v1185_v9   ;;  %v2391_v54 = vpop.eup (%p2999_p12), %2390 }
 0x4db   : > { %2394 = vrcp.f32 (%p2999_p12), %v1201_v12 }
 0x4dc   : > { %2396 = vrcp.f32 (%p2999_p12), %v1200_v7 }
 0x4dd   : > { %v2393_v39 = vpop.eup (%p2999_p12), %2392 }
 0x4e5   : > { %v2395_v41 = vpop.eup (%p2999_p12), %2394 }
 0x513   : >> { %v1251_v55 = vpop.f32.mrb[8].mxu0 }
 0x514   : >> { %v1395_v11 = vadd.f32 %v1251_v55, %v1202_v15   ;;  %v2112_v59 = vpop.f32.mrb[9].mxu0  ;;  %v3239_v55 = vmov %v1198_v61 }
 0x515   : >> { %v1254_v17 = vpop.f32.mrb[10].mxu0  ;;  %v3243_v59 = vmov %v2953_v3  ;;  %v1414_v3 = vld [vmem:[%s3206_s7 + $0xc] sm:$0xf] (%p2999_p12) }
 0x516   : >> { %v2113_v18 = vpop.f32.mrb[11].mxu0  ;;  %v1559_v50 = vsel (%p2999_p12), %vm1213_vm6, %v1414_v3, 0  ;;  %v1403_v40 = vmul.f32 (%p2999_p12), %v2391_v54, %v1395_v11  ;;  %v2005_v17 = vld [vmem:[%s3207_s8] ss:$0 sm:$0xff] (%p2999_p12)  ;;  %v2385_v54 = vld [vmem:[%s3212_s13 + $0x18] sm:$0xff] (%p2999_p12)  }
 0x517   : >> { %v1297_v58 = vpop.f32.mrb[8].mxu1  ;;  %2151 = vmatpush3.bf16.msra.mxu1 (%p2999_p12), %v1559_v50 }
 0x518   : >> { %v1396_v13 = vadd.f32 %v1297_v58, %v1203_v53   ;;  %v2118_v20 = vpop.f32.mrb[9].mxu1  ;;  %v3238_v53 = vmov %v1199_v2  ;;  %v3242_v58 = vmov %v2959_v8  ;;  %2164 = vmatprep.subr.bf16.mxu1 (%p2999_p12), %v2586_v14  ;;  %v1407_v42 = vpack.c.bf16 (%p2999_p12), %v1403_v40, %v1403_v40  ;;  %v2388_v40 = vld [vmem:[%s3212_s13 + $0x30] sm:$0xff] (%p2999_p12)  }
 0x519   : >> { %v1300_v52 = vpop.f32.mrb[10].mxu1 }
 0x51a   : >> { %v2119_v21 = vpop.f32.mrb[11].mxu1  ;;  %v3237_v52 = vmov %v1200_v7  ;;  %v1404_v45 = vmul.f32 (%p2999_p12), %v2393_v39, %v1396_v13  ;;  %v2387_v39 = vld [vmem:[%s3212_s13 + $0x28] sm:$0xff] (%p2999_p12)  }
 0x51b   : >> { %v1343_v23 = vpop.f32.mrb[12].mxu0 }
 0x51c   : >> { %v2995_v47 = vadd.f32 %v1343_v23, %v1204_v22   ;;  %v2124_v51 = vpop.f32.mrb[13].mxu0  ;;  %v1408_v8 = vpack.c.bf16 (%p2999_p12), %v1404_v45, %v1404_v45 }
 0x51d   : >> { %v1346_v57 = vpop.f32.mrb[14].mxu0  ;;  %v3236_v51 = vmov %v1201_v12  ;;  %914 = sbr.rel (!%p2999_p12) target bundleno = 700 (0x2bc), region = 135 }
 0x51e   : >> { %v3230_v24 = vmov %v2995_v47  ;;  %v2125_v49 = vpop.f32.mrb[15].mxu0  ;;  %v3241_v57 = vmov %v2965_v16  ;;  %v1421_v16 = vsel (%p2999_p12), %vm1213_vm6, %v1411_v29, 0  ;;  %v2382_v51 = vld [vmem:[%s3212_s13] sm:$0xff] (%p2999_p12)  }
 0x51f   : >> { %v1389_v25 = vpop.f32.mrb[12].mxu1  ;;  %v3233_v47 = vmov %v3230_v24  ;;  %v3235_v49 = vmov %v1395_v11  ;;  %2133 = vmatpush3.bf16.msra.mxu0 (%p2999_p12), %v1421_v16  ;;  %v2383_v57 = vld [vmem:[%s3212_s13 + $0x8] sm:$0xff] (%p2999_p12)   ;;  %v2007_v29 = vld [vmem:[%s3209_s10] ss:$0 sm:$0xff] (%p2999_p12) }
 0x520   : >> { %v1398_v26 = vadd.f32 %v1389_v25, %v1205_v56   ;;  %v2130_v27 = vpop.f32.mrb[13].mxu1  ;;  %v3240_v56 = vmov %v2971_v19  ;;  %2138 = vmatprep.subr.bf16.mxu0 (%p2999_p12), %v2586_v14  ;;  %v1413_v47 = vld [vmem:[%s3206_s7 + $0x8] sm:$0xf] (%p2999_p12)  ;;  %v2397_v19 = vpop.eup (%p2999_p12), %2396  ;;  %v2384_v49 = vld [vmem:[%s3212_s13 + $0x10] sm:$0xff] (%p2999_p12)  }
 0x521   : >> { %v1392_v28 = vpop.f32.mrb[14].mxu1  ;;  %v1513_v30 = vsel (%p2999_p12), %vm1213_vm6, %v1413_v47, 0  ;;  %v1405_v31 = vmul.f32 (%p2999_p12), %v2397_v19, %v3230_v24  ;;  %v2380_v24 = vld [vmem:[%s3210_s11] sm:$0xff] (%p2999_p12)  }
 0x522   : >> { %v2131_v48 = vpop.f32.mrb[15].mxu1  ;;  %v3232_v46 = vmov %v1398_v26  ;;  %v1406_v44 = vmul.f32 (%p2999_p12), %v2395_v41, %v1398_v26  ;;  %2135 = vmatmul.mubr.msk.bf16.vlgmr.msra.gmra.mrb[0].mxu0 (%p2999_p12), %vm942_vm4, %v1407_v42  ;;  %v2006_v28 = vld [vmem:[%s3208_s9] ss:$0 sm:$0xff] (%p2999_p12)  ;;  %v2389_v41 = vld [vmem:[%s3212_s13 + $0x38] sm:$0xff] (%p2999_p12)  }
 0x523   : >> { %v3234_v48 = vmov %v1396_v13  ;;  %2139 = vmatpush3.bf16.msra.mxu0 (%p2999_p12), %v1467_v43  ;;  %2140 = vmatprep.mubr.msk.bf16.mxu0 (%p2999_p12), %vm2587_vm1, %v2586_v14  ;;  %v1409_v32 = vpack.c.bf16 (%p2999_p12), %v1405_v31, %v1405_v31  ;;  %v2008_v42 = vld [vmem:[%s3211_s12] ss:$0 sm:$0xff] (%p2999_p12) }
 0x524   : > { %v1410_v46 = vpack.c.bf16 %v1406_v44, %v1406_v44  ;;  %2144 = vmatprep.subr.bf16.mxu0 %v2586_v14 }
 0x526   : > { %2153 = vmatmul.mubr.msk.bf16.vlgmr.msra.gmra.mrb[0].mxu1 %vm942_vm4, %v1410_v46 }
 0x527   : > { %2180 = vmatprep.mubr.msk.bf16.mxu1 %vm2587_vm1, %v2586_v14  ;;  %2165 = vmatpush3.bf16.msra.mxu1 %v2382_v51 }
 0x528   : > { %2166 = vmatprep.subr.bf16.mxu1 %v2586_v14 }
 0x52a   : > { %2141 = vmatmul.mubr.msk.bf16.vlgmr.msra.gmra.mrb[4].mxu0 %vm942_vm4, %v1408_v8 }
 0x52b   : > { %2145 = vmatpush3.bf16.msra.mxu0 %v1513_v30  ;;  %2146 = vmatprep.mubr.msk.bf16.mxu0 %vm2587_vm1, %v2586_v14 }
 0x52c   : > { %2156 = vmatprep.subr.bf16.mxu0 %v2586_v14  ;;  %2167 = vmatpush3.bf16.msra.mxu1 %v2383_v57 }
 0x52d   : > { %2168 = vmatprep.subr.bf16.mxu1 %v2586_v14 }
 0x530   : > { %2169 = vmatpush3.bf16.msra.mxu1 %v2384_v49 }
 0x531   : > { %2170 = vmatprep.subr.bf16.mxu1 %v2586_v14 }
 0x532   : > { %2147 = vmatmul.mubr.msk.bf16.vlgmr.msra.gmra.mrb[8].mxu0 %vm942_vm4, %v1409_v32 }
 0x533   : > { %2160 = vmatprep.mubr.msk.bf16.mxu0 %vm2587_vm1, %v2586_v14  ;;  %2157 = vmatpush3.bf16.msra.mxu0 %v2380_v24 }
 0x534   : > { %2158 = vmatprep.subr.bf16.mxu0 %v2586_v14  ;;  %2171 = vmatpush3.bf16.msra.mxu1 %v2385_v54 }
 0x535   : > { %2172 = vmatprep.subr.bf16.mxu1 %v2586_v14 }
 0x538   : > { %2173 = vmatpush3.bf16.msra.mxu1 %v2386_v38 }
 0x539   : > { %2174 = vmatprep.subr.bf16.mxu1 %v2586_v14 }
 0x53c   : > { %2175 = vmatpush3.bf16.msra.mxu1 %v2387_v39 }
 0x53d   : > { %2176 = vmatprep.subr.bf16.mxu1 %v2586_v14 }
 0x540   : > { %2177 = vmatpush3.bf16.msra.mxu1 %v2388_v40 }
 0x541   : > { %2178 = vmatprep.subr.bf16.mxu1 %v2586_v14 }
 0x544   : > { %2179 = vmatpush3.bf16.msra.mxu1 %v2389_v41 }
 0x5f5   : > { %v1457_v33 = vpop.f32.mrb[0].mxu0 }
 0x5f6   : > { %v2136_v60 = vpop.f32.mrb[1].mxu0  ;;  %v1601_v1 = vsel %vm512_vm0, %v1457_v33, 0.0  ;;  %v2012_v33 = vld [vmem:[%s3213_s14] ss:$0 sm:$0xff] }
 0x5f7   : > { %v1460_v34 = vpop.f32.mrb[2].mxu0 }
 0x5f8   : > { %v2137_v36 = vpop.f32.mrb[3].mxu0 }
 0x5f9   : > { %v1595_v35 = vpop.f32.mrb[0].mxu1 }
 0x5fa   : > { %v2154_v37 = vpop.f32.mrb[1].mxu1  ;;  %v1606_v10 = vsel %vm512_vm0, %v1595_v35, 0.0 }
 0x5fb   : > { %v1598_v61 = vpop.f32.mrb[2].mxu1 }
 0x5fc   : > { %v2155_v62 = vpop.f32.mrb[3].mxu1 }
 0x5fd   : > { %v1503_v63 = vpop.f32.mrb[4].mxu0 }
 0x5fe   : > { %v1602_v2 = vsel %vm512_vm0, %v1503_v63, 0.0  ;;  %v2142_v4 = vpop.f32.mrb[5].mxu0 }
 0x5ff   : > { %v1603_v5 = vadd.f32 %v1602_v2, %v1601_v1  ;;  %v1506_v6 = vpop.f32.mrb[6].mxu0 }
 0x600   : > { %v2143_v7 = vpop.f32.mrb[7].mxu0 }
 0x605   : > { %v1549_v9 = vpop.f32.mrb[8].mxu0 }
 0x606   : > { %v1604_v12 = vsel %vm512_vm0, %v1549_v9, 0.0  ;;  %v2148_v15 = vpop.f32.mrb[9].mxu0 }
 0x607   : > { %v1605_v55 = vadd.f32 %v1604_v12, %v1603_v5  ;;  %v1552_v11 = vpop.f32.mrb[10].mxu0 }
 0x608   : > { %v2149_v59 = vpop.f32.mrb[11].mxu0 }
 0x609   : > { %v1607_v18 = vadd.f32 %v1606_v10, %v1605_v55 }
 0x60b   : > { %v1615_v53 = vadd.f32 %v2005_v17, %v1607_v18 }
 0x60d   : > { %v3083_v58 = vadd.f32 %v1615_v53, %v2740_v0  ;;  %v2381_v0 = vld [vmem:[%s3210_s11 + $0x8] sm:$0xff]  }
 0x60e   : > { %2159 = vmatpush3.bf16.msra.mxu0 %v2381_v0 }
 0x60f   : > { %v1619_v13 = vsel %vm512_vm0, %v3083_v58, 0.0 }
 0x610   : > { %1620 = vadd.xlane.f32.xlu0 %v1619_v13 }
 0x69d   : > { %v1621_v20 = vpop.xlane.xlu0 %1620 }
 0x69e   : > { %v1622_v52 = vmul.f32 0.03125, %v1621_v20 }
 0x6a0   : > { %v1623_v21 = vsub.f32 %v3083_v58, %v1622_v52 }
 0x6a2   : > { %v1624_v22 = vmul.f32 %v1623_v21, %v1623_v21 }
 0x6a4   : > { %v1625_v23 = vsel %vm512_vm0, %v1624_v22, 0.0 }
 0x6a5   : > { %1626 = vadd.xlane.f32.xlu0 %v1625_v23 }
 0x732   : > { %v1627_v56 = vpop.xlane.xlu0 %1626 }
 0x733   : > { %v1628_v25 = vmul.f32 0.03125, %v1627_v56 }
 0x735   : > { %v1629_v26 = vadd.f32 1e-05, %v1628_v25 }
 0x737   : > { %2398 = vrsqrt.f32 %v1629_v26 }
 0x741   : > { %v2399_v27 = vpop.eup %2398 }
 0x742   : > { %v1631_v48 = vmul.f32 %v2399_v27, %v1623_v21 }
 0x744   : > { %v1638_v16 = vmul.f32 %v2006_v28, %v1631_v48 }
 0x746   : > { %v1645_v3 = vadd.f32 %v2007_v29, %v1638_v16 }
 0x748   : > { %v1646_v50 = vpack.c.bf16 %v1645_v3, %v1645_v3 }
 0x74a   : > { %2161 = vmatmul.mubr.msk.bf16.vlgmr.msra.gmra.mrb[12].mxu0 %vm512_vm0, %v1646_v50 }
 0x81d   : > { %v1707_v43 = vpop.f32.mrb[12].mxu0 }
 0x81e   : > { %v1708_v44 = vadd.f32 %v2008_v42, %v1707_v43  ;;  %v2162_v45 = vpop.f32.mrb[13].mxu0 }
 0x81f   : > { %v1710_v46 = vpop.f32.mrb[14].mxu0 }
 0x820   : > { %v1714_v47 = vmul.f32 0.70710677, %v1708_v44  ;;  %v2163_v8 = vpop.f32.mrb[15].mxu0  ;;  %v1713_v14 = vmul.f32 0.5, %v1708_v44 }
 0x822   : > { %2400 = verf.f32 %v1714_v47 }
 0x82c   : > { %v2401_v19 = vpop.eup %2400 }
 0x82d   : > { %v1716_v30 = vadd.f32 1.0, %v2401_v19 }
 0x82f   : > { %v1717_v31 = vmul.f32 %v1716_v30, %v1713_v14 }
 0x831   : > { %v1718_v32 = vpack.c.bf16 %v1717_v31, %v1717_v31 }
 0x833   : > { %2181 = vmatmul.mubr.bf16.vlgmr.msra.gmra.mrb[4].mxu1 %v1718_v32 }
 0x906   : > { %v1824_v60 = vpop.f32.mrb[4].mxu1 }
 0x907   : > { %v1825_v34 = vadd.f32 %v2012_v33, %v1824_v60  ;;  %v2182_v35 = vpop.f32.mrb[5].mxu1 }
 0x908   : > { %v1827_v36 = vpop.f32.mrb[6].mxu1 }
 0x909   : > { %v1830_v37 = vadd.f32 %v1825_v34, %v3083_v58  ;;  %v2183_v61 = vpop.f32.mrb[7].mxu1 }
 0x90b   : > { %1831 = vst.msk [vmem:[%s3245_s18] sm:$0xff] %vm512_vm0, %v1830_v37 }
 0x90c   : > { %2415 = shalt.err (!%p2412_p6)
}
 0x90d   : > { %s2416_s24 = scalar_lea.hbm %s3147_s25, 128  ;;  %s2420_s2 = scalar_lea.hbm %s3214_s15, 256 }
 0x90e   : > { %p2417_p7 = scmp.ne.s32.totalorder %s3147_s25, %s2416_s24  ;;  %p2421_p11 = scmp.lt.u32.totalorder %s3147_s25, %s3214_s15 }
 0x90f   : > { %p2422_p12 = scmp.lt.u32.totalorder %s2420_s2, %s2416_s24  ;;  %p2424_p0 = scmp.lt.u32.totalorder %s2416_s24, %s3147_s25 }
 0x910   : > { %p2418_p9 = pnand %p2417_p7, %p2720_p4 }
 0x911   : > { %p2423_p13 = por %p2422_p12, %p2421_p11 }
 0x912   : > { %p2419_p10 = pneg %p2418_p9 }
 0x913   : > { %p2425_p1 = por %p2424_p0, %p2423_p13 }
 0x915   : > { %p2426_p2 = pnand %p2425_p1, %p2419_p10 }
 0x917   : > { %2429 = shalt.err (!%p2426_p2)
}
 0x918   : > { %2184 = dma.vmem_to_hbm [thread:$0]  (%p2720_p4), %s3149_s0, 128, %s3147_s25, %s1833_s1  }
 0x919 PF: > { %s3247_s21 = sld [smem:[#allocation7_spill]]  ;;  %p2190_p3 = scmp.ge.s32.totalorder %s2532_s23, 2 }
 0x91b   : > { %p2187_p5 = pnand %p2190_p3, %p2727_p8 }
 0x91f   : > { %s1859_s26 = sand.u32 1, %s3247_s21  }
 0x920   : > { %s1860_s27 = scalar_lea.sflag [#allocation5], %s1859_s26 }
 0x921   : > { %2507 = dma.done.wait (!%p2187_p5), %s1860_s27, 128  }
 0x922   : > { %2509 = vsyncadd (!%p2187_p5), %s1860_s27, 4294967168  ;;  %s28_s23 = sadd.s32 1, %s2532_s23   ;;  %s3248_s28 = sld [smem:[#allocation8_spill]] }
 0x923   : > { %p25_p6 = scmp.ge.s32.totalorder %s28_s23, 4   ;;  %s3249_s18 = smov %s2516_s19 }
 0x924   : > { %s3250_s19 = smov %s2520_s20  ;;  %s3251_s20 = smov %s2733_s16 }
 0x925   : > { %s3252_s21 = smov %s2528_s22  ;;  %27 = sbr.rel (!%p25_p6) target bundleno = 9 (0x9), region = 146 }
 0x928   : > { %s3253_s22 = smov %s3248_s28 }
 0x92c   :  { %1865 = vsyncpa [#allocation5], 1 }
 0x92d   :  { %1867 = vsyncpa [#allocation5 + $0x1], 1 }

</bundles_post_ra>
